<compile_context>
chip_gen: v7x
topology: tpu7x:2x2x1
jax: 0.10.0
libtpu: 0.0.40
codegen_flags: <defaults>
</compile_context>

<pallas_src>
import functools

import jax
import jax.numpy as jnp
from jax import lax
from jax.experimental import pallas as pl
from jax.experimental.pallas import tpu as pltpu


def lstm_fc_kernel(x_ref, wih_ref, whh_ref, bias_ref, wfc_ref, out_ref,
                   h_sc, c_sc, *, unroll):
    """One (batch-block, time-chunk) grid step of the LSTM + final Linear.

    x_ref   : (tt, D, bb)  input chunk, time-major, features on sublanes,
                           batch on lanes (matmul_dtype)
    wih_ref : (4H, D)      input->hidden weight  (matmul_dtype)
    whh_ref : (4H, H)      hidden->hidden weight (matmul_dtype)
    bias_ref: (4H, 1)      b_ih + b_hh           (f32)
    wfc_ref : (O, H)       fc weight             (f32)
    out_ref : (O, bb)      fc(h_T), written only on the last time chunk
    h_sc/c_sc: (H, bb)     persistent f32 LSTM state scratch
    """
    tt = x_ref.shape[0]
    H, bb = h_sc.shape
    t_chunk = pl.program_id(1)

    # Fresh state at the start of every batch block's time sweep.
    @pl.when(t_chunk == 0)
    def _():
        h_sc[...] = jnp.zeros_like(h_sc)
        c_sc[...] = jnp.zeros_like(c_sc)

    # Hoisted: weights loaded and bias broadcast once per grid step.
    wih = wih_ref[...]
    whh = whh_ref[...]
    bias = jnp.broadcast_to(bias_ref[...], (4 * H, bb)).astype(jnp.float32)

    def sigmoid_via_tanh(z):
        # sigmoid(z) == 0.5 * (tanh(z / 2) + 1): 1 EUP push instead of 2.
        return 0.5 * jnp.tanh(0.5 * z) + 0.5

    def step(t, carry):
        h, c = carry                                   # f32, vreg-carried
        # Two MXU pushes per step; gates stacked on the sublane axis (4H, bb).
        gates = (jnp.dot(wih, x_ref[t], preferred_element_type=jnp.float32)
                 + jnp.dot(whh, h.astype(whh.dtype),
                           preferred_element_type=jnp.float32)
                 + bias)
        # 8-aligned sublane slices (H % 8 == 0) -> relayout-free vreg picks.
        i_g = sigmoid_via_tanh(gates[0 * H:1 * H, :])
        f_g = sigmoid_via_tanh(gates[1 * H:2 * H, :])
        g_g = jnp.tanh(gates[2 * H:3 * H, :])
        o_g = sigmoid_via_tanh(gates[3 * H:4 * H, :])
        c_new = f_g * c + i_g * g_g
        h_new = o_g * jnp.tanh(c_new)
        return h_new, c_new

    h_fin, c_fin = lax.fori_loop(
        0, tt, step, (h_sc[...], c_sc[...]), unroll=unroll)

    # Spill state to scratch once per chunk (not per timestep).
    h_sc[...] = h_fin
    c_sc[...] = c_fin

    @pl.when(t_chunk == pl.num_programs(1) - 1)
    def _():
        out_ref[...] = jnp.dot(
            wfc_ref[...], h_fin.astype(wfc_ref.dtype),
            preferred_element_type=jnp.float32).astype(out_ref.dtype)


def lstm_with_linear(x, w_ih, w_hh, b_ih, b_hh, w_fc, b_fc,
                     *, batch_block=None, time_block=None,
                     matmul_dtype=jnp.float32):
    """x: (B, T, D). Returns fc(h_T) with shape (B, O) (PyTorch squeeze(0))."""
    B, T, D = x.shape
    H4 = w_ih.shape[0]
    H = H4 // 4
    O = w_fc.shape[0]

    assert w_hh.shape == (H4, H) and w_fc.shape == (O, H)
    assert H % 8 == 0, "hidden_dim must be a multiple of 8 (f32 sublane slices)"

    # --- batch blocking: lane-dense blocks; nb>=2 spans both v7x TCs. ---
    if batch_block is None:
        bb = B
        if B % 256 == 0:
            bb = B // 2
        while bb > 512 and bb % 256 == 0:
            bb //= 2
    else:
        bb = batch_block
    assert B % bb == 0 and (bb == B or bb % 128 == 0), (
        "batch_block must divide B and be lane-dense (==B or a multiple of 128)")
    nb = B // bb

    # --- time chunking: cap the double-buffered x chunk at ~4 MiB. ---
    itm = jnp.dtype(matmul_dtype).itemsize
    if time_block is None:
        cap = (4 << 20) // max(1, 2 * D * max(bb, 128) * itm)
        tt = max(1, min(T, 512, cap))
    else:
        tt = max(1, min(time_block, T))
    while T % tt:                      # largest divisor of T not above the cap
        tt -= 1
    n_tc = T // tt

    # --- operand layouts ---
    # x: (B, T, D) -> (T, D, B): time-major, features on sublanes, batch lanes.
    xt = jnp.transpose(x, (1, 2, 0)).astype(matmul_dtype)
    wih = w_ih.astype(matmul_dtype)                      # (4H, D)
    whh = w_hh.astype(matmul_dtype)                      # (4H, H)
    bias = (b_ih + b_hh).reshape(H4, 1).astype(jnp.float32)
    wfc = w_fc.astype(jnp.float32)                       # (O, H)

    # --- VMEM budget for the chosen tiles (double buffers + weights + state) ---
    lane = lambda n: max(n, 128)
    sub = lambda n: max(n, 8)
    vmem_bytes = (2 * tt * sub(D) * lane(bb) * itm             # x chunk
                  + 2 * (H4 * lane(D) + H4 * lane(H)) * itm    # W_ih, W_hh
                  + 2 * (sub(O) * lane(H) + H4 * 128) * 4      # W_fc, bias
                  + 2 * sub(O) * lane(bb) * 4                  # out block
                  + 2 * sub(H) * lane(bb) * 4)                 # h/c scratch
    vmem_limit = int(min(max(2 * vmem_bytes + (8 << 20), 32 << 20), 56 << 20))

    kernel = functools.partial(lstm_fc_kernel, unroll=min(tt, 8))

    out = pl.pallas_call(
        kernel,
        out_shape=jax.ShapeDtypeStruct((O, B), jnp.float32),
        grid_spec=pltpu.PrefetchScalarGridSpec(
            num_scalar_prefetch=0,
            grid=(nb, n_tc),                 # batch parallel, time = reduction
            in_specs=[
                pl.BlockSpec((tt, D, bb), lambda b, t: (t, 0, b)),   # x chunk
                pl.BlockSpec((H4, D), lambda b, t: (0, 0)),          # W_ih
                pl.BlockSpec((H4, H), lambda b, t: (0, 0)),          # W_hh
                pl.BlockSpec((H4, 1), lambda b, t: (0, 0)),          # b_ih+b_hh
                pl.BlockSpec((O, H), lambda b, t: (0, 0)),           # W_fc
            ],
            out_specs=pl.BlockSpec((O, bb), lambda b, t: (0, b)),
            scratch_shapes=[
                pltpu.VMEM((H, bb), jnp.float32),   # h state
                pltpu.VMEM((H, bb), jnp.float32),   # c state
            ],
        ),
        compiler_params=pltpu.CompilerParams(
            dimension_semantics=("parallel", "arbitrary"),
            vmem_limit_bytes=vmem_limit),
    )(xt, wih, whh, bias, wfc)

    # fc bias added on the tiny (B, O) result (keeps a 1-lane tile out of VMEM).
    return (out.T + b_fc[None, :]).astype(x.dtype)


def reference(x, w_ih, w_hh, b_ih, b_hh, w_fc, b_fc):
    """Pure-JAX reference of the PyTorch forward (fc(h_t).squeeze(0))."""
    B, T, D = x.shape
    H = w_hh.shape[1]

    def step(carry, x_t):
        h, c = carry
        gates = x_t @ w_ih.T + h @ w_hh.T + b_ih + b_hh
        i, f, g, o = jnp.split(gates, 4, axis=-1)
        c = jax.nn.sigmoid(f) * c + jax.nn.sigmoid(i) * jnp.tanh(g)
        h = jax.nn.sigmoid(o) * jnp.tanh(c)
        return (h, c), None

    (h, _), _ = lax.scan(
        step,
        (jnp.zeros((B, H), x.dtype), jnp.zeros((B, H), x.dtype)),
        jnp.transpose(x, (1, 0, 2)))
    return h @ w_fc.T + b_fc   # (B, O)


if __name__ == "__main__":
    B, T = 2, 8            # batch, sequence length
    D, H, O = 16, 32, 8    # input_dim, hidden_dim, output_dim

    key = jax.random.PRNGKey(0)
    kx, k1, k2, k3, k4, k5, k6 = jax.random.split(key, 7)

    x = jax.random.normal(kx, (B, T, D), dtype=jnp.float32)

    # PyTorch-style uniform(-1/sqrt(H), 1/sqrt(H)) init, deterministic.
    bound = 1.0 / (H ** 0.5)
    w_ih = jax.random.uniform(k1, (4 * H, D), jnp.float32, -bound, bound)
    w_hh = jax.random.uniform(k2, (4 * H, H), jnp.float32, -bound, bound)
    b_ih = jax.random.uniform(k3, (4 * H,), jnp.float32, -bound, bound)
    b_hh = jax.random.uniform(k4, (4 * H,), jnp.float32, -bound, bound)
    w_fc = jax.random.uniform(k5, (O, H), jnp.float32, -bound, bound)
    b_fc = jax.random.uniform(k6, (O,), jnp.float32, -bound, bound)

    out = jax.jit(lstm_with_linear)(x, w_ih, w_hh, b_ih, b_hh, w_fc, b_fc)
    out = jax.block_until_ready(out)

    ref = reference(x, w_ih, w_hh, b_ih, b_hh, w_fc, b_fc)
    assert out.shape == (B, O), out.shape
    err = float(jnp.max(jnp.abs(out - ref)))
    assert err < 1e-4, f"max err {err}"

    print("KERNEL_OK")
</pallas_src>

<mosaic_0001>
module attributes {stable_mosaic.version = 11 : i64} {
  func.func @lstm_fc_kernel(%arg0: i32, %arg1: i32, %arg2: memref<8x16x2xf32, #tpu.memory_space<vmem>>, %arg3: memref<128x16xf32, #tpu.memory_space<vmem>>, %arg4: memref<128x32xf32, #tpu.memory_space<vmem>>, %arg5: memref<128x1xf32, #tpu.memory_space<vmem>>, %arg6: memref<8x32xf32, #tpu.memory_space<vmem>>, %arg7: memref<8x2xf32, #tpu.memory_space<vmem>>, %arg8: memref<32x2xf32, #tpu.memory_space<vmem>>, %arg9: memref<32x2xf32, #tpu.memory_space<vmem>>) attributes {dimension_semantics = [#tpu.dimension_semantics<parallel>, #tpu.dimension_semantics<arbitrary>], iteration_bounds = array<i64: 1, 1>, scalar_prefetch = 0 : i64, scratch_operands = 2 : i64, tpu.core_type = #tpu.core_type<tc>, window_params = [{transform_indices = @transform_0, window_bounds = array<i64: 8, 16, 2>}, {pipeline_mode = #tpu.pipeline_mode<synchronous>, transform_indices = @transform_1, window_bounds = array<i64: 128, 16>}, {pipeline_mode = #tpu.pipeline_mode<synchronous>, transform_indices = @transform_2, window_bounds = array<i64: 128, 32>}, {pipeline_mode = #tpu.pipeline_mode<synchronous>, transform_indices = @transform_3, window_bounds = array<i64: 128, 1>}, {pipeline_mode = #tpu.pipeline_mode<synchronous>, transform_indices = @transform_4, window_bounds = array<i64: 8, 32>}, {transform_indices = @transform_5, window_bounds = array<i64: 8, 2>}]} {
    %c0_i32 = arith.constant 0 : i32
    %0 = arith.cmpi eq, %arg1, %c0_i32 : i32
    %1 = arith.extui %0 : i1 to i32
    %c0_i32_0 = arith.constant 0 : i32
    %2 = arith.cmpi ne, %1, %c0_i32_0 : i32
    scf.if %2 {
      %cst_120 = arith.constant 0.000000e+00 : f32
      %319 = vector.broadcast %cst_120 : f32 to vector<32x2xf32>
      %c0_121 = arith.constant 0 : index
      %c0_122 = arith.constant 0 : index
      %320 = vector.load %arg8[%c0_121, %c0_122] : memref<32x2xf32, #tpu.memory_space<vmem>>, vector<32x2xf32>
      tpu.vector_store %arg8[%c0_121, %c0_122], %319 {strides = array<i32>} : memref<32x2xf32, #tpu.memory_space<vmem>>, vector<32x2xf32>,
      %cst_123 = arith.constant 0.000000e+00 : f32
      %321 = vector.broadcast %cst_123 : f32 to vector<32x2xf32>
      %c0_124 = arith.constant 0 : index
      %c0_125 = arith.constant 0 : index
      %322 = vector.load %arg9[%c0_124, %c0_125] : memref<32x2xf32, #tpu.memory_space<vmem>>, vector<32x2xf32>
      tpu.vector_store %arg9[%c0_124, %c0_125], %321 {strides = array<i32>} : memref<32x2xf32, #tpu.memory_space<vmem>>, vector<32x2xf32>,
    } else {
    }
    %c0 = arith.constant 0 : index
    %c0_1 = arith.constant 0 : index
    %3 = vector.load %arg3[%c0, %c0_1] : memref<128x16xf32, #tpu.memory_space<vmem>>, vector<128x16xf32>
    %c0_2 = arith.constant 0 : index
    %c0_3 = arith.constant 0 : index
    %4 = vector.load %arg4[%c0_2, %c0_3] : memref<128x32xf32, #tpu.memory_space<vmem>>, vector<128x32xf32>
    %c0_4 = arith.constant 0 : index
    %c0_5 = arith.constant 0 : index
    %5 = vector.load %arg5[%c0_4, %c0_5] : memref<128x1xf32, #tpu.memory_space<vmem>>, vector<128x1xf32>
    %6 = vector.shape_cast %5 : vector<128x1xf32> to vector<128x1xf32>
    %7 = vector.broadcast %6 : vector<128x1xf32> to vector<128x2xf32>
    %c0_6 = arith.constant 0 : index
    %c0_7 = arith.constant 0 : index
    %8 = vector.load %arg8[%c0_6, %c0_7] : memref<32x2xf32, #tpu.memory_space<vmem>>, vector<32x2xf32>
    %c0_8 = arith.constant 0 : index
    %c0_9 = arith.constant 0 : index
    %9 = vector.load %arg9[%c0_8, %c0_9] : memref<32x2xf32, #tpu.memory_space<vmem>>, vector<32x2xf32>
    %c0_i32_10 = arith.constant 0 : i32
    %10 = arith.index_cast %c0_i32_10 : i32 to index
    %c0_11 = arith.constant 0 : index
    %c0_12 = arith.constant 0 : index
    %11 = vector.load %arg2[%10, %c0_11, %c0_12] : memref<8x16x2xf32, #tpu.memory_space<vmem>>, vector<1x16x2xf32>
    %12 = vector.shape_cast %11 : vector<1x16x2xf32> to vector<16x2xf32>
    %cst = arith.constant dense<0.000000e+00> : vector<128x2xf32>
    %13 = tpu.matmul %3, %12, %cst {dimension_numbers = #tpu.dot_dimension_numbers<[1], [0], [0], [1], [0, 0, 1, 1], [], []>} : vector<128x16xf32>, vector<16x2xf32>, vector<128x2xf32> -> vector<128x2xf32>
    %cst_13 = arith.constant dense<0.000000e+00> : vector<128x2xf32>
    %14 = tpu.matmul %4, %8, %cst_13 {dimension_numbers = #tpu.dot_dimension_numbers<[1], [0], [0], [1], [0, 0, 1, 1], [], []>} : vector<128x32xf32>, vector<32x2xf32>, vector<128x2xf32> -> vector<128x2xf32>
    %15 = arith.addf %13, %14 : vector<128x2xf32>
    %16 = arith.addf %15, %7 : vector<128x2xf32>
    %17 = vector.extract_strided_slice %16 {offsets = [0, 0], sizes = [32, 2], strides = [1, 1]} : vector<128x2xf32> to vector<32x2xf32>
    %cst_14 = arith.constant 5.000000e-01 : f32
    %18 = vector.broadcast %cst_14 : f32 to vector<32x2xf32>
    %19 = arith.mulf %18, %17 : vector<32x2xf32>
    %20 = math.tanh %19 : vector<32x2xf32>
    %cst_15 = arith.constant 5.000000e-01 : f32
    %21 = vector.broadcast %cst_15 : f32 to vector<32x2xf32>
    %22 = arith.mulf %21, %20 : vector<32x2xf32>
    %cst_16 = arith.constant 5.000000e-01 : f32
    %23 = vector.broadcast %cst_16 : f32 to vector<32x2xf32>
    %24 = arith.addf %22, %23 : vector<32x2xf32>
    %25 = vector.extract_strided_slice %16 {offsets = [32, 0], sizes = [32, 2], strides = [1, 1]} : vector<128x2xf32> to vector<32x2xf32>
    %cst_17 = arith.constant 5.000000e-01 : f32
    %26 = vector.broadcast %cst_17 : f32 to vector<32x2xf32>
    %27 = arith.mulf %26, %25 : vector<32x2xf32>
    %28 = math.tanh %27 : vector<32x2xf32>
    %cst_18 = arith.constant 5.000000e-01 : f32
    %29 = vector.broadcast %cst_18 : f32 to vector<32x2xf32>
    %30 = arith.mulf %29, %28 : vector<32x2xf32>
    %cst_19 = arith.constant 5.000000e-01 : f32
    %31 = vector.broadcast %cst_19 : f32 to vector<32x2xf32>
    %32 = arith.addf %30, %31 : vector<32x2xf32>
    %33 = vector.extract_strided_slice %16 {offsets = [64, 0], sizes = [32, 2], strides = [1, 1]} : vector<128x2xf32> to vector<32x2xf32>
    %34 = math.tanh %33 : vector<32x2xf32>
    %35 = vector.extract_strided_slice %16 {offsets = [96, 0], sizes = [32, 2], strides = [1, 1]} : vector<128x2xf32> to vector<32x2xf32>
    %cst_20 = arith.constant 5.000000e-01 : f32
    %36 = vector.broadcast %cst_20 : f32 to vector<32x2xf32>
    %37 = arith.mulf %36, %35 : vector<32x2xf32>
    %38 = math.tanh %37 : vector<32x2xf32>
    %cst_21 = arith.constant 5.000000e-01 : f32
    %39 = vector.broadcast %cst_21 : f32 to vector<32x2xf32>
    %40 = arith.mulf %39, %38 : vector<32x2xf32>
    %cst_22 = arith.constant 5.000000e-01 : f32
    %41 = vector.broadcast %cst_22 : f32 to vector<32x2xf32>
    %42 = arith.addf %40, %41 : vector<32x2xf32>
    %43 = arith.mulf %32, %9 : vector<32x2xf32>
    %44 = arith.mulf %24, %34 : vector<32x2xf32>
    %45 = arith.addf %43, %44 : vector<32x2xf32>
    %46 = math.tanh %45 : vector<32x2xf32>
    %47 = arith.mulf %42, %46 : vector<32x2xf32>
    %c1_i32 = arith.constant 1 : i32
    %48 = arith.index_cast %c1_i32 : i32 to index
    %c0_23 = arith.constant 0 : index
    %c0_24 = arith.constant 0 : index
    %49 = vector.load %arg2[%48, %c0_23, %c0_24] : memref<8x16x2xf32, #tpu.memory_space<vmem>>, vector<1x16x2xf32>
    %50 = vector.shape_cast %49 : vector<1x16x2xf32> to vector<16x2xf32>
    %cst_25 = arith.constant dense<0.000000e+00> : vector<128x2xf32>
    %51 = tpu.matmul %3, %50, %cst_25 {dimension_numbers = #tpu.dot_dimension_numbers<[1], [0], [0], [1], [0, 0, 1, 1], [], []>} : vector<128x16xf32>, vector<16x2xf32>, vector<128x2xf32> -> vector<128x2xf32>
    %cst_26 = arith.constant dense<0.000000e+00> : vector<128x2xf32>
    %52 = tpu.matmul %4, %47, %cst_26 {dimension_numbers = #tpu.dot_dimension_numbers<[1], [0], [0], [1], [0, 0, 1, 1], [], []>} : vector<128x32xf32>, vector<32x2xf32>, vector<128x2xf32> -> vector<128x2xf32>
    %53 = arith.addf %51, %52 : vector<128x2xf32>
    %54 = arith.addf %53, %7 : vector<128x2xf32>
    %55 = vector.extract_strided_slice %54 {offsets = [0, 0], sizes = [32, 2], strides = [1, 1]} : vector<128x2xf32> to vector<32x2xf32>
    %cst_27 = arith.constant 5.000000e-01 : f32
    %56 = vector.broadcast %cst_27 : f32 to vector<32x2xf32>
    %57 = arith.mulf %56, %55 : vector<32x2xf32>
    %58 = math.tanh %57 : vector<32x2xf32>
    %cst_28 = arith.constant 5.000000e-01 : f32
    %59 = vector.broadcast %cst_28 : f32 to vector<32x2xf32>
    %60 = arith.mulf %59, %58 : vector<32x2xf32>
    %cst_29 = arith.constant 5.000000e-01 : f32
    %61 = vector.broadcast %cst_29 : f32 to vector<32x2xf32>
    %62 = arith.addf %60, %61 : vector<32x2xf32>
    %63 = vector.extract_strided_slice %54 {offsets = [32, 0], sizes = [32, 2], strides = [1, 1]} : vector<128x2xf32> to vector<32x2xf32>
    %cst_30 = arith.constant 5.000000e-01 : f32
    %64 = vector.broadcast %cst_30 : f32 to vector<32x2xf32>
    %65 = arith.mulf %64, %63 : vector<32x2xf32>
    %66 = math.tanh %65 : vector<32x2xf32>
    %cst_31 = arith.constant 5.000000e-01 : f32
    %67 = vector.broadcast %cst_31 : f32 to vector<32x2xf32>
    %68 = arith.mulf %67, %66 : vector<32x2xf32>
    %cst_32 = arith.constant 5.000000e-01 : f32
    %69 = vector.broadcast %cst_32 : f32 to vector<32x2xf32>
    %70 = arith.addf %68, %69 : vector<32x2xf32>
    %71 = vector.extract_strided_slice %54 {offsets = [64, 0], sizes = [32, 2], strides = [1, 1]} : vector<128x2xf32> to vector<32x2xf32>
    %72 = math.tanh %71 : vector<32x2xf32>
    %73 = vector.extract_strided_slice %54 {offsets = [96, 0], sizes = [32, 2], strides = [1, 1]} : vector<128x2xf32> to vector<32x2xf32>
    %cst_33 = arith.constant 5.000000e-01 : f32
    %74 = vector.broadcast %cst_33 : f32 to vector<32x2xf32>
    %75 = arith.mulf %74, %73 : vector<32x2xf32>
    %76 = math.tanh %75 : vector<32x2xf32>
    %cst_34 = arith.constant 5.000000e-01 : f32
    %77 = vector.broadcast %cst_34 : f32 to vector<32x2xf32>
    %78 = arith.mulf %77, %76 : vector<32x2xf32>
    %cst_35 = arith.constant 5.000000e-01 : f32
    %79 = vector.broadcast %cst_35 : f32 to vector<32x2xf32>
    %80 = arith.addf %78, %79 : vector<32x2xf32>
    %81 = arith.mulf %70, %45 : vector<32x2xf32>
    %82 = arith.mulf %62, %72 : vector<32x2xf32>
    %83 = arith.addf %81, %82 : vector<32x2xf32>
    %84 = math.tanh %83 : vector<32x2xf32>
    %85 = arith.mulf %80, %84 : vector<32x2xf32>
    %c2_i32 = arith.constant 2 : i32
    %86 = arith.index_cast %c2_i32 : i32 to index
    %c0_36 = arith.constant 0 : index
    %c0_37 = arith.constant 0 : index
    %87 = vector.load %arg2[%86, %c0_36, %c0_37] : memref<8x16x2xf32, #tpu.memory_space<vmem>>, vector<1x16x2xf32>
    %88 = vector.shape_cast %87 : vector<1x16x2xf32> to vector<16x2xf32>
    %cst_38 = arith.constant dense<0.000000e+00> : vector<128x2xf32>
    %89 = tpu.matmul %3, %88, %cst_38 {dimension_numbers = #tpu.dot_dimension_numbers<[1], [0], [0], [1], [0, 0, 1, 1], [], []>} : vector<128x16xf32>, vector<16x2xf32>, vector<128x2xf32> -> vector<128x2xf32>
    %cst_39 = arith.constant dense<0.000000e+00> : vector<128x2xf32>
    %90 = tpu.matmul %4, %85, %cst_39 {dimension_numbers = #tpu.dot_dimension_numbers<[1], [0], [0], [1], [0, 0, 1, 1], [], []>} : vector<128x32xf32>, vector<32x2xf32>, vector<128x2xf32> -> vector<128x2xf32>
    %91 = arith.addf %89, %90 : vector<128x2xf32>
    %92 = arith.addf %91, %7 : vector<128x2xf32>
    %93 = vector.extract_strided_slice %92 {offsets = [0, 0], sizes = [32, 2], strides = [1, 1]} : vector<128x2xf32> to vector<32x2xf32>
    %cst_40 = arith.constant 5.000000e-01 : f32
    %94 = vector.broadcast %cst_40 : f32 to vector<32x2xf32>
    %95 = arith.mulf %94, %93 : vector<32x2xf32>
    %96 = math.tanh %95 : vector<32x2xf32>
    %cst_41 = arith.constant 5.000000e-01 : f32
    %97 = vector.broadcast %cst_41 : f32 to vector<32x2xf32>
    %98 = arith.mulf %97, %96 : vector<32x2xf32>
    %cst_42 = arith.constant 5.000000e-01 : f32
    %99 = vector.broadcast %cst_42 : f32 to vector<32x2xf32>
    %100 = arith.addf %98, %99 : vector<32x2xf32>
    %101 = vector.extract_strided_slice %92 {offsets = [32, 0], sizes = [32, 2], strides = [1, 1]} : vector<128x2xf32> to vector<32x2xf32>
    %cst_43 = arith.constant 5.000000e-01 : f32
    %102 = vector.broadcast %cst_43 : f32 to vector<32x2xf32>
    %103 = arith.mulf %102, %101 : vector<32x2xf32>
    %104 = math.tanh %103 : vector<32x2xf32>
    %cst_44 = arith.constant 5.000000e-01 : f32
    %105 = vector.broadcast %cst_44 : f32 to vector<32x2xf32>
    %106 = arith.mulf %105, %104 : vector<32x2xf32>
    %cst_45 = arith.constant 5.000000e-01 : f32
    %107 = vector.broadcast %cst_45 : f32 to vector<32x2xf32>
    %108 = arith.addf %106, %107 : vector<32x2xf32>
    %109 = vector.extract_strided_slice %92 {offsets = [64, 0], sizes = [32, 2], strides = [1, 1]} : vector<128x2xf32> to vector<32x2xf32>
    %110 = math.tanh %109 : vector<32x2xf32>
    %111 = vector.extract_strided_slice %92 {offsets = [96, 0], sizes = [32, 2], strides = [1, 1]} : vector<128x2xf32> to vector<32x2xf32>
    %cst_46 = arith.constant 5.000000e-01 : f32
    %112 = vector.broadcast %cst_46 : f32 to vector<32x2xf32>
    %113 = arith.mulf %112, %111 : vector<32x2xf32>
    %114 = math.tanh %113 : vector<32x2xf32>
    %cst_47 = arith.constant 5.000000e-01 : f32
    %115 = vector.broadcast %cst_47 : f32 to vector<32x2xf32>
    %116 = arith.mulf %115, %114 : vector<32x2xf32>
    %cst_48 = arith.constant 5.000000e-01 : f32
    %117 = vector.broadcast %cst_48 : f32 to vector<32x2xf32>
    %118 = arith.addf %116, %117 : vector<32x2xf32>
    %119 = arith.mulf %108, %83 : vector<32x2xf32>
    %120 = arith.mulf %100, %110 : vector<32x2xf32>
    %121 = arith.addf %119, %120 : vector<32x2xf32>
    %122 = math.tanh %121 : vector<32x2xf32>
    %123 = arith.mulf %118, %122 : vector<32x2xf32>
    %c3_i32 = arith.constant 3 : i32
    %124 = arith.index_cast %c3_i32 : i32 to index
    %c0_49 = arith.constant 0 : index
    %c0_50 = arith.constant 0 : index
    %125 = vector.load %arg2[%124, %c0_49, %c0_50] : memref<8x16x2xf32, #tpu.memory_space<vmem>>, vector<1x16x2xf32>
    %126 = vector.shape_cast %125 : vector<1x16x2xf32> to vector<16x2xf32>
    %cst_51 = arith.constant dense<0.000000e+00> : vector<128x2xf32>
    %127 = tpu.matmul %3, %126, %cst_51 {dimension_numbers = #tpu.dot_dimension_numbers<[1], [0], [0], [1], [0, 0, 1, 1], [], []>} : vector<128x16xf32>, vector<16x2xf32>, vector<128x2xf32> -> vector<128x2xf32>
    %cst_52 = arith.constant dense<0.000000e+00> : vector<128x2xf32>
    %128 = tpu.matmul %4, %123, %cst_52 {dimension_numbers = #tpu.dot_dimension_numbers<[1], [0], [0], [1], [0, 0, 1, 1], [], []>} : vector<128x32xf32>, vector<32x2xf32>, vector<128x2xf32> -> vector<128x2xf32>
    %129 = arith.addf %127, %128 : vector<128x2xf32>
    %130 = arith.addf %129, %7 : vector<128x2xf32>
    %131 = vector.extract_strided_slice %130 {offsets = [0, 0], sizes = [32, 2], strides = [1, 1]} : vector<128x2xf32> to vector<32x2xf32>
    %cst_53 = arith.constant 5.000000e-01 : f32
    %132 = vector.broadcast %cst_53 : f32 to vector<32x2xf32>
    %133 = arith.mulf %132, %131 : vector<32x2xf32>
    %134 = math.tanh %133 : vector<32x2xf32>
    %cst_54 = arith.constant 5.000000e-01 : f32
    %135 = vector.broadcast %cst_54 : f32 to vector<32x2xf32>
    %136 = arith.mulf %135, %134 : vector<32x2xf32>
    %cst_55 = arith.constant 5.000000e-01 : f32
    %137 = vector.broadcast %cst_55 : f32 to vector<32x2xf32>
    %138 = arith.addf %136, %137 : vector<32x2xf32>
    %139 = vector.extract_strided_slice %130 {offsets = [32, 0], sizes = [32, 2], strides = [1, 1]} : vector<128x2xf32> to vector<32x2xf32>
    %cst_56 = arith.constant 5.000000e-01 : f32
    %140 = vector.broadcast %cst_56 : f32 to vector<32x2xf32>
    %141 = arith.mulf %140, %139 : vector<32x2xf32>
    %142 = math.tanh %141 : vector<32x2xf32>
    %cst_57 = arith.constant 5.000000e-01 : f32
    %143 = vector.broadcast %cst_57 : f32 to vector<32x2xf32>
    %144 = arith.mulf %143, %142 : vector<32x2xf32>
    %cst_58 = arith.constant 5.000000e-01 : f32
    %145 = vector.broadcast %cst_58 : f32 to vector<32x2xf32>
    %146 = arith.addf %144, %145 : vector<32x2xf32>
    %147 = vector.extract_strided_slice %130 {offsets = [64, 0], sizes = [32, 2], strides = [1, 1]} : vector<128x2xf32> to vector<32x2xf32>
    %148 = math.tanh %147 : vector<32x2xf32>
    %149 = vector.extract_strided_slice %130 {offsets = [96, 0], sizes = [32, 2], strides = [1, 1]} : vector<128x2xf32> to vector<32x2xf32>
    %cst_59 = arith.constant 5.000000e-01 : f32
    %150 = vector.broadcast %cst_59 : f32 to vector<32x2xf32>
    %151 = arith.mulf %150, %149 : vector<32x2xf32>
    %152 = math.tanh %151 : vector<32x2xf32>
    %cst_60 = arith.constant 5.000000e-01 : f32
    %153 = vector.broadcast %cst_60 : f32 to vector<32x2xf32>
    %154 = arith.mulf %153, %152 : vector<32x2xf32>
    %cst_61 = arith.constant 5.000000e-01 : f32
    %155 = vector.broadcast %cst_61 : f32 to vector<32x2xf32>
    %156 = arith.addf %154, %155 : vector<32x2xf32>
    %157 = arith.mulf %146, %121 : vector<32x2xf32>
    %158 = arith.mulf %138, %148 : vector<32x2xf32>
    %159 = arith.addf %157, %158 : vector<32x2xf32>
    %160 = math.tanh %159 : vector<32x2xf32>
    %161 = arith.mulf %156, %160 : vector<32x2xf32>
    %c4_i32 = arith.constant 4 : i32
    %162 = arith.index_cast %c4_i32 : i32 to index
    %c0_62 = arith.constant 0 : index
    %c0_63 = arith.constant 0 : index
    %163 = vector.load %arg2[%162, %c0_62, %c0_63] : memref<8x16x2xf32, #tpu.memory_space<vmem>>, vector<1x16x2xf32>
    %164 = vector.shape_cast %163 : vector<1x16x2xf32> to vector<16x2xf32>
    %cst_64 = arith.constant dense<0.000000e+00> : vector<128x2xf32>
    %165 = tpu.matmul %3, %164, %cst_64 {dimension_numbers = #tpu.dot_dimension_numbers<[1], [0], [0], [1], [0, 0, 1, 1], [], []>} : vector<128x16xf32>, vector<16x2xf32>, vector<128x2xf32> -> vector<128x2xf32>
    %cst_65 = arith.constant dense<0.000000e+00> : vector<128x2xf32>
    %166 = tpu.matmul %4, %161, %cst_65 {dimension_numbers = #tpu.dot_dimension_numbers<[1], [0], [0], [1], [0, 0, 1, 1], [], []>} : vector<128x32xf32>, vector<32x2xf32>, vector<128x2xf32> -> vector<128x2xf32>
    %167 = arith.addf %165, %166 : vector<128x2xf32>
    %168 = arith.addf %167, %7 : vector<128x2xf32>
    %169 = vector.extract_strided_slice %168 {offsets = [0, 0], sizes = [32, 2], strides = [1, 1]} : vector<128x2xf32> to vector<32x2xf32>
    %cst_66 = arith.constant 5.000000e-01 : f32
    %170 = vector.broadcast %cst_66 : f32 to vector<32x2xf32>
    %171 = arith.mulf %170, %169 : vector<32x2xf32>
    %172 = math.tanh %171 : vector<32x2xf32>
    %cst_67 = arith.constant 5.000000e-01 : f32
    %173 = vector.broadcast %cst_67 : f32 to vector<32x2xf32>
    %174 = arith.mulf %173, %172 : vector<32x2xf32>
    %cst_68 = arith.constant 5.000000e-01 : f32
    %175 = vector.broadcast %cst_68 : f32 to vector<32x2xf32>
    %176 = arith.addf %174, %175 : vector<32x2xf32>
    %177 = vector.extract_strided_slice %168 {offsets = [32, 0], sizes = [32, 2], strides = [1, 1]} : vector<128x2xf32> to vector<32x2xf32>
    %cst_69 = arith.constant 5.000000e-01 : f32
    %178 = vector.broadcast %cst_69 : f32 to vector<32x2xf32>
    %179 = arith.mulf %178, %177 : vector<32x2xf32>
    %180 = math.tanh %179 : vector<32x2xf32>
    %cst_70 = arith.constant 5.000000e-01 : f32
    %181 = vector.broadcast %cst_70 : f32 to vector<32x2xf32>
    %182 = arith.mulf %181, %180 : vector<32x2xf32>
    %cst_71 = arith.constant 5.000000e-01 : f32
    %183 = vector.broadcast %cst_71 : f32 to vector<32x2xf32>
    %184 = arith.addf %182, %183 : vector<32x2xf32>
    %185 = vector.extract_strided_slice %168 {offsets = [64, 0], sizes = [32, 2], strides = [1, 1]} : vector<128x2xf32> to vector<32x2xf32>
    %186 = math.tanh %185 : vector<32x2xf32>
    %187 = vector.extract_strided_slice %168 {offsets = [96, 0], sizes = [32, 2], strides = [1, 1]} : vector<128x2xf32> to vector<32x2xf32>
    %cst_72 = arith.constant 5.000000e-01 : f32
    %188 = vector.broadcast %cst_72 : f32 to vector<32x2xf32>
    %189 = arith.mulf %188, %187 : vector<32x2xf32>
    %190 = math.tanh %189 : vector<32x2xf32>
    %cst_73 = arith.constant 5.000000e-01 : f32
    %191 = vector.broadcast %cst_73 : f32 to vector<32x2xf32>
    %192 = arith.mulf %191, %190 : vector<32x2xf32>
    %cst_74 = arith.constant 5.000000e-01 : f32
    %193 = vector.broadcast %cst_74 : f32 to vector<32x2xf32>
    %194 = arith.addf %192, %193 : vector<32x2xf32>
    %195 = arith.mulf %184, %159 : vector<32x2xf32>
    %196 = arith.mulf %176, %186 : vector<32x2xf32>
    %197 = arith.addf %195, %196 : vector<32x2xf32>
    %198 = math.tanh %197 : vector<32x2xf32>
    %199 = arith.mulf %194, %198 : vector<32x2xf32>
    %c5_i32 = arith.constant 5 : i32
    %200 = arith.index_cast %c5_i32 : i32 to index
    %c0_75 = arith.constant 0 : index
    %c0_76 = arith.constant 0 : index
    %201 = vector.load %arg2[%200, %c0_75, %c0_76] : memref<8x16x2xf32, #tpu.memory_space<vmem>>, vector<1x16x2xf32>
    %202 = vector.shape_cast %201 : vector<1x16x2xf32> to vector<16x2xf32>
    %cst_77 = arith.constant dense<0.000000e+00> : vector<128x2xf32>
    %203 = tpu.matmul %3, %202, %cst_77 {dimension_numbers = #tpu.dot_dimension_numbers<[1], [0], [0], [1], [0, 0, 1, 1], [], []>} : vector<128x16xf32>, vector<16x2xf32>, vector<128x2xf32> -> vector<128x2xf32>
    %cst_78 = arith.constant dense<0.000000e+00> : vector<128x2xf32>
    %204 = tpu.matmul %4, %199, %cst_78 {dimension_numbers = #tpu.dot_dimension_numbers<[1], [0], [0], [1], [0, 0, 1, 1], [], []>} : vector<128x32xf32>, vector<32x2xf32>, vector<128x2xf32> -> vector<128x2xf32>
    %205 = arith.addf %203, %204 : vector<128x2xf32>
    %206 = arith.addf %205, %7 : vector<128x2xf32>
    %207 = vector.extract_strided_slice %206 {offsets = [0, 0], sizes = [32, 2], strides = [1, 1]} : vector<128x2xf32> to vector<32x2xf32>
    %cst_79 = arith.constant 5.000000e-01 : f32
    %208 = vector.broadcast %cst_79 : f32 to vector<32x2xf32>
    %209 = arith.mulf %208, %207 : vector<32x2xf32>
    %210 = math.tanh %209 : vector<32x2xf32>
    %cst_80 = arith.constant 5.000000e-01 : f32
    %211 = vector.broadcast %cst_80 : f32 to vector<32x2xf32>
    %212 = arith.mulf %211, %210 : vector<32x2xf32>
    %cst_81 = arith.constant 5.000000e-01 : f32
    %213 = vector.broadcast %cst_81 : f32 to vector<32x2xf32>
    %214 = arith.addf %212, %213 : vector<32x2xf32>
    %215 = vector.extract_strided_slice %206 {offsets = [32, 0], sizes = [32, 2], strides = [1, 1]} : vector<128x2xf32> to vector<32x2xf32>
    %cst_82 = arith.constant 5.000000e-01 : f32
    %216 = vector.broadcast %cst_82 : f32 to vector<32x2xf32>
    %217 = arith.mulf %216, %215 : vector<32x2xf32>
    %218 = math.tanh %217 : vector<32x2xf32>
    %cst_83 = arith.constant 5.000000e-01 : f32
    %219 = vector.broadcast %cst_83 : f32 to vector<32x2xf32>
    %220 = arith.mulf %219, %218 : vector<32x2xf32>
    %cst_84 = arith.constant 5.000000e-01 : f32
    %221 = vector.broadcast %cst_84 : f32 to vector<32x2xf32>
    %222 = arith.addf %220, %221 : vector<32x2xf32>
    %223 = vector.extract_strided_slice %206 {offsets = [64, 0], sizes = [32, 2], strides = [1, 1]} : vector<128x2xf32> to vector<32x2xf32>
    %224 = math.tanh %223 : vector<32x2xf32>
    %225 = vector.extract_strided_slice %206 {offsets = [96, 0], sizes = [32, 2], strides = [1, 1]} : vector<128x2xf32> to vector<32x2xf32>
    %cst_85 = arith.constant 5.000000e-01 : f32
    %226 = vector.broadcast %cst_85 : f32 to vector<32x2xf32>
    %227 = arith.mulf %226, %225 : vector<32x2xf32>
    %228 = math.tanh %227 : vector<32x2xf32>
    %cst_86 = arith.constant 5.000000e-01 : f32
    %229 = vector.broadcast %cst_86 : f32 to vector<32x2xf32>
    %230 = arith.mulf %229, %228 : vector<32x2xf32>
    %cst_87 = arith.constant 5.000000e-01 : f32
    %231 = vector.broadcast %cst_87 : f32 to vector<32x2xf32>
    %232 = arith.addf %230, %231 : vector<32x2xf32>
    %233 = arith.mulf %222, %197 : vector<32x2xf32>
    %234 = arith.mulf %214, %224 : vector<32x2xf32>
    %235 = arith.addf %233, %234 : vector<32x2xf32>
    %236 = math.tanh %235 : vector<32x2xf32>
    %237 = arith.mulf %232, %236 : vector<32x2xf32>
    %c6_i32 = arith.constant 6 : i32
    %238 = arith.index_cast %c6_i32 : i32 to index
    %c0_88 = arith.constant 0 : index
    %c0_89 = arith.constant 0 : index
    %239 = vector.load %arg2[%238, %c0_88, %c0_89] : memref<8x16x2xf32, #tpu.memory_space<vmem>>, vector<1x16x2xf32>
    %240 = vector.shape_cast %239 : vector<1x16x2xf32> to vector<16x2xf32>
    %cst_90 = arith.constant dense<0.000000e+00> : vector<128x2xf32>
    %241 = tpu.matmul %3, %240, %cst_90 {dimension_numbers = #tpu.dot_dimension_numbers<[1], [0], [0], [1], [0, 0, 1, 1], [], []>} : vector<128x16xf32>, vector<16x2xf32>, vector<128x2xf32> -> vector<128x2xf32>
    %cst_91 = arith.constant dense<0.000000e+00> : vector<128x2xf32>
    %242 = tpu.matmul %4, %237, %cst_91 {dimension_numbers = #tpu.dot_dimension_numbers<[1], [0], [0], [1], [0, 0, 1, 1], [], []>} : vector<128x32xf32>, vector<32x2xf32>, vector<128x2xf32> -> vector<128x2xf32>
    %243 = arith.addf %241, %242 : vector<128x2xf32>
    %244 = arith.addf %243, %7 : vector<128x2xf32>
    %245 = vector.extract_strided_slice %244 {offsets = [0, 0], sizes = [32, 2], strides = [1, 1]} : vector<128x2xf32> to vector<32x2xf32>
    %cst_92 = arith.constant 5.000000e-01 : f32
    %246 = vector.broadcast %cst_92 : f32 to vector<32x2xf32>
    %247 = arith.mulf %246, %245 : vector<32x2xf32>
    %248 = math.tanh %247 : vector<32x2xf32>
    %cst_93 = arith.constant 5.000000e-01 : f32
    %249 = vector.broadcast %cst_93 : f32 to vector<32x2xf32>
    %250 = arith.mulf %249, %248 : vector<32x2xf32>
    %cst_94 = arith.constant 5.000000e-01 : f32
    %251 = vector.broadcast %cst_94 : f32 to vector<32x2xf32>
    %252 = arith.addf %250, %251 : vector<32x2xf32>
    %253 = vector.extract_strided_slice %244 {offsets = [32, 0], sizes = [32, 2], strides = [1, 1]} : vector<128x2xf32> to vector<32x2xf32>
    %cst_95 = arith.constant 5.000000e-01 : f32
    %254 = vector.broadcast %cst_95 : f32 to vector<32x2xf32>
    %255 = arith.mulf %254, %253 : vector<32x2xf32>
    %256 = math.tanh %255 : vector<32x2xf32>
    %cst_96 = arith.constant 5.000000e-01 : f32
    %257 = vector.broadcast %cst_96 : f32 to vector<32x2xf32>
    %258 = arith.mulf %257, %256 : vector<32x2xf32>
    %cst_97 = arith.constant 5.000000e-01 : f32
    %259 = vector.broadcast %cst_97 : f32 to vector<32x2xf32>
    %260 = arith.addf %258, %259 : vector<32x2xf32>
    %261 = vector.extract_strided_slice %244 {offsets = [64, 0], sizes = [32, 2], strides = [1, 1]} : vector<128x2xf32> to vector<32x2xf32>
    %262 = math.tanh %261 : vector<32x2xf32>
    %263 = vector.extract_strided_slice %244 {offsets = [96, 0], sizes = [32, 2], strides = [1, 1]} : vector<128x2xf32> to vector<32x2xf32>
    %cst_98 = arith.constant 5.000000e-01 : f32
    %264 = vector.broadcast %cst_98 : f32 to vector<32x2xf32>
    %265 = arith.mulf %264, %263 : vector<32x2xf32>
    %266 = math.tanh %265 : vector<32x2xf32>
    %cst_99 = arith.constant 5.000000e-01 : f32
    %267 = vector.broadcast %cst_99 : f32 to vector<32x2xf32>
    %268 = arith.mulf %267, %266 : vector<32x2xf32>
    %cst_100 = arith.constant 5.000000e-01 : f32
    %269 = vector.broadcast %cst_100 : f32 to vector<32x2xf32>
    %270 = arith.addf %268, %269 : vector<32x2xf32>
    %271 = arith.mulf %260, %235 : vector<32x2xf32>
    %272 = arith.mulf %252, %262 : vector<32x2xf32>
    %273 = arith.addf %271, %272 : vector<32x2xf32>
    %274 = math.tanh %273 : vector<32x2xf32>
    %275 = arith.mulf %270, %274 : vector<32x2xf32>
    %c7_i32 = arith.constant 7 : i32
    %276 = arith.index_cast %c7_i32 : i32 to index
    %c0_101 = arith.constant 0 : index
    %c0_102 = arith.constant 0 : index
    %277 = vector.load %arg2[%276, %c0_101, %c0_102] : memref<8x16x2xf32, #tpu.memory_space<vmem>>, vector<1x16x2xf32>
    %278 = vector.shape_cast %277 : vector<1x16x2xf32> to vector<16x2xf32>
    %cst_103 = arith.constant dense<0.000000e+00> : vector<128x2xf32>
    %279 = tpu.matmul %3, %278, %cst_103 {dimension_numbers = #tpu.dot_dimension_numbers<[1], [0], [0], [1], [0, 0, 1, 1], [], []>} : vector<128x16xf32>, vector<16x2xf32>, vector<128x2xf32> -> vector<128x2xf32>
    %cst_104 = arith.constant dense<0.000000e+00> : vector<128x2xf32>
    %280 = tpu.matmul %4, %275, %cst_104 {dimension_numbers = #tpu.dot_dimension_numbers<[1], [0], [0], [1], [0, 0, 1, 1], [], []>} : vector<128x32xf32>, vector<32x2xf32>, vector<128x2xf32> -> vector<128x2xf32>
    %281 = arith.addf %279, %280 : vector<128x2xf32>
    %282 = arith.addf %281, %7 : vector<128x2xf32>
    %283 = vector.extract_strided_slice %282 {offsets = [0, 0], sizes = [32, 2], strides = [1, 1]} : vector<128x2xf32> to vector<32x2xf32>
    %cst_105 = arith.constant 5.000000e-01 : f32
    %284 = vector.broadcast %cst_105 : f32 to vector<32x2xf32>
    %285 = arith.mulf %284, %283 : vector<32x2xf32>
    %286 = math.tanh %285 : vector<32x2xf32>
    %cst_106 = arith.constant 5.000000e-01 : f32
    %287 = vector.broadcast %cst_106 : f32 to vector<32x2xf32>
    %288 = arith.mulf %287, %286 : vector<32x2xf32>
    %cst_107 = arith.constant 5.000000e-01 : f32
    %289 = vector.broadcast %cst_107 : f32 to vector<32x2xf32>
    %290 = arith.addf %288, %289 : vector<32x2xf32>
    %291 = vector.extract_strided_slice %282 {offsets = [32, 0], sizes = [32, 2], strides = [1, 1]} : vector<128x2xf32> to vector<32x2xf32>
    %cst_108 = arith.constant 5.000000e-01 : f32
    %292 = vector.broadcast %cst_108 : f32 to vector<32x2xf32>
    %293 = arith.mulf %292, %291 : vector<32x2xf32>
    %294 = math.tanh %293 : vector<32x2xf32>
    %cst_109 = arith.constant 5.000000e-01 : f32
    %295 = vector.broadcast %cst_109 : f32 to vector<32x2xf32>
    %296 = arith.mulf %295, %294 : vector<32x2xf32>
    %cst_110 = arith.constant 5.000000e-01 : f32
    %297 = vector.broadcast %cst_110 : f32 to vector<32x2xf32>
    %298 = arith.addf %296, %297 : vector<32x2xf32>
    %299 = vector.extract_strided_slice %282 {offsets = [64, 0], sizes = [32, 2], strides = [1, 1]} : vector<128x2xf32> to vector<32x2xf32>
    %300 = math.tanh %299 : vector<32x2xf32>
    %301 = vector.extract_strided_slice %282 {offsets = [96, 0], sizes = [32, 2], strides = [1, 1]} : vector<128x2xf32> to vector<32x2xf32>
    %cst_111 = arith.constant 5.000000e-01 : f32
    %302 = vector.broadcast %cst_111 : f32 to vector<32x2xf32>
    %303 = arith.mulf %302, %301 : vector<32x2xf32>
    %304 = math.tanh %303 : vector<32x2xf32>
    %cst_112 = arith.constant 5.000000e-01 : f32
    %305 = vector.broadcast %cst_112 : f32 to vector<32x2xf32>
    %306 = arith.mulf %305, %304 : vector<32x2xf32>
    %cst_113 = arith.constant 5.000000e-01 : f32
    %307 = vector.broadcast %cst_113 : f32 to vector<32x2xf32>
    %308 = arith.addf %306, %307 : vector<32x2xf32>
    %309 = arith.mulf %298, %273 : vector<32x2xf32>
    %310 = arith.mulf %290, %300 : vector<32x2xf32>
    %311 = arith.addf %309, %310 : vector<32x2xf32>
    %312 = math.tanh %311 : vector<32x2xf32>
    %313 = arith.mulf %308, %312 : vector<32x2xf32>
    %c8_i32 = arith.constant 8 : i32
    %c0_114 = arith.constant 0 : index
    %c0_115 = arith.constant 0 : index
    %314 = vector.load %arg8[%c0_114, %c0_115] : memref<32x2xf32, #tpu.memory_space<vmem>>, vector<32x2xf32>
    tpu.vector_store %arg8[%c0_114, %c0_115], %313 {strides = array<i32>} : memref<32x2xf32, #tpu.memory_space<vmem>>, vector<32x2xf32>,
    %c0_116 = arith.constant 0 : index
    %c0_117 = arith.constant 0 : index
    %315 = vector.load %arg9[%c0_116, %c0_117] : memref<32x2xf32, #tpu.memory_space<vmem>>, vector<32x2xf32>
    tpu.vector_store %arg9[%c0_116, %c0_117], %311 {strides = array<i32>} : memref<32x2xf32, #tpu.memory_space<vmem>>, vector<32x2xf32>,
    %c0_i32_118 = arith.constant 0 : i32
    %316 = arith.cmpi eq, %arg1, %c0_i32_118 : i32
    %317 = arith.extui %316 : i1 to i32
    %c0_i32_119 = arith.constant 0 : i32
    %318 = arith.cmpi ne, %317, %c0_i32_119 : i32
    scf.if %318 {
      %c0_120 = arith.constant 0 : index
      %c0_121 = arith.constant 0 : index
      %319 = vector.load %arg6[%c0_120, %c0_121] : memref<8x32xf32, #tpu.memory_space<vmem>>, vector<8x32xf32>
      %cst_122 = arith.constant dense<0.000000e+00> : vector<8x2xf32>
      %320 = tpu.matmul %319, %313, %cst_122 {dimension_numbers = #tpu.dot_dimension_numbers<[1], [0], [0], [1], [0, 0, 1, 1], [], []>} : vector<8x32xf32>, vector<32x2xf32>, vector<8x2xf32> -> vector<8x2xf32>
      %c0_123 = arith.constant 0 : index
      %c0_124 = arith.constant 0 : index
      %321 = vector.load %arg7[%c0_123, %c0_124] : memref<8x2xf32, #tpu.memory_space<vmem>>, vector<8x2xf32>
      tpu.vector_store %arg7[%c0_123, %c0_124], %320 {strides = array<i32>} : memref<8x2xf32, #tpu.memory_space<vmem>>, vector<8x2xf32>,
    } else {
    }
    return
  }
  func.func @transform_0(%arg0: i32, %arg1: i32) -> (i32, i32, i32) {
    %c0_i32 = arith.constant 0 : i32
    %c0_i32_0 = arith.constant 0 : i32
    return %arg1, %c0_i32, %arg0 : i32, i32, i32
  }
  func.func @transform_1(%arg0: i32, %arg1: i32) -> (i32, i32) {
    %c0_i32 = arith.constant 0 : i32
    %c0_i32_0 = arith.constant 0 : i32
    %c0_i32_1 = arith.constant 0 : i32
    return %c0_i32, %c0_i32_0 : i32, i32
  }
  func.func @transform_2(%arg0: i32, %arg1: i32) -> (i32, i32) {
    %c0_i32 = arith.constant 0 : i32
    %c0_i32_0 = arith.constant 0 : i32
    %c0_i32_1 = arith.constant 0 : i32
    return %c0_i32, %c0_i32_0 : i32, i32
  }
  func.func @transform_3(%arg0: i32, %arg1: i32) -> (i32, i32) {
    %c0_i32 = arith.constant 0 : i32
    %c0_i32_0 = arith.constant 0 : i32
    %c0_i32_1 = arith.constant 0 : i32
    return %c0_i32, %c0_i32_0 : i32, i32
  }
  func.func @transform_4(%arg0: i32, %arg1: i32) -> (i32, i32) {
    %c0_i32 = arith.constant 0 : i32
    %c0_i32_0 = arith.constant 0 : i32
    %c0_i32_1 = arith.constant 0 : i32
    return %c0_i32, %c0_i32_0 : i32, i32
  }
  func.func @transform_5(%arg0: i32, %arg1: i32) -> (i32, i32) {
    %c0_i32 = arith.constant 0 : i32
    %c0_i32_0 = arith.constant 0 : i32
    return %c0_i32, %arg0 : i32, i32
  }
}

</mosaic_0001>

<bundles_post_ra>
// kernel: lstm_with_linear.1
= control target key start
LH: loop header
LB: loop body
LE: loop exit
PB: predicated region body
PF: predicated region fallthrough
CT: control target
= control target key end

     0   :  { %vm24_vm0 = vcmask 15360   ;;  %vm171_vm1 = vcmask 261120   ;;  %v6432_v0 = vmov 0.0   ;;  %v5096_v2 = vmov 0   ;;  %s6426_s2 = inlined_call_operand.vmem [shape: f32[128,32], index: 2, kind: input, shape index: {}]   ;;  %s6427_s0 = inlined_call_operand.vmem [shape: f32[8,16,2], index: 0, kind: input, shape index: {}]   ;;  %s6428_s3 = inlined_call_operand.vmem [shape: f32[128,1], index: 3, kind: input, shape index: {}]   ;;  %s6429_s1 = inlined_call_operand.vmem [shape: f32[128,16], index: 1, kind: input, shape index: {}]   ;;  %s6430_s4 = inlined_call_operand.vmem [shape: f32[8,32], index: 4, kind: input, shape index: {}]   ;;  %s6431_s5 = inlined_call_operand.vmem [shape: f32[8,2], index: 5, kind: output, shape index: {}]  }
   0x1   :  { %25 = vst.msk [vmem:[#allocation2] sm:$0xff] %vm24_vm0, %v6432_v0  ;;  %26 = vst.msk [vmem:[#allocation2 + $0x8] sm:$0xff] %vm24_vm0, %v6432_v0  ;;  %v5148_v1 = vld [vmem:[%s6426_s2] sm:$0xff]  ;;  %4711 = vset.pattern.permute.xlu1 %v5096_v2  ;;  %4710 = vset.pattern.permute.xlu0 %v5096_v2  ;;  %v170_v10 = vld [vmem:[%s6427_s0 + $0x8] sm:$0xff]  ;;  %vm365_vm2 = vcmask 130048   ;;  %vm5098_vm3 = vmmov 0  }
   0x2   :  { %27 = vst.msk [vmem:[#allocation2 + $0x10] sm:$0xff] %vm24_vm0, %v6432_v0  ;;  %28 = vst.msk [vmem:[#allocation2 + $0x18] sm:$0xff] %vm24_vm0, %v6432_v0  ;;  %3993 = vmatprep.mubr.msk.f32.mxu0 %vm171_vm1, %v5148_v1  ;;  %4053 = vmatprep.mubr.msk.f32.mxu1 %vm171_vm1, %v5148_v1  ;;  %v169_v9 = vld [vmem:[%s6427_s0] sm:$0xff]  ;;  %v70_v14 = vld [vmem:[%s6428_s3 + $0x28] sm:$0xff] }
   0x3   :  { %29 = vst.msk [vmem:[#allocation3] sm:$0xff] %vm24_vm0, %v6432_v0  ;;  %30 = vst.msk [vmem:[#allocation3 + $0x8] sm:$0xff] %vm24_vm0, %v6432_v0  ;;  %v4484_v11 = vpack.c.bf16 %v170_v10, %v169_v9  ;;  %v69_v12 = vld [vmem:[%s6428_s3 + $0x20] sm:$0xff]  ;;  %v5172_v15 = vld [vmem:[%s6426_s2 + $0x8] sm:$0xff] }
   0x4   :  { %31 = vst.msk [vmem:[#allocation3 + $0x10] sm:$0xff] %vm24_vm0, %v6432_v0  ;;  %32 = vst.msk [vmem:[#allocation3 + $0x18] sm:$0xff] %vm24_vm0, %v6432_v0  ;;  %103 = vperm.xlu1 %4711, %v69_v12   ;;  %v65_v13 = vld [vmem:[%s6428_s3] sm:$0xff]  ;;  %v66_v16 = vld [vmem:[%s6428_s3 + $0x8] sm:$0xff] }
   0x5   :  { %6481 = vst [vmem:[#allocation4_spill] sm:$0xff] %v5148_v1  ;;  %83 = vperm.xlu0 %4710, %v65_v13   ;;  %v5180_v17 = vld [vmem:[%s6426_s2 + $0x10] sm:$0xff]  ;;  %v68_v18 = vld [vmem:[%s6428_s3 + $0x18] sm:$0xff]  ;;  %v5200_v21 = vld [vmem:[%s6426_s2 + $0x20] sm:$0xff] }
   0x6   :  { %v5192_v19 = vld [vmem:[%s6426_s2 + $0x18] sm:$0xff]  ;;  %v67_v20 = vld [vmem:[%s6428_s3 + $0x10] sm:$0xff]  ;;  %v5212_v23 = vld [vmem:[%s6426_s2 + $0x28] sm:$0xff] }
   0x7   :  { %v72_v22 = vld [vmem:[%s6428_s3 + $0x38] sm:$0xff]  ;;  %v71_v24 = vld [vmem:[%s6428_s3 + $0x30] sm:$0xff]  ;;  %v74_v26 = vld [vmem:[%s6428_s3 + $0x48] sm:$0xff] }
   0x8   :  { %v161_v3 = vld [vmem:[#allocation2] sm:$0xff]  ;;  %v162_v4 = vld [vmem:[#allocation2 + $0x8] sm:$0xff]  ;;  %108 = vperm.xlu1 %4711, %v70_v14   ;;  %v5220_v25 = vld [vmem:[%s6426_s2 + $0x30] sm:$0xff] }
   0x9   :  { %v163_v5 = vld [vmem:[#allocation2 + $0x10] sm:$0xff]  ;;  %v4476_v6 = vpack.c.bf16 %v162_v4, %v161_v3  ;;  %v164_v7 = vld [vmem:[#allocation2 + $0x18] sm:$0xff]  ;;  %88 = vperm.xlu0 %4710, %v66_v16   ;;  %v73_v28 = vld [vmem:[%s6428_s3 + $0x40] sm:$0xff] }
   0xa   :  { %v4480_v8 = vpack.c.bf16 %v164_v7, %v163_v5  ;;  %v5232_v27 = vld [vmem:[%s6426_s2 + $0x38] sm:$0xff]  ;;  %v5240_v29 = vld [vmem:[%s6426_s2 + $0x40] sm:$0xff]  ;;  %v5252_v31 = vld [vmem:[%s6426_s2 + $0x48] sm:$0xff] }
   0xb   :  { %4477 = vmatprep.subr.bf16.mxu0 %v4476_v6  ;;  %v76_v30 = vld [vmem:[%s6428_s3 + $0x58] sm:$0xff]  ;;  %v75_v32 = vld [vmem:[%s6428_s3 + $0x50] sm:$0xff]  ;;  %v78_v34 = vld [vmem:[%s6428_s3 + $0x68] sm:$0xff] }
   0xc   :  { %4479 = vmatpush3.bf16.msra.mxu0 %v4476_v6  ;;  %98 = vperm.xlu1 %4711, %v68_v18   ;;  %v5260_v33 = vld [vmem:[%s6426_s2 + $0x50] sm:$0xff]  ;;  %v5272_v35 = vld [vmem:[%s6426_s2 + $0x58] sm:$0xff]  ;;  %v77_v36 = vld [vmem:[%s6428_s3 + $0x60] sm:$0xff] }
   0xd   :  { %4481 = vmatprep.subr.bf16.mxu0 %v4480_v8  ;;  %93 = vperm.xlu0 %4710, %v67_v20   ;;  %v5280_v37 = vld [vmem:[%s6426_s2 + $0x60] sm:$0xff]  ;;  %v80_v38 = vld [vmem:[%s6428_s3 + $0x78] sm:$0xff]  ;;  %v5292_v39 = vld [vmem:[%s6426_s2 + $0x68] sm:$0xff] }
   0xe   :  { %v79_v40 = vld [vmem:[%s6428_s3 + $0x70] sm:$0xff]  ;;  %v5309_v42 = vld [vmem:[%s6426_s2 + $0x78] sm:$0xff]  ;;  %v5314_v43 = vld [vmem:[%s6429_s1] sm:$0xff] }
   0xf   :  { %v5300_v41 = vld [vmem:[%s6426_s2 + $0x70] sm:$0xff]  ;;  %v5323_v44 = vld [vmem:[%s6429_s1 + $0x8] sm:$0xff]  ;;  %v5337_v46 = vld [vmem:[%s6429_s1 + $0x18] sm:$0xff] }
  0x10   :  { %4483 = vmatpush3.bf16.msra.mxu0 %v4480_v8  ;;  %118 = vperm.xlu1 %4711, %v72_v22   ;;  %v5328_v45 = vld [vmem:[%s6429_s1 + $0x10] sm:$0xff]  ;;  %v5342_v47 = vld [vmem:[%s6429_s1 + $0x20] sm:$0xff]  ;;  %v5351_v48 = vld [vmem:[%s6429_s1 + $0x28] sm:$0xff] }
  0x11   :  { %4485 = vmatprep.subr.bf16.mxu0 %v4484_v11  ;;  %113 = vperm.xlu0 %4710, %v71_v24   ;;  %v5356_v49 = vld [vmem:[%s6429_s1 + $0x30] sm:$0xff]  ;;  %v5365_v50 = vld [vmem:[%s6429_s1 + $0x38] sm:$0xff]  ;;  %v5370_v51 = vld [vmem:[%s6429_s1 + $0x40] sm:$0xff] }
  0x12   :  { %v5379_v52 = vld [vmem:[%s6429_s1 + $0x48] sm:$0xff]  ;;  %v5384_v53 = vld [vmem:[%s6429_s1 + $0x50] sm:$0xff]  ;;  %v5393_v54 = vld [vmem:[%s6429_s1 + $0x58] sm:$0xff] }
  0x13   :  { %3994 = vmatmul.mubr.msk.f32.vlgmr.msra.gmra.mrb[0].mxu0 %vm171_vm1, %v5172_v15  ;;  %v5398_v55 = vld [vmem:[%s6429_s1 + $0x60] sm:$0xff]  ;;  %v5407_v56 = vld [vmem:[%s6429_s1 + $0x68] sm:$0xff]  ;;  %v5412_v57 = vld [vmem:[%s6429_s1 + $0x70] sm:$0xff] }
  0x14   :  { %3996 = vmatprep.mubr.msk.f32.mxu0 %vm171_vm1, %v5180_v17  ;;  %4487 = vmatpush3.bf16.msra.mxu0 %v4484_v11  ;;  %v5421_v58 = vld [vmem:[%s6429_s1 + $0x78] sm:$0xff] }
  0x15   :  { %128 = vperm.xlu1 %4711, %v74_v26   ;;  %123 = vperm.xlu0 %4710, %v73_v28  }
  0x17   :  { %3997 = vmatmul.mubr.msk.f32.gmra.mrb[2].mxu0 %vm171_vm1, %v5192_v19 }
  0x18   :  { %3999 = vmatprep.mubr.msk.f32.mxu0 %vm171_vm1, %v5200_v21 }
  0x19   :  { %138 = vperm.xlu1 %4711, %v76_v30   ;;  %133 = vperm.xlu0 %4710, %v75_v32  }
  0x1b   :  { %4000 = vmatmul.mubr.msk.f32.gmra.mrb[4].mxu0 %vm171_vm1, %v5212_v23 }
  0x1c   :  { %4002 = vmatprep.mubr.msk.f32.mxu0 %vm171_vm1, %v5220_v25 }
  0x1d   :  { %148 = vperm.xlu1 %4711, %v78_v34   ;;  %143 = vperm.xlu0 %4710, %v77_v36  }
  0x1f   :  { %4003 = vmatmul.mubr.msk.f32.gmra.mrb[6].mxu0 %vm171_vm1, %v5232_v27 }
  0x20   :  { %4005 = vmatprep.mubr.msk.f32.mxu0 %vm171_vm1, %v5240_v29 }
  0x21   :  { %158 = vperm.xlu1 %4711, %v80_v38   ;;  %153 = vperm.xlu0 %4710, %v79_v40  }
  0x23   :  { %4006 = vmatmul.mubr.msk.f32.gmra.mrb[8].mxu0 %vm171_vm1, %v5252_v31 }
  0x24   :  { %4008 = vmatprep.mubr.msk.f32.mxu0 %vm171_vm1, %v5260_v33 }
  0x27   :  { %4009 = vmatmul.mubr.msk.f32.gmra.mrb[10].mxu0 %vm171_vm1, %v5272_v35 }
  0x28   :  { %4011 = vmatprep.mubr.msk.f32.mxu0 %vm171_vm1, %v5280_v37 }
  0x2b   :  { %4012 = vmatmul.mubr.msk.f32.gmra.mrb[12].mxu0 %vm171_vm1, %v5292_v39 }
  0x2c   :  { %4014 = vmatprep.mubr.msk.f32.mxu0 %vm171_vm1, %v5300_v41 }
  0x2f   :  { %4015 = vmatmul.mubr.msk.f32.gmra.mrb[14].mxu0 %vm171_vm1, %v5309_v42 }
  0x30   :  { %4021 = vmatprep.mubr.msk.f32.mxu0 %vm365_vm2, %v5314_v43 }
  0x33   :  { %4022 = vmatmul.mubr.msk.f32.vlgmr.msra.gmra.mrb[0].mxu0 %vm365_vm2, %v5323_v44 }
  0x34   :  { %4024 = vmatprep.mubr.msk.f32.mxu0 %vm365_vm2, %v5328_v45 }
  0x37   :  { %4025 = vmatmul.mubr.msk.f32.gmra.mrb[2].mxu0 %vm365_vm2, %v5337_v46 }
  0x38   :  { %4027 = vmatprep.mubr.msk.f32.mxu0 %vm365_vm2, %v5342_v47 }
  0x3b   :  { %4028 = vmatmul.mubr.msk.f32.gmra.mrb[4].mxu0 %vm365_vm2, %v5351_v48 }
  0x3c   :  { %4030 = vmatprep.mubr.msk.f32.mxu0 %vm365_vm2, %v5356_v49 }
  0x3f   :  { %4031 = vmatmul.mubr.msk.f32.gmra.mrb[6].mxu0 %vm365_vm2, %v5365_v50 }
  0x40   :  { %4033 = vmatprep.mubr.msk.f32.mxu0 %vm365_vm2, %v5370_v51 }
  0x43   :  { %4034 = vmatmul.mubr.msk.f32.gmra.mrb[8].mxu0 %vm365_vm2, %v5379_v52 }
  0x44   :  { %4036 = vmatprep.mubr.msk.f32.mxu0 %vm365_vm2, %v5384_v53 }
  0x47   :  { %4037 = vmatmul.mubr.msk.f32.gmra.mrb[10].mxu0 %vm365_vm2, %v5393_v54 }
  0x48   :  { %4039 = vmatprep.mubr.msk.f32.mxu0 %vm365_vm2, %v5398_v55 }
  0x4b   :  { %4040 = vmatmul.mubr.msk.f32.gmra.mrb[12].mxu0 %vm365_vm2, %v5407_v56 }
  0x4c   :  { %4042 = vmatprep.mubr.msk.f32.mxu0 %vm365_vm2, %v5412_v57 }
  0x4f   :  { %4043 = vmatmul.mubr.msk.f32.gmra.mrb[14].mxu0 %vm365_vm2, %v5421_v58 }
  0x50   :  { %4113 = vmatprep.mubr.msk.f32.mxu0 %vm171_vm1, %v5148_v1 }
  0x83   :  { %v5427_v59 = vpop.permute.xlu1 %103 }
  0x84   :  { %6482 = vst [vmem:[#allocation5_spill] sm:$0xff] %v5427_v59  ;;  %v5429_v60 = vpop.permute.xlu0 %83 }
  0x85   :  { %6483 = vst [vmem:[#allocation6_spill] sm:$0xff] %v5429_v60 }
  0x87   :  { %v5431_v61 = vpop.permute.xlu1 %108 }
  0x88   :  { %6484 = vst [vmem:[#allocation7_spill] sm:$0xff] %v5431_v61  ;;  %v5433_v62 = vpop.permute.xlu0 %88 }
  0x89   :  { %6485 = vst [vmem:[#allocation8_spill] sm:$0xff] %v5433_v62 }
  0x8b   :  { %v5435_v63 = vpop.permute.xlu1 %98 }
  0x8c   :  { %6486 = vst [vmem:[#allocation9_spill] sm:$0xff] %v5435_v63  ;;  %v5437_v2 = vpop.permute.xlu0 %93 }
  0x8d   :  { %6487 = vst [vmem:[#allocation10_spill] sm:$0xff] %v5437_v2 }
  0x8f   :  { %v5441_v7 = vpop.permute.xlu1 %118 }
  0x90   :  { %6488 = vst [vmem:[#allocation11_spill] sm:$0xff] %v5441_v7  ;;  %v5443_v9 = vpop.permute.xlu0 %113 }
  0x91   :  { %6489 = vst [vmem:[#allocation12_spill] sm:$0xff] %v5443_v9 }
  0x94   :  { %v5448_v24 = vpop.permute.xlu1 %128  ;;  %v5451_v28 = vpop.permute.xlu0 %123 }
  0x95   :  { %6490 = vst [vmem:[#allocation13_spill] sm:$0xff] %v5448_v24  ;;  %6491 = vst [vmem:[#allocation14_spill] sm:$0xff] %v5451_v28 }
 0x106   :  { %v4023_v3 = vpop.f32.mrb[0].mxu0 }
 0x107   :  { %v560_v4 = vadd.f32 %v4023_v3, %v5433_v62  ;;  %v480_v5 = vpop.f32.mrb[1].mxu0 }
 0x108   :  { %v559_v6 = vadd.f32 %v480_v5, %v5429_v60  ;;  %v5455_v5 = vpop.permute.xlu1 %138  ;;  %v167_v60 = vld [vmem:[#allocation3 + $0x10] sm:$0xff] }
 0x109   :  { %v576_v10 = vmul.f32 0.5, %v560_v4  ;;  %6492 = vst [vmem:[#allocation15_spill] sm:$0xff] %v5455_v5 }
 0x10a   :  { %v4026_v8 = vpop.f32.mrb[2].mxu0  ;;  %v575_v13 = vmul.f32 0.5, %v559_v6 }
 0x10b   :  { %v562_v11 = vadd.f32 %v4026_v8, %v5435_v63  ;;  %v490_v12 = vpop.f32.mrb[3].mxu0  ;;  %4712 = vtanh.f32 %v576_v10  ;;  %v5457_v10 = vpop.permute.xlu0 %133 }
 0x10c   :  { %v561_v14 = vadd.f32 %v490_v12, %v5437_v2  ;;  %4714 = vtanh.f32 %v575_v13  ;;  %6493 = vst [vmem:[#allocation16_spill] sm:$0xff] %v5457_v10 }
 0x10d   :  { %v578_v16 = vmul.f32 0.5, %v562_v11 }
 0x10e   :  { %v4029_v18 = vpop.f32.mrb[4].mxu0  ;;  %v577_v30 = vmul.f32 0.5, %v561_v14 }
 0x10f   :  { %v564_v20 = vadd.f32 %v4029_v18, %v5431_v61  ;;  %v500_v22 = vpop.f32.mrb[5].mxu0  ;;  %4716 = vtanh.f32 %v578_v16 }
 0x110   :  { %v563_v26 = vadd.f32 %v500_v22, %v5427_v59 }
 0x111   :  { %v592_v32 = vmul.f32 0.5, %v564_v20 }
 0x112   :  { %v591_v34 = vmul.f32 0.5, %v563_v26  ;;  %v4032_v36 = vpop.f32.mrb[6].mxu0 }
 0x113   :  { %4718 = vtanh.f32 %v592_v32  ;;  %v566_v38 = vadd.f32 %v4032_v36, %v5441_v7  ;;  %v510_v40 = vpop.f32.mrb[7].mxu0  ;;  %v5465_v36 = vpop.permute.xlu0 %143 }
 0x114   :  { %4720 = vtanh.f32 %v591_v34  ;;  %v565_v3 = vadd.f32 %v510_v40, %v5443_v9  ;;  %6495 = vst [vmem:[#allocation18_spill] sm:$0xff] %v5465_v36  ;;  %v165_v9 = vld [vmem:[#allocation3] sm:$0xff] }
 0x115   :  { %4722 = vtanh.f32 %v577_v30  ;;  %v594_v4 = vmul.f32 0.5, %v566_v38  ;;  %v4713_v14 = vpop.eup %4712  ;;  %v5462_v30 = vpop.permute.xlu1 %148 }
 0x116   :  { %v593_v6 = vmul.f32 0.5, %v565_v3  ;;  %v4035_v8 = vpop.f32.mrb[8].mxu0  ;;  %v4715_v16 = vpop.eup %4714  ;;  %6494 = vst [vmem:[#allocation17_spill] sm:$0xff] %v5462_v30  ;;  %v584_v38 = vmul.f32 0.5, %v4713_v14 }
 0x117   :  { %4724 = vtanh.f32 %v594_v4  ;;  %v568_v11 = vadd.f32 %v4035_v8, %v5448_v24  ;;  %v520_v12 = vpop.f32.mrb[9].mxu0  ;;  %v583_v40 = vmul.f32 0.5, %v4715_v16 }
 0x118   :  { %4726 = vtanh.f32 %v593_v6  ;;  %v567_v13 = vadd.f32 %v520_v12, %v5451_v28 }
 0x119   :  { %4728 = vtanh.f32 %v568_v11  ;;  %v4717_v26 = vpop.eup %4716  ;;  %v587_v28 = vadd.f32 0.5, %v583_v40 }
 0x11a   :  { %4730 = vtanh.f32 %v567_v13  ;;  %v4038_v18 = vpop.f32.mrb[10].mxu0 }
 0x11b   :  { %v570_v20 = vadd.f32 %v4038_v18, %v5455_v5  ;;  %v530_v22 = vpop.f32.mrb[11].mxu0  ;;  %v166_v18 = vld [vmem:[#allocation3 + $0x8] sm:$0xff] }
 0x11c   :  { %v569_v32 = vadd.f32 %v530_v22, %v5457_v10  ;;  %v588_v10 = vadd.f32 0.5, %v584_v38 }
 0x11d   :  { %v4719_v34 = vpop.eup %4718  ;;  %4732 = vtanh.f32 %v570_v20  ;;  %v5469_v20 = vpop.permute.xlu1 %158 }
 0x11e   :  { %v4721_v3 = vpop.eup %4720  ;;  %v600_v4 = vmul.f32 0.5, %v4719_v34  ;;  %4734 = vtanh.f32 %v569_v32  ;;  %v4041_v6 = vpop.f32.mrb[12].mxu0  ;;  %v586_v34 = vmul.f32 0.5, %v4717_v26 }
 0x11f   :  { %v4723_v8 = vpop.eup %4722  ;;  %v599_v11 = vmul.f32 0.5, %v4721_v3  ;;  %v572_v12 = vadd.f32 %v4041_v6, %v5462_v30  ;;  %v540_v13 = vpop.f32.mrb[13].mxu0 }
 0x120   :  { %v604_v0 = vadd.f32 0.5, %v600_v4  ;;  %v571_v5 = vadd.f32 %v540_v13, %v5465_v36  ;;  %v585_v32 = vmul.f32 0.5, %v4723_v8  ;;  %v5471_v30 = vpop.permute.xlu0 %153  ;;  %v168_v36 = vld [vmem:[#allocation3 + $0x18] sm:$0xff]  ;;  %v590_v63 = vadd.f32 0.5, %v586_v34 }
 0x121   :  { %v4725_v22 = vpop.eup %4724  ;;  %v603_v24 = vadd.f32 0.5, %v599_v11  ;;  %v612_v14 = vmul.f32 0.5, %v572_v12 }
 0x122   :  { %v4727_v16 = vpop.eup %4726  ;;  %v602_v7 = vmul.f32 0.5, %v4725_v22  ;;  %v611_v3 = vmul.f32 0.5, %v571_v5  ;;  %v4044_v59 = vpop.f32.mrb[14].mxu0  ;;  %v628_v4 = vmul.f32 %v604_v0, %v166_v18 }
 0x123   :  { %v4729_v6 = vpop.eup %4728  ;;  %v601_v61 = vmul.f32 0.5, %v4727_v16  ;;  %4736 = vtanh.f32 %v612_v14  ;;  %v574_v38 = vadd.f32 %v4044_v59, %v5469_v20  ;;  %v550_v40 = vpop.f32.mrb[15].mxu0  ;;  %v627_v8 = vmul.f32 %v603_v24, %v165_v9 }
 0x124   :  { %v4731_v11 = vpop.eup %4730  ;;  %v606_v12 = vadd.f32 0.5, %v602_v7  ;;  %v632_v13 = vmul.f32 %v4729_v6, %v588_v10  ;;  %4738 = vtanh.f32 %v611_v3  ;;  %v573_v26 = vadd.f32 %v550_v40, %v5471_v30 }
 0x125   :  { %v605_v22 = vadd.f32 0.5, %v601_v61  ;;  %v631_v5 = vmul.f32 %v4731_v11, %v587_v28  ;;  %v614_v2 = vmul.f32 0.5, %v574_v38  ;;  %v589_v14 = vadd.f32 0.5, %v585_v32 }
 0x126   :  { %v5475_v62 = vadd.f32 %v632_v13, %v628_v4  ;;  %v613_v0 = vmul.f32 0.5, %v573_v26  ;;  %v630_v10 = vmul.f32 %v606_v12, %v168_v36 }
 0x127   :  { %v4733_v18 = vpop.eup %4732  ;;  %v5477_v59 = vadd.f32 %v631_v5, %v627_v8  ;;  %4740 = vtanh.f32 %v614_v2  ;;  %v629_v3 = vmul.f32 %v605_v22, %v167_v60 }
 0x128   :  { %v4735_v7 = vpop.eup %4734  ;;  %v634_v16 = vmul.f32 %v4733_v18, %v590_v63  ;;  %4742 = vtanh.f32 %v613_v0 }
 0x129   :  { %v633_v9 = vmul.f32 %v4735_v7, %v589_v14  ;;  %4744 = vtanh.f32 %v5477_v59  ;;  %v3437_v7 = vld [vmem:[%s6427_s0 + $0x10] sm:$0xff] }
 0x12a   :  { %v5480_v61 = vadd.f32 %v634_v16, %v630_v10  ;;  %4746 = vtanh.f32 %v5475_v62  ;;  %v3438_v10 = vld [vmem:[%s6427_s0 + $0x18] sm:$0xff] }
 0x12b   :  { %v5483_v24 = vadd.f32 %v633_v9, %v629_v3  ;;  %v4496_v3 = vpack.c.bf16 %v3438_v10, %v3437_v7 }
 0x12c   :  { %4748 = vtanh.f32 %v5480_v61 }
 0x12d   :  { %v4737_v28 = vpop.eup %4736  ;;  %4750 = vtanh.f32 %v5483_v24 }
 0x12e   :  { %v4739_v2 = vpop.eup %4738  ;;  %v620_v34 = vmul.f32 0.5, %v4737_v28  ;;  %v6496_v28 = vld [vmem:[#allocation8_spill] sm:$0xff] }
 0x12f   :  { %v619_v36 = vmul.f32 0.5, %v4739_v2 }
 0x130   :  { %v624_v32 = vadd.f32 0.5, %v620_v34 }
 0x131   :  { %v4741_v63 = vpop.eup %4740  ;;  %v623_v60 = vadd.f32 0.5, %v619_v36  ;;  %v6497_v36 = vld [vmem:[#allocation6_spill] sm:$0xff] }
 0x132   :  { %v4743_v6 = vpop.eup %4742  ;;  %v622_v4 = vmul.f32 0.5, %v4741_v63 }
 0x133   :  { %v4745_v38 = vpop.eup %4744  ;;  %v621_v40 = vmul.f32 0.5, %v4743_v6  ;;  %v6498_v6 = vld [vmem:[#allocation9_spill] sm:$0xff] }
 0x134   :  { %v4747_v11 = vpop.eup %4746  ;;  %v626_v12 = vadd.f32 0.5, %v622_v4  ;;  %v643_v13 = vmul.f32 %v4745_v38, %v623_v60 }
 0x135   :  { %v625_v26 = vadd.f32 0.5, %v621_v40  ;;  %v644_v8 = vmul.f32 %v4747_v11, %v624_v32  ;;  %v6499_v11 = vld [vmem:[#allocation10_spill] sm:$0xff] }
 0x136   :  { %v4749_v22 = vpop.eup %4748 }
 0x137   :  { %v4751_v5 = vpop.eup %4750  ;;  %v4488_v0 = vpack.c.bf16 %v644_v8, %v643_v13  ;;  %v646_v18 = vmul.f32 %v4749_v22, %v626_v12  ;;  %v6500_v8 = vld [vmem:[#allocation7_spill] sm:$0xff] }
 0x138   :  { %v645_v14 = vmul.f32 %v4751_v5, %v625_v26 }
 0x139   :  { %4489 = vmatprep.subr.bf16.mxu1 %v4488_v0 }
 0x13a   :  { %4491 = vmatpush3.bf16.msra.mxu1 %v4488_v0  ;;  %v4492_v16 = vpack.c.bf16 %v646_v18, %v645_v14  ;;  %v6501_v0 = vld [vmem:[#allocation5_spill] sm:$0xff] }
 0x13c   :  { %4493 = vmatprep.subr.bf16.mxu1 %v4492_v16 }
 0x13e   :  { %4495 = vmatpush3.bf16.msra.mxu1 %v4492_v16 }
 0x13f   :  { %4497 = vmatprep.subr.bf16.mxu1 %v4496_v3 }
 0x141   :  { %4054 = vmatmul.mubr.msk.f32.vlgmr.msra.gmra.mrb[0].mxu1 %vm171_vm1, %v5172_v15 }
 0x142   :  { %4056 = vmatprep.mubr.msk.f32.mxu1 %vm171_vm1, %v5180_v17  ;;  %4499 = vmatpush3.bf16.msra.mxu1 %v4496_v3  ;;  %v6502_v3 = vld [vmem:[#allocation11_spill] sm:$0xff] }
 0x145   :  { %4057 = vmatmul.mubr.msk.f32.gmra.mrb[2].mxu1 %vm171_vm1, %v5192_v19 }
 0x146   :  { %4059 = vmatprep.mubr.msk.f32.mxu1 %vm171_vm1, %v5200_v21 }
 0x149   :  { %4060 = vmatmul.mubr.msk.f32.gmra.mrb[4].mxu1 %vm171_vm1, %v5212_v23 }
 0x14a   :  { %4062 = vmatprep.mubr.msk.f32.mxu1 %vm171_vm1, %v5220_v25 }
 0x14d   :  { %4063 = vmatmul.mubr.msk.f32.gmra.mrb[6].mxu1 %vm171_vm1, %v5232_v27 }
 0x14e   :  { %4065 = vmatprep.mubr.msk.f32.mxu1 %vm171_vm1, %v5240_v29 }
 0x151   :  { %4066 = vmatmul.mubr.msk.f32.gmra.mrb[8].mxu1 %vm171_vm1, %v5252_v31 }
 0x152   :  { %4068 = vmatprep.mubr.msk.f32.mxu1 %vm171_vm1, %v5260_v33 }
 0x155   :  { %4069 = vmatmul.mubr.msk.f32.gmra.mrb[10].mxu1 %vm171_vm1, %v5272_v35 }
 0x156   :  { %4071 = vmatprep.mubr.msk.f32.mxu1 %vm171_vm1, %v5280_v37 }
 0x159   :  { %4072 = vmatmul.mubr.msk.f32.gmra.mrb[12].mxu1 %vm171_vm1, %v5292_v39 }
 0x15a   :  { %4074 = vmatprep.mubr.msk.f32.mxu1 %vm171_vm1, %v5300_v41 }
 0x15d   :  { %4075 = vmatmul.mubr.msk.f32.gmra.mrb[14].mxu1 %vm171_vm1, %v5309_v42 }
 0x15e   :  { %4081 = vmatprep.mubr.msk.f32.mxu1 %vm365_vm2, %v5314_v43 }
 0x161   :  { %4082 = vmatmul.mubr.msk.f32.vlgmr.msra.gmra.mrb[0].mxu1 %vm365_vm2, %v5323_v44 }
 0x162   :  { %4084 = vmatprep.mubr.msk.f32.mxu1 %vm365_vm2, %v5328_v45 }
 0x165   :  { %4085 = vmatmul.mubr.msk.f32.gmra.mrb[2].mxu1 %vm365_vm2, %v5337_v46 }
 0x166   :  { %4087 = vmatprep.mubr.msk.f32.mxu1 %vm365_vm2, %v5342_v47 }
 0x169   :  { %4088 = vmatmul.mubr.msk.f32.gmra.mrb[4].mxu1 %vm365_vm2, %v5351_v48 }
 0x16a   :  { %4090 = vmatprep.mubr.msk.f32.mxu1 %vm365_vm2, %v5356_v49 }
 0x16d   :  { %4091 = vmatmul.mubr.msk.f32.gmra.mrb[6].mxu1 %vm365_vm2, %v5365_v50 }
 0x16e   :  { %4093 = vmatprep.mubr.msk.f32.mxu1 %vm365_vm2, %v5370_v51 }
 0x171   :  { %4094 = vmatmul.mubr.msk.f32.gmra.mrb[8].mxu1 %vm365_vm2, %v5379_v52 }
 0x172   :  { %4096 = vmatprep.mubr.msk.f32.mxu1 %vm365_vm2, %v5384_v53 }
 0x175   :  { %4097 = vmatmul.mubr.msk.f32.gmra.mrb[10].mxu1 %vm365_vm2, %v5393_v54 }
 0x176   :  { %4099 = vmatprep.mubr.msk.f32.mxu1 %vm365_vm2, %v5398_v55 }
 0x179   :  { %4100 = vmatmul.mubr.msk.f32.gmra.mrb[12].mxu1 %vm365_vm2, %v5407_v56 }
 0x17a   :  { %4102 = vmatprep.mubr.msk.f32.mxu1 %vm365_vm2, %v5412_v57 }
 0x17d   :  { %4103 = vmatmul.mubr.msk.f32.gmra.mrb[14].mxu1 %vm365_vm2, %v5421_v58 }
 0x17e   :  { %4173 = vmatprep.mubr.msk.f32.mxu1 %vm171_vm1, %v5148_v1 }
 0x234   :  { %v4083_v9 = vpop.f32.mrb[0].mxu1 }
 0x235   :  { %v941_v2 = vadd.f32 %v4083_v9, %v6496_v28  ;;  %v861_v34 = vpop.f32.mrb[1].mxu1 }
 0x236   :  { %v940_v63 = vadd.f32 %v861_v34, %v6497_v36  ;;  %v6503_v34 = vld [vmem:[#allocation12_spill] sm:$0xff] }
 0x237   :  { %v957_v60 = vmul.f32 0.5, %v941_v2 }
 0x238   :  { %v4086_v32 = vpop.f32.mrb[2].mxu1  ;;  %v956_v40 = vmul.f32 0.5, %v940_v63 }
 0x239   :  { %v943_v4 = vadd.f32 %v4086_v32, %v6498_v6  ;;  %v871_v38 = vpop.f32.mrb[3].mxu1  ;;  %4752 = vtanh.f32 %v957_v60 }
 0x23a   :  { %v942_v12 = vadd.f32 %v871_v38, %v6499_v11  ;;  %4754 = vtanh.f32 %v956_v40  ;;  %v6504_v38 = vld [vmem:[#allocation13_spill] sm:$0xff] }
 0x23b   :  { %v959_v13 = vmul.f32 0.5, %v943_v4 }
 0x23c   :  { %v4089_v26 = vpop.f32.mrb[4].mxu1  ;;  %v958_v14 = vmul.f32 0.5, %v942_v12  ;;  %v6505_v12 = vld [vmem:[#allocation14_spill] sm:$0xff] }
 0x23d   :  { %v945_v22 = vadd.f32 %v4089_v26, %v6500_v8  ;;  %v881_v5 = vpop.f32.mrb[5].mxu1  ;;  %4756 = vtanh.f32 %v959_v13  ;;  %v6509_v8 = vld [vmem:[#allocation18_spill] sm:$0xff] }
 0x23e   :  { %v944_v18 = vadd.f32 %v881_v5, %v6501_v0 }
 0x23f   :  { %v973_v7 = vmul.f32 0.5, %v945_v22 }
 0x240   :  { %v972_v10 = vmul.f32 0.5, %v944_v18  ;;  %v4092_v16 = vpop.f32.mrb[6].mxu1 }
 0x241   :  { %4758 = vtanh.f32 %v973_v7  ;;  %v947_v9 = vadd.f32 %v4092_v16, %v6502_v3  ;;  %v891_v2 = vpop.f32.mrb[7].mxu1  ;;  %v6506_v7 = vld [vmem:[#allocation15_spill] sm:$0xff] }
 0x242   :  { %4760 = vtanh.f32 %v972_v10  ;;  %v946_v63 = vadd.f32 %v891_v2, %v6503_v34 }
 0x243   :  { %4762 = vtanh.f32 %v958_v14  ;;  %v975_v32 = vmul.f32 0.5, %v947_v9  ;;  %v4753_v22 = vpop.eup %4752  ;;  %v6507_v14 = vld [vmem:[#allocation16_spill] sm:$0xff] }
 0x244   :  { %v974_v60 = vmul.f32 0.5, %v946_v63  ;;  %v4095_v4 = vpop.f32.mrb[8].mxu1  ;;  %v4755_v5 = vpop.eup %4754  ;;  %v965_v34 = vmul.f32 0.5, %v4753_v22 }
 0x245   :  { %4764 = vtanh.f32 %v975_v32  ;;  %v949_v40 = vadd.f32 %v4095_v4, %v6504_v38  ;;  %v901_v26 = vpop.f32.mrb[9].mxu1  ;;  %v964_v32 = vmul.f32 0.5, %v4755_v5 }
 0x246   :  { %4766 = vtanh.f32 %v974_v60  ;;  %v948_v13 = vadd.f32 %v901_v26, %v6505_v12  ;;  %v969_v11 = vadd.f32 0.5, %v965_v34 }
 0x247   :  { %4768 = vtanh.f32 %v949_v40  ;;  %v4757_v2 = vpop.eup %4756  ;;  %v6508_v40 = vld [vmem:[#allocation17_spill] sm:$0xff]  ;;  %v968_v6 = vadd.f32 0.5, %v964_v32 }
 0x248   :  { %4770 = vtanh.f32 %v948_v13  ;;  %v4098_v18 = vpop.f32.mrb[10].mxu1  ;;  %v967_v5 = vmul.f32 0.5, %v4757_v2 }
 0x249   :  { %v951_v10 = vadd.f32 %v4098_v18, %v6506_v7  ;;  %v911_v16 = vpop.f32.mrb[11].mxu1 }
 0x24a   :  { %v950_v9 = vadd.f32 %v911_v16, %v6507_v14 }
 0x24b   :  { %v4759_v63 = vpop.eup %4758  ;;  %4772 = vtanh.f32 %v951_v10 }
 0x24c   :  { %v4761_v4 = vpop.eup %4760  ;;  %v981_v38 = vmul.f32 0.5, %v4759_v63  ;;  %4774 = vtanh.f32 %v950_v9  ;;  %v4101_v60 = vpop.f32.mrb[12].mxu1 }
 0x24d   :  { %v4763_v26 = vpop.eup %4762  ;;  %v980_v12 = vmul.f32 0.5, %v4761_v4  ;;  %v953_v3 = vadd.f32 %v4101_v60, %v6508_v40  ;;  %v921_v13 = vpop.f32.mrb[13].mxu1 }
 0x24e   :  { %v985_v0 = vadd.f32 0.5, %v981_v38  ;;  %v952_v18 = vadd.f32 %v921_v13, %v6509_v8  ;;  %v966_v10 = vmul.f32 0.5, %v4763_v26  ;;  %v971_v26 = vadd.f32 0.5, %v967_v5 }
 0x24f   :  { %v4765_v7 = vpop.eup %4764  ;;  %v984_v16 = vadd.f32 0.5, %v980_v12  ;;  %v993_v14 = vmul.f32 0.5, %v953_v3 }
 0x250   :  { %v4767_v22 = vpop.eup %4766  ;;  %v983_v36 = vmul.f32 0.5, %v4765_v7  ;;  %v992_v63 = vmul.f32 0.5, %v952_v18  ;;  %v4104_v9 = vpop.f32.mrb[14].mxu1  ;;  %v1009_v4 = vmul.f32 %v985_v0, %v5475_v62 }
 0x251   :  { %v4769_v28 = vpop.eup %4768  ;;  %v982_v1 = vmul.f32 0.5, %v4767_v22  ;;  %4776 = vtanh.f32 %v993_v14  ;;  %v955_v38 = vadd.f32 %v4104_v9, %v5469_v20  ;;  %v931_v60 = vpop.f32.mrb[15].mxu1  ;;  %v1008_v12 = vmul.f32 %v984_v16, %v5477_v59 }
 0x252   :  { %v4771_v13 = vpop.eup %4770  ;;  %v987_v8 = vadd.f32 0.5, %v983_v36  ;;  %v1013_v34 = vmul.f32 %v4769_v28, %v969_v11  ;;  %4778 = vtanh.f32 %v992_v63  ;;  %v954_v3 = vadd.f32 %v931_v60, %v5471_v30 }
 0x253   :  { %v986_v2 = vadd.f32 0.5, %v982_v1  ;;  %v1012_v7 = vmul.f32 %v4771_v13, %v968_v6  ;;  %v995_v32 = vmul.f32 0.5, %v955_v38  ;;  %v970_v14 = vadd.f32 0.5, %v966_v10 }
 0x254   :  { %v5575_v18 = vadd.f32 %v1013_v34, %v1009_v4  ;;  %v994_v62 = vmul.f32 0.5, %v954_v3  ;;  %v1011_v28 = vmul.f32 %v987_v8, %v5480_v61 }
 0x255   :  { %v4773_v0 = vpop.eup %4772  ;;  %v5577_v22 = vadd.f32 %v1012_v7, %v1008_v12  ;;  %4780 = vtanh.f32 %v995_v32  ;;  %v1010_v59 = vmul.f32 %v986_v2, %v5483_v24 }
 0x256   :  { %v4775_v9 = vpop.eup %4774  ;;  %4782 = vtanh.f32 %v5575_v18  ;;  %v1015_v36 = vmul.f32 %v4773_v0, %v971_v26 }
 0x257   :  { %4784 = vtanh.f32 %v5577_v22  ;;  %v1014_v1 = vmul.f32 %v4775_v9, %v970_v14  ;;  %v3471_v14 = vld [vmem:[%s6427_s0 + $0x20] sm:$0xff]  ;;  %v3472_v9 = vld [vmem:[%s6427_s0 + $0x28] sm:$0xff] }
 0x258   :  { %v5583_v6 = vadd.f32 %v1015_v36, %v1011_v28  ;;  %4786 = vtanh.f32 %v994_v62 }
 0x259   :  { %v5585_v11 = vadd.f32 %v1014_v1, %v1010_v59  ;;  %v4508_v59 = vpack.c.bf16 %v3472_v9, %v3471_v14 }
 0x25a   :  { %4788 = vtanh.f32 %v5583_v6 }
 0x25b   :  { %v4777_v16 = vpop.eup %4776  ;;  %4790 = vtanh.f32 %v5585_v11 }
 0x25c   :  { %v4779_v5 = vpop.eup %4778  ;;  %v1001_v61 = vmul.f32 0.5, %v4777_v16 }
 0x25d   :  { %v1000_v8 = vmul.f32 0.5, %v4779_v5 }
 0x25e   :  { %v1005_v10 = vadd.f32 0.5, %v1001_v61  ;;  %v6519_v61 = vld [vmem:[#allocation13_spill] sm:$0xff] }
 0x25f   :  { %v4781_v63 = vpop.eup %4780  ;;  %v1004_v4 = vadd.f32 0.5, %v1000_v8 }
 0x260   :  { %v4783_v24 = vpop.eup %4782  ;;  %v1003_v38 = vmul.f32 0.5, %v4781_v63  ;;  %v6520_v63 = vld [vmem:[#allocation14_spill] sm:$0xff] }
 0x261   :  { %v4785_v60 = vpop.eup %4784  ;;  %v1025_v13 = vmul.f32 %v4783_v24, %v1005_v10 }
 0x262   :  { %v4787_v34 = vpop.eup %4786  ;;  %v1007_v3 = vadd.f32 0.5, %v1003_v38  ;;  %v1024_v12 = vmul.f32 %v4785_v60, %v1004_v4 }
 0x263   :  { %v1002_v2 = vmul.f32 0.5, %v4787_v34 }
 0x264   :  { %v4789_v7 = vpop.eup %4788  ;;  %v4500_v32 = vpack.c.bf16 %v1025_v13, %v1024_v12  ;;  %v6521_v13 = vld [vmem:[#allocation15_spill] sm:$0xff] }
 0x265   :  { %v4791_v26 = vpop.eup %4790  ;;  %v1006_v62 = vadd.f32 0.5, %v1002_v2  ;;  %v1027_v0 = vmul.f32 %v4789_v7, %v1007_v3  ;;  %v6522_v2 = vld [vmem:[#allocation16_spill] sm:$0xff] }
 0x266   :  { %4501 = vmatprep.subr.bf16.mxu0 %v4500_v32 }
 0x267   :  { %4503 = vmatpush3.bf16.msra.mxu0 %v4500_v32  ;;  %v1026_v28 = vmul.f32 %v4791_v26, %v1006_v62 }
 0x269   :  { %v4504_v36 = vpack.c.bf16 %v1027_v0, %v1026_v28 }
 0x26b   :  { %4505 = vmatprep.subr.bf16.mxu0 %v4504_v36 }
 0x26c   :  { %4507 = vmatpush3.bf16.msra.mxu0 %v4504_v36 }
 0x26d   :  { %4509 = vmatprep.subr.bf16.mxu0 %v4508_v59 }
 0x26f   :  { %4114 = vmatmul.mubr.msk.f32.vlgmr.msra.gmra.mrb[16].mxu0 %vm171_vm1, %v5172_v15  ;;  %v6510_v15 = vld [vmem:[#allocation4_spill] sm:$0xff] }
 0x270   :  { %4116 = vmatprep.mubr.msk.f32.mxu0 %vm171_vm1, %v5180_v17  ;;  %4511 = vmatpush3.bf16.msra.mxu0 %v4508_v59 }
 0x273   :  { %4117 = vmatmul.mubr.msk.f32.gmra.mrb[18].mxu0 %vm171_vm1, %v5192_v19  ;;  %v6511_v19 = vld [vmem:[#allocation8_spill] sm:$0xff] }
 0x274   :  { %4119 = vmatprep.mubr.msk.f32.mxu0 %vm171_vm1, %v5200_v21 }
 0x277   :  { %4120 = vmatmul.mubr.msk.f32.gmra.mrb[20].mxu0 %vm171_vm1, %v5212_v23 }
 0x278   :  { %4122 = vmatprep.mubr.msk.f32.mxu0 %vm171_vm1, %v5220_v25  ;;  %v6512_v25 = vld [vmem:[#allocation6_spill] sm:$0xff] }
 0x27b   :  { %4123 = vmatmul.mubr.msk.f32.gmra.mrb[22].mxu0 %vm171_vm1, %v5232_v27 }
 0x27c   :  { %4125 = vmatprep.mubr.msk.f32.mxu0 %vm171_vm1, %v5240_v29 }
 0x27f   :  { %4126 = vmatmul.mubr.msk.f32.gmra.mrb[24].mxu0 %vm171_vm1, %v5252_v31 }
 0x280   :  { %4128 = vmatprep.mubr.msk.f32.mxu0 %vm171_vm1, %v5260_v33  ;;  %v6513_v33 = vld [vmem:[#allocation9_spill] sm:$0xff] }
 0x283   :  { %4129 = vmatmul.mubr.msk.f32.gmra.mrb[26].mxu0 %vm171_vm1, %v5272_v35 }
 0x284   :  { %4131 = vmatprep.mubr.msk.f32.mxu0 %vm171_vm1, %v5280_v37 }
 0x287   :  { %4132 = vmatmul.mubr.msk.f32.gmra.mrb[28].mxu0 %vm171_vm1, %v5292_v39 }
 0x288   :  { %4134 = vmatprep.mubr.msk.f32.mxu0 %vm171_vm1, %v5300_v41  ;;  %v6514_v41 = vld [vmem:[#allocation10_spill] sm:$0xff] }
 0x28b   :  { %4135 = vmatmul.mubr.msk.f32.gmra.mrb[30].mxu0 %vm171_vm1, %v5309_v42 }
 0x28c   :  { %4141 = vmatprep.mubr.msk.f32.mxu0 %vm365_vm2, %v5314_v43 }
 0x28f   :  { %4142 = vmatmul.mubr.msk.f32.vlgmr.msra.gmra.mrb[16].mxu0 %vm365_vm2, %v5323_v44 }
 0x290   :  { %4144 = vmatprep.mubr.msk.f32.mxu0 %vm365_vm2, %v5328_v45  ;;  %v6515_v45 = vld [vmem:[#allocation7_spill] sm:$0xff] }
 0x293   :  { %4145 = vmatmul.mubr.msk.f32.gmra.mrb[18].mxu0 %vm365_vm2, %v5337_v46 }
 0x294   :  { %4147 = vmatprep.mubr.msk.f32.mxu0 %vm365_vm2, %v5342_v47 }
 0x297   :  { %4148 = vmatmul.mubr.msk.f32.gmra.mrb[20].mxu0 %vm365_vm2, %v5351_v48  ;;  %v6516_v48 = vld [vmem:[#allocation5_spill] sm:$0xff] }
 0x298   :  { %4150 = vmatprep.mubr.msk.f32.mxu0 %vm365_vm2, %v5356_v49 }
 0x29b   :  { %4151 = vmatmul.mubr.msk.f32.gmra.mrb[22].mxu0 %vm365_vm2, %v5365_v50 }
 0x29c   :  { %4153 = vmatprep.mubr.msk.f32.mxu0 %vm365_vm2, %v5370_v51 }
 0x29f   :  { %4154 = vmatmul.mubr.msk.f32.gmra.mrb[24].mxu0 %vm365_vm2, %v5379_v52 }
 0x2a0   :  { %4156 = vmatprep.mubr.msk.f32.mxu0 %vm365_vm2, %v5384_v53 }
 0x2a3   :  { %4157 = vmatmul.mubr.msk.f32.gmra.mrb[26].mxu0 %vm365_vm2, %v5393_v54  ;;  %v6517_v54 = vld [vmem:[#allocation11_spill] sm:$0xff] }
 0x2a4   :  { %4159 = vmatprep.mubr.msk.f32.mxu0 %vm365_vm2, %v5398_v55 }
 0x2a7   :  { %4160 = vmatmul.mubr.msk.f32.gmra.mrb[28].mxu0 %vm365_vm2, %v5407_v56 }
 0x2a8   :  { %4162 = vmatprep.mubr.msk.f32.mxu0 %vm365_vm2, %v5412_v57  ;;  %v6518_v57 = vld [vmem:[#allocation12_spill] sm:$0xff] }
 0x2ab   :  { %4163 = vmatmul.mubr.msk.f32.gmra.mrb[30].mxu0 %vm365_vm2, %v5421_v58 }
 0x2ac   :  { %4233 = vmatprep.mubr.msk.f32.mxu0 %vm171_vm1, %v6510_v15 }
 0x362   :  { %v4143_v17 = vpop.f32.mrb[16].mxu0 }
 0x363   :  { %v1322_v21 = vadd.f32 %v4143_v17, %v6511_v19  ;;  %v1242_v23 = vpop.f32.mrb[17].mxu0 }
 0x364   :  { %v1321_v27 = vadd.f32 %v1242_v23, %v6512_v25 }
 0x365   :  { %v1338_v31 = vmul.f32 0.5, %v1322_v21  ;;  %v6523_v21 = vld [vmem:[#allocation18_spill] sm:$0xff] }
 0x366   :  { %v4146_v29 = vpop.f32.mrb[18].mxu0  ;;  %v1337_v39 = vmul.f32 0.5, %v1321_v27 }
 0x367   :  { %v1324_v35 = vadd.f32 %v4146_v29, %v6513_v33  ;;  %v1252_v37 = vpop.f32.mrb[19].mxu0  ;;  %4792 = vtanh.f32 %v1338_v31 }
 0x368   :  { %v1323_v42 = vadd.f32 %v1252_v37, %v6514_v41  ;;  %4794 = vtanh.f32 %v1337_v39 }
 0x369   :  { %v1340_v43 = vmul.f32 0.5, %v1324_v35 }
 0x36a   :  { %v4149_v44 = vpop.f32.mrb[20].mxu0  ;;  %v1339_v50 = vmul.f32 0.5, %v1323_v42 }
 0x36b   :  { %v1326_v46 = vadd.f32 %v4149_v44, %v6515_v45  ;;  %v1262_v47 = vpop.f32.mrb[21].mxu0  ;;  %4796 = vtanh.f32 %v1340_v43 }
 0x36c   :  { %v1325_v49 = vadd.f32 %v1262_v47, %v6516_v48 }
 0x36d   :  { %v1354_v51 = vmul.f32 0.5, %v1326_v46 }
 0x36e   :  { %v1353_v52 = vmul.f32 0.5, %v1325_v49  ;;  %v4152_v53 = vpop.f32.mrb[22].mxu0 }
 0x36f   :  { %4798 = vtanh.f32 %v1354_v51  ;;  %v1328_v55 = vadd.f32 %v4152_v53, %v6517_v54  ;;  %v1272_v56 = vpop.f32.mrb[23].mxu0 }
 0x370   :  { %4800 = vtanh.f32 %v1353_v52  ;;  %v1327_v58 = vadd.f32 %v1272_v56, %v6518_v57 }
 0x371   :  { %4802 = vtanh.f32 %v1339_v50  ;;  %v1356_v1 = vmul.f32 0.5, %v1328_v55  ;;  %v4793_v24 = vpop.eup %4792 }
 0x372   :  { %v1355_v16 = vmul.f32 0.5, %v1327_v58  ;;  %v4155_v5 = vpop.f32.mrb[24].mxu0  ;;  %v4795_v38 = vpop.eup %4794  ;;  %v1346_v26 = vmul.f32 0.5, %v4793_v24 }
 0x373   :  { %4804 = vtanh.f32 %v1356_v1  ;;  %v1330_v8 = vadd.f32 %v4155_v5, %v6519_v61  ;;  %v1282_v10 = vpop.f32.mrb[25].mxu0  ;;  %v1345_v62 = vmul.f32 0.5, %v4795_v38 }
 0x374   :  { %4806 = vtanh.f32 %v1355_v16  ;;  %v1329_v4 = vadd.f32 %v1282_v10, %v6520_v63  ;;  %v1350_v29 = vadd.f32 0.5, %v1346_v26 }
 0x375   :  { %4808 = vtanh.f32 %v1330_v8  ;;  %v4797_v12 = vpop.eup %4796  ;;  %v1349_v31 = vadd.f32 0.5, %v1345_v62 }
 0x376   :  { %4810 = vtanh.f32 %v1329_v4  ;;  %v4158_v60 = vpop.f32.mrb[26].mxu0  ;;  %v1348_v42 = vmul.f32 0.5, %v4797_v12 }
 0x377   :  { %v1332_v34 = vadd.f32 %v4158_v60, %v6521_v13  ;;  %v1292_v3 = vpop.f32.mrb[27].mxu0 }
 0x378   :  { %v1331_v7 = vadd.f32 %v1292_v3, %v6522_v2  ;;  %v1352_v4 = vadd.f32 0.5, %v1348_v42 }
 0x379   :  { %v4799_v32 = vpop.eup %4798  ;;  %4812 = vtanh.f32 %v1332_v34 }
 0x37a   :  { %v4801_v0 = vpop.eup %4800  ;;  %v1362_v14 = vmul.f32 0.5, %v4799_v32  ;;  %4814 = vtanh.f32 %v1331_v7  ;;  %v4161_v9 = vpop.f32.mrb[28].mxu0 }
 0x37b   :  { %v4803_v28 = vpop.eup %4802  ;;  %v1361_v36 = vmul.f32 0.5, %v4801_v0  ;;  %v1334_v59 = vadd.f32 %v4161_v9, %v6508_v40  ;;  %v1302_v15 = vpop.f32.mrb[29].mxu0 }
 0x37c   :  { %v1366_v17 = vadd.f32 0.5, %v1362_v14  ;;  %v1333_v23 = vadd.f32 %v1302_v15, %v6523_v21  ;;  %v1347_v43 = vmul.f32 0.5, %v4803_v28 }
 0x37d   :  { %v4805_v27 = vpop.eup %4804  ;;  %v1365_v35 = vadd.f32 0.5, %v1361_v36  ;;  %v1374_v37 = vmul.f32 0.5, %v1334_v59 }
 0x37e   :  { %v4807_v39 = vpop.eup %4806  ;;  %v1364_v44 = vmul.f32 0.5, %v4805_v27  ;;  %v1373_v46 = vmul.f32 0.5, %v1333_v23  ;;  %v4164_v47 = vpop.f32.mrb[30].mxu0  ;;  %v1390_v50 = vmul.f32 %v1366_v17, %v5575_v18  ;;  %v1351_v60 = vadd.f32 0.5, %v1347_v43 }
 0x37f   :  { %v4809_v49 = vpop.eup %4808  ;;  %v1363_v51 = vmul.f32 0.5, %v4807_v39  ;;  %4816 = vtanh.f32 %v1374_v37  ;;  %v1336_v52 = vadd.f32 %v4164_v47, %v5469_v20  ;;  %v1312_v53 = vpop.f32.mrb[31].mxu0  ;;  %v1389_v16 = vmul.f32 %v1365_v35, %v5577_v22  ;;  %v3506_v47 = vld [vmem:[%s6427_s0 + $0x38] sm:$0xff] }
 0x380   :  { %v4811_v55 = vpop.eup %4810  ;;  %v1368_v56 = vadd.f32 0.5, %v1364_v44  ;;  %v1394_v58 = vmul.f32 %v4809_v49, %v1350_v29  ;;  %4818 = vtanh.f32 %v1373_v46  ;;  %v1335_v1 = vadd.f32 %v1312_v53, %v5471_v30  ;;  %v3505_v46 = vld [vmem:[%s6427_s0 + $0x30] sm:$0xff] }
 0x381   :  { %v1367_v5 = vadd.f32 0.5, %v1363_v51  ;;  %v1393_v8 = vmul.f32 %v4811_v55, %v1349_v31  ;;  %v1376_v10 = vmul.f32 0.5, %v1336_v52  ;;  %v4520_v51 = vpack.c.bf16 %v3506_v47, %v3505_v46  ;;  %v5700_v52 = vld [vmem:[%s6426_s2 + $0x8] sm:$0xff]  ;;  %v5707_v53 = vld [vmem:[%s6426_s2 + $0x10] sm:$0xff]  ;;  %v5714_v55 = vld [vmem:[%s6426_s2 + $0x18] sm:$0xff] }
 0x382   :  { %v5677_v24 = vadd.f32 %v1394_v58, %v1390_v50  ;;  %v1375_v18 = vmul.f32 0.5, %v1335_v1  ;;  %v1392_v12 = vmul.f32 %v1368_v56, %v5583_v6  ;;  %v5721_v56 = vld [vmem:[%s6426_s2 + $0x20] sm:$0xff]  ;;  %v5728_v58 = vld [vmem:[%s6426_s2 + $0x28] sm:$0xff]  ;;  %v5735_v1 = vld [vmem:[%s6426_s2 + $0x30] sm:$0xff] }
 0x383   :  { %v4813_v38 = vpop.eup %4812  ;;  %v5679_v34 = vadd.f32 %v1393_v8, %v1389_v16  ;;  %4820 = vtanh.f32 %v1376_v10  ;;  %v1391_v22 = vmul.f32 %v1367_v5, %v5585_v11  ;;  %v5742_v16 = vld [vmem:[%s6426_s2 + $0x38] sm:$0xff]  ;;  %v5749_v5 = vld [vmem:[%s6426_s2 + $0x40] sm:$0xff]  ;;  %v5756_v8 = vld [vmem:[%s6426_s2 + $0x48] sm:$0xff] }
 0x384   :  { %v4815_v3 = vpop.eup %4814  ;;  %4822 = vtanh.f32 %v5677_v24  ;;  %v1396_v7 = vmul.f32 %v4813_v38, %v1352_v4  ;;  %v5763_v10 = vld [vmem:[%s6426_s2 + $0x50] sm:$0xff]  ;;  %v5770_v4 = vld [vmem:[%s6426_s2 + $0x58] sm:$0xff]  ;;  %v5784_v38 = vld [vmem:[%s6426_s2 + $0x68] sm:$0xff] }
 0x385   :  { %4824 = vtanh.f32 %v5679_v34  ;;  %v1395_v32 = vmul.f32 %v4815_v3, %v1351_v60  ;;  %v5791_v60 = vld [vmem:[%s6426_s2 + $0x70] sm:$0xff]  ;;  %v5798_v3 = vld [vmem:[%s6426_s2 + $0x78] sm:$0xff] }
 0x386   :  { %v5685_v26 = vadd.f32 %v1396_v7, %v1392_v12  ;;  %4826 = vtanh.f32 %v1375_v18  ;;  %v5777_v18 = vld [vmem:[%s6426_s2 + $0x60] sm:$0xff]  ;;  %v5812_v7 = vld [vmem:[%s6429_s1 + $0x8] sm:$0xff] }
 0x387   :  { %v5687_v62 = vadd.f32 %v1395_v32, %v1391_v22  ;;  %v5805_v12 = vld [vmem:[%s6429_s1] sm:$0xff]  ;;  %v5819_v22 = vld [vmem:[%s6429_s1 + $0x10] sm:$0xff]  ;;  %v5826_v32 = vld [vmem:[%s6429_s1 + $0x18] sm:$0xff] }
 0x388   :  { %4828 = vtanh.f32 %v5685_v26 }
 0x389   :  { %v4817_v0 = vpop.eup %4816  ;;  %4830 = vtanh.f32 %v5687_v62 }
 0x38a   :  { %v4819_v14 = vpop.eup %4818  ;;  %v1382_v6 = vmul.f32 0.5, %v4817_v0  ;;  %v5833_v0 = vld [vmem:[%s6429_s1 + $0x20] sm:$0xff] }
 0x38b   :  { %v1381_v9 = vmul.f32 0.5, %v4819_v14  ;;  %v5840_v14 = vld [vmem:[%s6429_s1 + $0x28] sm:$0xff] }
 0x38c   :  { %v1386_v28 = vadd.f32 0.5, %v1382_v6  ;;  %v5847_v6 = vld [vmem:[%s6429_s1 + $0x30] sm:$0xff] }
 0x38d   :  { %v4821_v36 = vpop.eup %4820  ;;  %v1385_v59 = vadd.f32 0.5, %v1381_v9  ;;  %v5854_v9 = vld [vmem:[%s6429_s1 + $0x38] sm:$0xff] }
 0x38e   :  { %v4823_v11 = vpop.eup %4822  ;;  %v1384_v15 = vmul.f32 0.5, %v4821_v36  ;;  %v5868_v36 = vld [vmem:[%s6429_s1 + $0x48] sm:$0xff] }
 0x38f   :  { %v4825_v17 = vpop.eup %4824  ;;  %v1406_v23 = vmul.f32 %v4823_v11, %v1386_v28  ;;  %v5861_v28 = vld [vmem:[%s6429_s1 + $0x40] sm:$0xff]  ;;  %v5882_v11 = vld [vmem:[%s6429_s1 + $0x58] sm:$0xff] }
 0x390   :  { %v4827_v27 = vpop.eup %4826  ;;  %v1388_v29 = vadd.f32 0.5, %v1384_v15  ;;  %v1405_v31 = vmul.f32 %v4825_v17, %v1385_v59  ;;  %v5875_v59 = vld [vmem:[%s6429_s1 + $0x50] sm:$0xff]  ;;  %v5889_v15 = vld [vmem:[%s6429_s1 + $0x60] sm:$0xff]  ;;  %v5896_v17 = vld [vmem:[%s6429_s1 + $0x68] sm:$0xff] }
 0x391   :  { %v1383_v35 = vmul.f32 0.5, %v4827_v27  ;;  %v5910_v27 = vld [vmem:[%s6429_s1 + $0x78] sm:$0xff] }
 0x392   :  { %v4829_v37 = vpop.eup %4828  ;;  %v4512_v39 = vpack.c.bf16 %v1406_v23, %v1405_v31  ;;  %v5903_v23 = vld [vmem:[%s6429_s1 + $0x70] sm:$0xff]  ;;  %6525 = vst [vmem:[#allocation4_spill] sm:$0xff] %v5910_v27 }
 0x393   :  { %v4831_v42 = vpop.eup %4830  ;;  %v1387_v43 = vadd.f32 0.5, %v1383_v35  ;;  %v1408_v44 = vmul.f32 %v4829_v37, %v1388_v29  ;;  %6524 = vst [vmem:[#allocation17_spill] sm:$0xff] %v5903_v23  ;;  %v5917_v29 = vld [vmem:[%s6426_s2] sm:$0xff] }
 0x394   :  { %4513 = vmatprep.subr.bf16.mxu1 %v4512_v39  ;;  %6526 = vst [vmem:[#allocation19_spill] sm:$0xff] %v5917_v29 }
 0x395   :  { %4515 = vmatpush3.bf16.msra.mxu1 %v4512_v39  ;;  %v1407_v49 = vmul.f32 %v4831_v42, %v1387_v43 }
 0x397   :  { %v4516_v50 = vpack.c.bf16 %v1408_v44, %v1407_v49 }
 0x399   :  { %4517 = vmatprep.subr.bf16.mxu1 %v4516_v50 }
 0x39a   :  { %4519 = vmatpush3.bf16.msra.mxu1 %v4516_v50 }
 0x39b   :  { %4521 = vmatprep.subr.bf16.mxu1 %v4520_v51 }
 0x39d   :  { %4174 = vmatmul.mubr.msk.f32.vlgmr.msra.gmra.mrb[16].mxu1 %vm171_vm1, %v5700_v52 }
 0x39e   :  { %4176 = vmatprep.mubr.msk.f32.mxu1 %vm171_vm1, %v5707_v53  ;;  %4523 = vmatpush3.bf16.msra.mxu1 %v4520_v51 }
 0x3a1   :  { %4177 = vmatmul.mubr.msk.f32.gmra.mrb[18].mxu1 %vm171_vm1, %v5714_v55 }
 0x3a2   :  { %4179 = vmatprep.mubr.msk.f32.mxu1 %vm171_vm1, %v5721_v56 }
 0x3a5   :  { %4180 = vmatmul.mubr.msk.f32.gmra.mrb[20].mxu1 %vm171_vm1, %v5728_v58 }
 0x3a6   :  { %4182 = vmatprep.mubr.msk.f32.mxu1 %vm171_vm1, %v5735_v1 }
 0x3a9   :  { %4183 = vmatmul.mubr.msk.f32.gmra.mrb[22].mxu1 %vm171_vm1, %v5742_v16 }
 0x3aa   :  { %4185 = vmatprep.mubr.msk.f32.mxu1 %vm171_vm1, %v5749_v5 }
 0x3ad   :  { %4186 = vmatmul.mubr.msk.f32.gmra.mrb[24].mxu1 %vm171_vm1, %v5756_v8 }
 0x3ae   :  { %4188 = vmatprep.mubr.msk.f32.mxu1 %vm171_vm1, %v5763_v10 }
 0x3b1   :  { %4189 = vmatmul.mubr.msk.f32.gmra.mrb[26].mxu1 %vm171_vm1, %v5770_v4 }
 0x3b2   :  { %4191 = vmatprep.mubr.msk.f32.mxu1 %vm171_vm1, %v5777_v18 }
 0x3b5   :  { %4192 = vmatmul.mubr.msk.f32.gmra.mrb[28].mxu1 %vm171_vm1, %v5784_v38 }
 0x3b6   :  { %4194 = vmatprep.mubr.msk.f32.mxu1 %vm171_vm1, %v5791_v60 }
 0x3b9   :  { %4195 = vmatmul.mubr.msk.f32.gmra.mrb[30].mxu1 %vm171_vm1, %v5798_v3 }
 0x3ba   :  { %4201 = vmatprep.mubr.msk.f32.mxu1 %vm365_vm2, %v5805_v12 }
 0x3bd   :  { %4202 = vmatmul.mubr.msk.f32.vlgmr.msra.gmra.mrb[16].mxu1 %vm365_vm2, %v5812_v7 }
 0x3be   :  { %4204 = vmatprep.mubr.msk.f32.mxu1 %vm365_vm2, %v5819_v22 }
 0x3c1   :  { %4205 = vmatmul.mubr.msk.f32.gmra.mrb[18].mxu1 %vm365_vm2, %v5826_v32 }
 0x3c2   :  { %4207 = vmatprep.mubr.msk.f32.mxu1 %vm365_vm2, %v5833_v0 }
 0x3c5   :  { %4208 = vmatmul.mubr.msk.f32.gmra.mrb[20].mxu1 %vm365_vm2, %v5840_v14 }
 0x3c6   :  { %4210 = vmatprep.mubr.msk.f32.mxu1 %vm365_vm2, %v5847_v6 }
 0x3c9   :  { %4211 = vmatmul.mubr.msk.f32.gmra.mrb[22].mxu1 %vm365_vm2, %v5854_v9 }
 0x3ca   :  { %4213 = vmatprep.mubr.msk.f32.mxu1 %vm365_vm2, %v5861_v28 }
 0x3cd   :  { %4214 = vmatmul.mubr.msk.f32.gmra.mrb[24].mxu1 %vm365_vm2, %v5868_v36 }
 0x3ce   :  { %4216 = vmatprep.mubr.msk.f32.mxu1 %vm365_vm2, %v5875_v59 }
 0x3d1   :  { %4217 = vmatmul.mubr.msk.f32.gmra.mrb[26].mxu1 %vm365_vm2, %v5882_v11 }
 0x3d2   :  { %4219 = vmatprep.mubr.msk.f32.mxu1 %vm365_vm2, %v5889_v15 }
 0x3d5   :  { %4220 = vmatmul.mubr.msk.f32.gmra.mrb[28].mxu1 %vm365_vm2, %v5896_v17 }
 0x3d6   :  { %4222 = vmatprep.mubr.msk.f32.mxu1 %vm365_vm2, %v5903_v23 }
 0x3d9   :  { %4223 = vmatmul.mubr.msk.f32.gmra.mrb[30].mxu1 %vm365_vm2, %v5910_v27 }
 0x3da   :  { %4293 = vmatprep.mubr.msk.f32.mxu1 %vm171_vm1, %v5917_v29 }
 0x490   :  { %v4203_v31 = vpop.f32.mrb[16].mxu1 }
 0x491   :  { %v1703_v35 = vadd.f32 %v4203_v31, %v6511_v19  ;;  %v1623_v37 = vpop.f32.mrb[17].mxu1 }
 0x492   :  { %v1702_v39 = vadd.f32 %v1623_v37, %v6512_v25 }
 0x493   :  { %v1719_v43 = vmul.f32 0.5, %v1703_v35 }
 0x494   :  { %v4206_v42 = vpop.f32.mrb[18].mxu1  ;;  %v1718_v47 = vmul.f32 0.5, %v1702_v39 }
 0x495   :  { %v1705_v44 = vadd.f32 %v4206_v42, %v6513_v33  ;;  %v1633_v46 = vpop.f32.mrb[19].mxu1  ;;  %4832 = vtanh.f32 %v1719_v43 }
 0x496   :  { %v1704_v49 = vadd.f32 %v1633_v46, %v6514_v41  ;;  %4834 = vtanh.f32 %v1718_v47 }
 0x497   :  { %v1721_v50 = vmul.f32 0.5, %v1705_v44 }
 0x498   :  { %v4209_v51 = vpop.f32.mrb[20].mxu1  ;;  %v1720_v19 = vmul.f32 0.5, %v1704_v49 }
 0x499   :  { %v1707_v27 = vadd.f32 %v4209_v51, %v6515_v45  ;;  %v1643_v29 = vpop.f32.mrb[21].mxu1  ;;  %4836 = vtanh.f32 %v1721_v50 }
 0x49a   :  { %v1706_v31 = vadd.f32 %v1643_v29, %v6516_v48 }
 0x49b   :  { %v1735_v23 = vmul.f32 0.5, %v1707_v27 }
 0x49c   :  { %v1734_v37 = vmul.f32 0.5, %v1706_v31  ;;  %v4212_v35 = vpop.f32.mrb[22].mxu1 }
 0x49d   :  { %4838 = vtanh.f32 %v1735_v23  ;;  %v1709_v42 = vadd.f32 %v4212_v35, %v6517_v54  ;;  %v1653_v39 = vpop.f32.mrb[23].mxu1 }
 0x49e   :  { %4840 = vtanh.f32 %v1734_v37  ;;  %v1708_v44 = vadd.f32 %v1653_v39, %v6518_v57 }
 0x49f   :  { %4842 = vtanh.f32 %v1720_v19  ;;  %v1737_v43 = vmul.f32 0.5, %v1709_v42  ;;  %v4833_v49 = vpop.eup %4832 }
 0x4a0   :  { %v1736_v46 = vmul.f32 0.5, %v1708_v44  ;;  %v4215_v51 = vpop.f32.mrb[24].mxu1  ;;  %v4835_v23 = vpop.eup %4834  ;;  %v1727_v39 = vmul.f32 0.5, %v4833_v49 }
 0x4a1   :  { %4844 = vtanh.f32 %v1737_v43  ;;  %v1711_v47 = vadd.f32 %v4215_v51, %v6519_v61  ;;  %v1663_v29 = vpop.f32.mrb[25].mxu1  ;;  %v1726_v44 = vmul.f32 0.5, %v4835_v23 }
 0x4a2   :  { %4846 = vtanh.f32 %v1736_v46  ;;  %v1710_v27 = vadd.f32 %v1663_v29, %v6520_v63  ;;  %v1731_v57 = vadd.f32 0.5, %v1727_v39 }
 0x4a3   :  { %4848 = vtanh.f32 %v1711_v47  ;;  %v4837_v35 = vpop.eup %4836  ;;  %v1730_v54 = vadd.f32 0.5, %v1726_v44 }
 0x4a4   :  { %4850 = vtanh.f32 %v1710_v27  ;;  %v4218_v50 = vpop.f32.mrb[26].mxu1  ;;  %v1729_v23 = vmul.f32 0.5, %v4837_v35 }
 0x4a5   :  { %v1713_v31 = vadd.f32 %v4218_v50, %v6521_v13  ;;  %v1673_v37 = vpop.f32.mrb[27].mxu1 }
 0x4a6   :  { %v1712_v19 = vadd.f32 %v1673_v37, %v6522_v2 }
 0x4a7   :  { %v4839_v42 = vpop.eup %4838  ;;  %4852 = vtanh.f32 %v1713_v31 }
 0x4a8   :  { %v4841_v43 = vpop.eup %4840  ;;  %v1743_v51 = vmul.f32 0.5, %v4839_v42  ;;  %4854 = vtanh.f32 %v1712_v19  ;;  %v4221_v46 = vpop.f32.mrb[28].mxu1 }
 0x4a9   :  { %v4843_v29 = vpop.eup %4842  ;;  %v1742_v63 = vmul.f32 0.5, %v4841_v43  ;;  %v1715_v47 = vadd.f32 %v4221_v46, %v6508_v40  ;;  %v1683_v27 = vpop.f32.mrb[29].mxu1 }
 0x4aa   :  { %v1747_v61 = vadd.f32 0.5, %v1743_v51  ;;  %v1714_v50 = vadd.f32 %v1683_v27, %v6523_v21  ;;  %v1728_v31 = vmul.f32 0.5, %v4843_v29 }
 0x4ab   :  { %v4845_v13 = vpop.eup %4844  ;;  %v1746_v37 = vadd.f32 0.5, %v1742_v63  ;;  %v1755_v2 = vmul.f32 0.5, %v1715_v47  ;;  %v1733_v47 = vadd.f32 0.5, %v1729_v23 }
 0x4ac   :  { %v4847_v49 = vpop.eup %4846  ;;  %v1745_v48 = vmul.f32 0.5, %v4845_v13  ;;  %v1754_v42 = vmul.f32 0.5, %v1714_v50  ;;  %v4224_v19 = vpop.f32.mrb[30].mxu1  ;;  %v1771_v43 = vmul.f32 %v1747_v61, %v5677_v24 }
 0x4ad   :  { %v4849_v45 = vpop.eup %4848  ;;  %v1744_v41 = vmul.f32 0.5, %v4847_v49  ;;  %4856 = vtanh.f32 %v1755_v2  ;;  %v1717_v51 = vadd.f32 %v4224_v19, %v5469_v20  ;;  %v1693_v46 = vpop.f32.mrb[31].mxu1  ;;  %v1770_v35 = vmul.f32 %v1746_v37, %v5679_v34 }
 0x4ae   :  { %v4851_v27 = vpop.eup %4850  ;;  %v1749_v21 = vadd.f32 0.5, %v1745_v48  ;;  %v1775_v39 = vmul.f32 %v4849_v45, %v1731_v57  ;;  %4858 = vtanh.f32 %v1754_v42  ;;  %v1716_v63 = vadd.f32 %v1693_v46, %v5471_v30 }
 0x4af   :  { %v1748_v44 = vadd.f32 0.5, %v1744_v41  ;;  %v1774_v13 = vmul.f32 %v4851_v27, %v1730_v54  ;;  %v1757_v29 = vmul.f32 0.5, %v1717_v51  ;;  %v1732_v2 = vadd.f32 0.5, %v1728_v31 }
 0x4b0   :  { %v5939_v50 = vadd.f32 %v1775_v39, %v1771_v43  ;;  %v1756_v61 = vmul.f32 0.5, %v1716_v63  ;;  %v1773_v45 = vmul.f32 %v1749_v21, %v5685_v26 }
 0x4b1   :  { %v4853_v24 = vpop.eup %4852  ;;  %v5941_v49 = vadd.f32 %v1774_v13, %v1770_v35  ;;  %4860 = vtanh.f32 %v1757_v29  ;;  %v1772_v57 = vmul.f32 %v1748_v44, %v5687_v62 }
 0x4b2   :  { %v4855_v19 = vpop.eup %4854  ;;  %4862 = vtanh.f32 %v5939_v50  ;;  %v1777_v48 = vmul.f32 %v4853_v24, %v1733_v47 }
 0x4b3   :  { %4864 = vtanh.f32 %v5941_v49  ;;  %v1776_v41 = vmul.f32 %v4855_v19, %v1732_v2  ;;  %v3539_v2 = vld [vmem:[%s6427_s0 + $0x40] sm:$0xff]  ;;  %v3540_v19 = vld [vmem:[%s6427_s0 + $0x48] sm:$0xff] }
 0x4b4   :  { %v5947_v54 = vadd.f32 %v1777_v48, %v1773_v45  ;;  %4866 = vtanh.f32 %v1756_v61 }
 0x4b5   :  { %v5949_v34 = vadd.f32 %v1776_v41, %v1772_v57  ;;  %v4532_v57 = vpack.c.bf16 %v3540_v19, %v3539_v2  ;;  %v6527_v41 = vld [vmem:[#allocation17_spill] sm:$0xff] }
 0x4b6   :  { %4868 = vtanh.f32 %v5947_v54 }
 0x4b7   :  { %v4857_v37 = vpop.eup %4856  ;;  %4870 = vtanh.f32 %v5949_v34 }
 0x4b8   :  { %v4859_v23 = vpop.eup %4858  ;;  %v1763_v21 = vmul.f32 0.5, %v4857_v37  ;;  %v6528_v37 = vld [vmem:[#allocation4_spill] sm:$0xff] }
 0x4b9   :  { %v1762_v26 = vmul.f32 0.5, %v4859_v23  ;;  %v6529_v23 = vld [vmem:[#allocation19_spill] sm:$0xff] }
 0x4ba   :  { %v1767_v31 = vadd.f32 0.5, %v1763_v21 }
 0x4bb   :  { %v4861_v42 = vpop.eup %4860  ;;  %v1766_v43 = vadd.f32 0.5, %v1762_v26  ;;  %v6530_v26 = vld [vmem:[#allocation8_spill] sm:$0xff] }
 0x4bc   :  { %v4863_v62 = vpop.eup %4862  ;;  %v1765_v51 = vmul.f32 0.5, %v4861_v42 }
 0x4bd   :  { %v4865_v46 = vpop.eup %4864  ;;  %v1787_v27 = vmul.f32 %v4863_v62, %v1767_v31 }
 0x4be   :  { %v4867_v39 = vpop.eup %4866  ;;  %v1769_v63 = vadd.f32 0.5, %v1765_v51  ;;  %v1786_v35 = vmul.f32 %v4865_v46, %v1766_v43 }
 0x4bf   :  { %v1764_v44 = vmul.f32 0.5, %v4867_v39 }
 0x4c0   :  { %v4869_v13 = vpop.eup %4868  ;;  %v4524_v29 = vpack.c.bf16 %v1787_v27, %v1786_v35 }
 0x4c1   :  { %v4871_v47 = vpop.eup %4870  ;;  %v1768_v61 = vadd.f32 0.5, %v1764_v44  ;;  %v1789_v24 = vmul.f32 %v4869_v13, %v1769_v63  ;;  %v6531_v63 = vld [vmem:[#allocation10_spill] sm:$0xff] }
 0x4c2   :  { %4525 = vmatprep.subr.bf16.mxu0 %v4524_v29 }
 0x4c3   :  { %4527 = vmatpush3.bf16.msra.mxu0 %v4524_v29  ;;  %v1788_v45 = vmul.f32 %v4871_v47, %v1768_v61  ;;  %v6532_v29 = vld [vmem:[#allocation7_spill] sm:$0xff] }
 0x4c5   :  { %v4528_v48 = vpack.c.bf16 %v1789_v24, %v1788_v45  ;;  %v6533_v24 = vld [vmem:[#allocation5_spill] sm:$0xff] }
 0x4c7   :  { %4529 = vmatprep.subr.bf16.mxu0 %v4528_v48 }
 0x4c8   :  { %4531 = vmatpush3.bf16.msra.mxu0 %v4528_v48 }
 0x4c9   :  { %4533 = vmatprep.subr.bf16.mxu0 %v4532_v57 }
 0x4cb   :  { %4234 = vmatmul.mubr.msk.f32.vlgmr.msra.gmra.mrb[32].mxu0 %vm171_vm1, %v5700_v52 }
 0x4cc   :  { %4236 = vmatprep.mubr.msk.f32.mxu0 %vm171_vm1, %v5707_v53  ;;  %4535 = vmatpush3.bf16.msra.mxu0 %v4532_v57 }
 0x4cf   :  { %4237 = vmatmul.mubr.msk.f32.gmra.mrb[34].mxu0 %vm171_vm1, %v5714_v55 }
 0x4d0   :  { %4239 = vmatprep.mubr.msk.f32.mxu0 %vm171_vm1, %v5721_v56 }
 0x4d3   :  { %4240 = vmatmul.mubr.msk.f32.gmra.mrb[36].mxu0 %vm171_vm1, %v5728_v58 }
 0x4d4   :  { %4242 = vmatprep.mubr.msk.f32.mxu0 %vm171_vm1, %v5735_v1 }
 0x4d7   :  { %4243 = vmatmul.mubr.msk.f32.gmra.mrb[38].mxu0 %vm171_vm1, %v5742_v16 }
 0x4d8   :  { %4245 = vmatprep.mubr.msk.f32.mxu0 %vm171_vm1, %v5749_v5 }
 0x4db   :  { %4246 = vmatmul.mubr.msk.f32.gmra.mrb[40].mxu0 %vm171_vm1, %v5756_v8 }
 0x4dc   :  { %4248 = vmatprep.mubr.msk.f32.mxu0 %vm171_vm1, %v5763_v10 }
 0x4df   :  { %4249 = vmatmul.mubr.msk.f32.gmra.mrb[42].mxu0 %vm171_vm1, %v5770_v4 }
 0x4e0   :  { %4251 = vmatprep.mubr.msk.f32.mxu0 %vm171_vm1, %v5777_v18 }
 0x4e3   :  { %4252 = vmatmul.mubr.msk.f32.gmra.mrb[44].mxu0 %vm171_vm1, %v5784_v38 }
 0x4e4   :  { %4254 = vmatprep.mubr.msk.f32.mxu0 %vm171_vm1, %v5791_v60 }
 0x4e7   :  { %4255 = vmatmul.mubr.msk.f32.gmra.mrb[46].mxu0 %vm171_vm1, %v5798_v3 }
 0x4e8   :  { %4261 = vmatprep.mubr.msk.f32.mxu0 %vm365_vm2, %v5805_v12 }
 0x4eb   :  { %4262 = vmatmul.mubr.msk.f32.vlgmr.msra.gmra.mrb[32].mxu0 %vm365_vm2, %v5812_v7 }
 0x4ec   :  { %4264 = vmatprep.mubr.msk.f32.mxu0 %vm365_vm2, %v5819_v22 }
 0x4ef   :  { %4265 = vmatmul.mubr.msk.f32.gmra.mrb[34].mxu0 %vm365_vm2, %v5826_v32 }
 0x4f0   :  { %4267 = vmatprep.mubr.msk.f32.mxu0 %vm365_vm2, %v5833_v0 }
 0x4f3   :  { %4268 = vmatmul.mubr.msk.f32.gmra.mrb[36].mxu0 %vm365_vm2, %v5840_v14 }
 0x4f4   :  { %4270 = vmatprep.mubr.msk.f32.mxu0 %vm365_vm2, %v5847_v6 }
 0x4f7   :  { %4271 = vmatmul.mubr.msk.f32.gmra.mrb[38].mxu0 %vm365_vm2, %v5854_v9 }
 0x4f8   :  { %4273 = vmatprep.mubr.msk.f32.mxu0 %vm365_vm2, %v5861_v28 }
 0x4fb   :  { %4274 = vmatmul.mubr.msk.f32.gmra.mrb[40].mxu0 %vm365_vm2, %v5868_v36 }
 0x4fc   :  { %4276 = vmatprep.mubr.msk.f32.mxu0 %vm365_vm2, %v5875_v59 }
 0x4ff   :  { %4277 = vmatmul.mubr.msk.f32.gmra.mrb[42].mxu0 %vm365_vm2, %v5882_v11 }
 0x500   :  { %4279 = vmatprep.mubr.msk.f32.mxu0 %vm365_vm2, %v5889_v15 }
 0x503   :  { %4280 = vmatmul.mubr.msk.f32.gmra.mrb[44].mxu0 %vm365_vm2, %v5896_v17 }
 0x504   :  { %4282 = vmatprep.mubr.msk.f32.mxu0 %vm365_vm2, %v6527_v41 }
 0x507   :  { %4283 = vmatmul.mubr.msk.f32.gmra.mrb[46].mxu0 %vm365_vm2, %v6528_v37 }
 0x508   :  { %4353 = vmatprep.mubr.msk.f32.mxu0 %vm171_vm1, %v6529_v23 }
 0x5be   :  { %v4263_v21 = vpop.f32.mrb[32].mxu0 }
 0x5bf   :  { %v2084_v31 = vadd.f32 %v4263_v21, %v6530_v26  ;;  %v2004_v42 = vpop.f32.mrb[33].mxu0  ;;  %v6534_v21 = vld [vmem:[#allocation11_spill] sm:$0xff] }
 0x5c0   :  { %v2083_v43 = vadd.f32 %v2004_v42, %v6512_v25 }
 0x5c1   :  { %v2100_v51 = vmul.f32 0.5, %v2084_v31 }
 0x5c2   :  { %v4266_v62 = vpop.f32.mrb[34].mxu0  ;;  %v2099_v39 = vmul.f32 0.5, %v2083_v43  ;;  %v6535_v43 = vld [vmem:[#allocation12_spill] sm:$0xff] }
 0x5c3   :  { %v2086_v46 = vadd.f32 %v4266_v62, %v6513_v33  ;;  %v2014_v27 = vpop.f32.mrb[35].mxu0  ;;  %4872 = vtanh.f32 %v2100_v51 }
 0x5c4   :  { %v2085_v35 = vadd.f32 %v2014_v27, %v6531_v63  ;;  %4874 = vtanh.f32 %v2099_v39  ;;  %v6536_v39 = vld [vmem:[#allocation13_spill] sm:$0xff] }
 0x5c5   :  { %v2102_v44 = vmul.f32 0.5, %v2086_v46 }
 0x5c6   :  { %v4269_v13 = vpop.f32.mrb[36].mxu0  ;;  %v2101_v19 = vmul.f32 0.5, %v2085_v35  ;;  %v6537_v35 = vld [vmem:[#allocation14_spill] sm:$0xff] }
 0x5c7   :  { %v2088_v47 = vadd.f32 %v4269_v13, %v6532_v29  ;;  %v2024_v61 = vpop.f32.mrb[37].mxu0  ;;  %4876 = vtanh.f32 %v2102_v44  ;;  %v6540_v29 = vld [vmem:[#allocation18_spill] sm:$0xff] }
 0x5c8   :  { %v2087_v2 = vadd.f32 %v2024_v61, %v6533_v24 }
 0x5c9   :  { %v2116_v45 = vmul.f32 0.5, %v2088_v47 }
 0x5ca   :  { %v2115_v48 = vmul.f32 0.5, %v2087_v2  ;;  %v4272_v57 = vpop.f32.mrb[38].mxu0 }
 0x5cb   :  { %4878 = vtanh.f32 %v2116_v45  ;;  %v2090_v31 = vadd.f32 %v4272_v57, %v6534_v21  ;;  %v2034_v42 = vpop.f32.mrb[39].mxu0  ;;  %v6538_v57 = vld [vmem:[#allocation15_spill] sm:$0xff] }
 0x5cc   :  { %4880 = vtanh.f32 %v2115_v48  ;;  %v2089_v62 = vadd.f32 %v2034_v42, %v6535_v43 }
 0x5cd   :  { %4882 = vtanh.f32 %v2101_v19  ;;  %v2118_v51 = vmul.f32 0.5, %v2090_v31  ;;  %v4873_v47 = vpop.eup %4872  ;;  %v6539_v19 = vld [vmem:[#allocation16_spill] sm:$0xff] }
 0x5ce   :  { %v2117_v46 = vmul.f32 0.5, %v2089_v62  ;;  %v4275_v27 = vpop.f32.mrb[40].mxu0  ;;  %v4875_v2 = vpop.eup %4874  ;;  %v2108_v43 = vmul.f32 0.5, %v4873_v47 }
 0x5cf   :  { %4884 = vtanh.f32 %v2118_v51  ;;  %v2092_v13 = vadd.f32 %v4275_v27, %v6536_v39  ;;  %v2044_v61 = vpop.f32.mrb[41].mxu0  ;;  %v2107_v51 = vmul.f32 0.5, %v4875_v2 }
 0x5d0   :  { %4886 = vtanh.f32 %v2117_v46  ;;  %v2091_v44 = vadd.f32 %v2044_v61, %v6537_v35  ;;  %v2112_v63 = vadd.f32 0.5, %v2108_v43 }
 0x5d1   :  { %4888 = vtanh.f32 %v2092_v13  ;;  %v4877_v42 = vpop.eup %4876  ;;  %v2111_v33 = vadd.f32 0.5, %v2107_v51 }
 0x5d2   :  { %4890 = vtanh.f32 %v2091_v44  ;;  %v4278_v45 = vpop.f32.mrb[42].mxu0  ;;  %v2110_v2 = vmul.f32 0.5, %v4877_v42 }
 0x5d3   :  { %v2094_v48 = vadd.f32 %v4278_v45, %v6538_v57  ;;  %v2054_v21 = vpop.f32.mrb[43].mxu0 }
 0x5d4   :  { %v2093_v31 = vadd.f32 %v2054_v21, %v6539_v19 }
 0x5d5   :  { %v4879_v62 = vpop.eup %4878  ;;  %4892 = vtanh.f32 %v2094_v48 }
 0x5d6   :  { %v4881_v27 = vpop.eup %4880  ;;  %v2124_v39 = vmul.f32 0.5, %v4879_v62  ;;  %4894 = vtanh.f32 %v2093_v31  ;;  %v4281_v46 = vpop.f32.mrb[44].mxu0 }
 0x5d7   :  { %v4883_v61 = vpop.eup %4882  ;;  %v2123_v35 = vmul.f32 0.5, %v4881_v27  ;;  %v2096_v13 = vadd.f32 %v4281_v46, %v6508_v40  ;;  %v2064_v44 = vpop.f32.mrb[45].mxu0 }
 0x5d8   :  { %v2128_v24 = vadd.f32 0.5, %v2124_v39  ;;  %v2095_v45 = vadd.f32 %v2064_v44, %v6540_v29  ;;  %v2109_v48 = vmul.f32 0.5, %v4883_v61 }
 0x5d9   :  { %v4885_v57 = vpop.eup %4884  ;;  %v2127_v21 = vadd.f32 0.5, %v2123_v35  ;;  %v2136_v19 = vmul.f32 0.5, %v2096_v13  ;;  %v2114_v13 = vadd.f32 0.5, %v2110_v2 }
 0x5da   :  { %v4887_v47 = vpop.eup %4886  ;;  %v2126_v25 = vmul.f32 0.5, %v4885_v57  ;;  %v2135_v62 = vmul.f32 0.5, %v2095_v45  ;;  %v4284_v31 = vpop.f32.mrb[46].mxu0  ;;  %v2152_v27 = vmul.f32 %v2128_v24, %v5939_v50 }
 0x5db   :  { %v4889_v26 = vpop.eup %4888  ;;  %v2125_v23 = vmul.f32 0.5, %v4887_v47  ;;  %4896 = vtanh.f32 %v2136_v19  ;;  %v2098_v39 = vadd.f32 %v4284_v31, %v5469_v20  ;;  %v2074_v46 = vpop.f32.mrb[47].mxu0  ;;  %v2151_v42 = vmul.f32 %v2127_v21, %v5941_v49 }
 0x5dc   :  { %v4891_v44 = vpop.eup %4890  ;;  %v2130_v29 = vadd.f32 0.5, %v2126_v25  ;;  %v2156_v43 = vmul.f32 %v4889_v26, %v2112_v63  ;;  %4898 = vtanh.f32 %v2135_v62  ;;  %v2097_v35 = vadd.f32 %v2074_v46, %v5471_v30 }
 0x5dd   :  { %v2129_v51 = vadd.f32 0.5, %v2125_v23  ;;  %v2155_v57 = vmul.f32 %v4891_v44, %v2111_v33  ;;  %v2138_v61 = vmul.f32 0.5, %v2098_v39  ;;  %v2113_v19 = vadd.f32 0.5, %v2109_v48 }
 0x5de   :  { %v6041_v45 = vadd.f32 %v2156_v43, %v2152_v27  ;;  %v2137_v50 = vmul.f32 0.5, %v2097_v35  ;;  %v2154_v25 = vmul.f32 %v2130_v29, %v5947_v54 }
 0x5df   :  { %v4893_v24 = vpop.eup %4892  ;;  %v6043_v47 = vadd.f32 %v2155_v57, %v2151_v42  ;;  %4900 = vtanh.f32 %v2138_v61  ;;  %v2153_v49 = vmul.f32 %v2129_v51, %v5949_v34 }
 0x5e0   :  { %v4895_v31 = vpop.eup %4894  ;;  %4902 = vtanh.f32 %v6041_v45  ;;  %v2158_v26 = vmul.f32 %v4893_v24, %v2114_v13 }
 0x5e1   :  { %4904 = vtanh.f32 %v6043_v47  ;;  %v2157_v33 = vmul.f32 %v4895_v31, %v2113_v19  ;;  %v3573_v19 = vld [vmem:[%s6427_s0 + $0x50] sm:$0xff]  ;;  %v3574_v31 = vld [vmem:[%s6427_s0 + $0x58] sm:$0xff] }
 0x5e2   :  { %v6049_v23 = vadd.f32 %v2158_v26, %v2154_v25  ;;  %4906 = vtanh.f32 %v2137_v50 }
 0x5e3   :  { %v6051_v63 = vadd.f32 %v2157_v33, %v2153_v49  ;;  %v4544_v49 = vpack.c.bf16 %v3574_v31, %v3573_v19  ;;  %v6541_v33 = vld [vmem:[#allocation19_spill] sm:$0xff] }
 0x5e4   :  { %4908 = vtanh.f32 %v6049_v23 }
 0x5e5   :  { %v4897_v21 = vpop.eup %4896  ;;  %4910 = vtanh.f32 %v6051_v63 }
 0x5e6   :  { %v4899_v2 = vpop.eup %4898  ;;  %v2144_v54 = vmul.f32 0.5, %v4897_v21 }
 0x5e7   :  { %v2143_v29 = vmul.f32 0.5, %v4899_v2  ;;  %v6542_v2 = vld [vmem:[#allocation8_spill] sm:$0xff] }
 0x5e8   :  { %v2148_v48 = vadd.f32 0.5, %v2144_v54 }
 0x5e9   :  { %v4901_v62 = vpop.eup %4900  ;;  %v2147_v27 = vadd.f32 0.5, %v2143_v29 }
 0x5ea   :  { %v4903_v34 = vpop.eup %4902  ;;  %v2146_v39 = vmul.f32 0.5, %v4901_v62 }
 0x5eb   :  { %v4905_v46 = vpop.eup %4904  ;;  %v2168_v44 = vmul.f32 %v4903_v34, %v2148_v48  ;;  %v6543_v48 = vld [vmem:[#allocation6_spill] sm:$0xff] }
 0x5ec   :  { %v4907_v43 = vpop.eup %4906  ;;  %v2150_v35 = vadd.f32 0.5, %v2146_v39  ;;  %v2167_v42 = vmul.f32 %v4905_v46, %v2147_v27  ;;  %v6544_v39 = vld [vmem:[#allocation9_spill] sm:$0xff] }
 0x5ed   :  { %v2145_v51 = vmul.f32 0.5, %v4907_v43 }
 0x5ee   :  { %v4909_v57 = vpop.eup %4908  ;;  %v4536_v61 = vpack.c.bf16 %v2168_v44, %v2167_v42 }
 0x5ef   :  { %v4911_v13 = vpop.eup %4910  ;;  %v2149_v50 = vadd.f32 0.5, %v2145_v51  ;;  %v2170_v24 = vmul.f32 %v4909_v57, %v2150_v35  ;;  %v6545_v35 = vld [vmem:[#allocation10_spill] sm:$0xff] }
 0x5f0   :  { %4537 = vmatprep.subr.bf16.mxu1 %v4536_v61 }
 0x5f1   :  { %4539 = vmatpush3.bf16.msra.mxu1 %v4536_v61  ;;  %v2169_v25 = vmul.f32 %v4911_v13, %v2149_v50  ;;  %v6546_v61 = vld [vmem:[#allocation7_spill] sm:$0xff] }
 0x5f3   :  { %v4540_v26 = vpack.c.bf16 %v2170_v24, %v2169_v25  ;;  %v6547_v24 = vld [vmem:[#allocation5_spill] sm:$0xff] }
 0x5f5   :  { %4541 = vmatprep.subr.bf16.mxu1 %v4540_v26 }
 0x5f6   :  { %4543 = vmatpush3.bf16.msra.mxu1 %v4540_v26 }
 0x5f7   :  { %4545 = vmatprep.subr.bf16.mxu1 %v4544_v49 }
 0x5f9   :  { %4294 = vmatmul.mubr.msk.f32.vlgmr.msra.gmra.mrb[32].mxu1 %vm171_vm1, %v5700_v52 }
 0x5fa   :  { %4296 = vmatprep.mubr.msk.f32.mxu1 %vm171_vm1, %v5707_v53  ;;  %4547 = vmatpush3.bf16.msra.mxu1 %v4544_v49 }
 0x5fd   :  { %4297 = vmatmul.mubr.msk.f32.gmra.mrb[34].mxu1 %vm171_vm1, %v5714_v55 }
 0x5fe   :  { %4299 = vmatprep.mubr.msk.f32.mxu1 %vm171_vm1, %v5721_v56 }
 0x601   :  { %4300 = vmatmul.mubr.msk.f32.gmra.mrb[36].mxu1 %vm171_vm1, %v5728_v58 }
 0x602   :  { %4302 = vmatprep.mubr.msk.f32.mxu1 %vm171_vm1, %v5735_v1 }
 0x605   :  { %4303 = vmatmul.mubr.msk.f32.gmra.mrb[38].mxu1 %vm171_vm1, %v5742_v16 }
 0x606   :  { %4305 = vmatprep.mubr.msk.f32.mxu1 %vm171_vm1, %v5749_v5 }
 0x609   :  { %4306 = vmatmul.mubr.msk.f32.gmra.mrb[40].mxu1 %vm171_vm1, %v5756_v8 }
 0x60a   :  { %4308 = vmatprep.mubr.msk.f32.mxu1 %vm171_vm1, %v5763_v10 }
 0x60d   :  { %4309 = vmatmul.mubr.msk.f32.gmra.mrb[42].mxu1 %vm171_vm1, %v5770_v4 }
 0x60e   :  { %4311 = vmatprep.mubr.msk.f32.mxu1 %vm171_vm1, %v5777_v18 }
 0x611   :  { %4312 = vmatmul.mubr.msk.f32.gmra.mrb[44].mxu1 %vm171_vm1, %v5784_v38 }
 0x612   :  { %4314 = vmatprep.mubr.msk.f32.mxu1 %vm171_vm1, %v5791_v60 }
 0x615   :  { %4315 = vmatmul.mubr.msk.f32.gmra.mrb[46].mxu1 %vm171_vm1, %v5798_v3 }
 0x616   :  { %4321 = vmatprep.mubr.msk.f32.mxu1 %vm365_vm2, %v5805_v12 }
 0x619   :  { %4322 = vmatmul.mubr.msk.f32.vlgmr.msra.gmra.mrb[32].mxu1 %vm365_vm2, %v5812_v7 }
 0x61a   :  { %4324 = vmatprep.mubr.msk.f32.mxu1 %vm365_vm2, %v5819_v22 }
 0x61d   :  { %4325 = vmatmul.mubr.msk.f32.gmra.mrb[34].mxu1 %vm365_vm2, %v5826_v32 }
 0x61e   :  { %4327 = vmatprep.mubr.msk.f32.mxu1 %vm365_vm2, %v5833_v0 }
 0x621   :  { %4328 = vmatmul.mubr.msk.f32.gmra.mrb[36].mxu1 %vm365_vm2, %v5840_v14 }
 0x622   :  { %4330 = vmatprep.mubr.msk.f32.mxu1 %vm365_vm2, %v5847_v6 }
 0x625   :  { %4331 = vmatmul.mubr.msk.f32.gmra.mrb[38].mxu1 %vm365_vm2, %v5854_v9 }
 0x626   :  { %4333 = vmatprep.mubr.msk.f32.mxu1 %vm365_vm2, %v5861_v28 }
 0x629   :  { %4334 = vmatmul.mubr.msk.f32.gmra.mrb[40].mxu1 %vm365_vm2, %v5868_v36 }
 0x62a   :  { %4336 = vmatprep.mubr.msk.f32.mxu1 %vm365_vm2, %v5875_v59 }
 0x62d   :  { %4337 = vmatmul.mubr.msk.f32.gmra.mrb[42].mxu1 %vm365_vm2, %v5882_v11 }
 0x62e   :  { %4339 = vmatprep.mubr.msk.f32.mxu1 %vm365_vm2, %v5889_v15 }
 0x631   :  { %4340 = vmatmul.mubr.msk.f32.gmra.mrb[44].mxu1 %vm365_vm2, %v5896_v17 }
 0x632   :  { %4342 = vmatprep.mubr.msk.f32.mxu1 %vm365_vm2, %v6527_v41 }
 0x635   :  { %4343 = vmatmul.mubr.msk.f32.gmra.mrb[46].mxu1 %vm365_vm2, %v6528_v37 }
 0x636   :  { %4413 = vmatprep.mubr.msk.f32.mxu1 %vm171_vm1, %v6541_v33  ;;  %v6548_v33 = vld [vmem:[#allocation11_spill] sm:$0xff] }
 0x6ec   :  { %v4323_v21 = vpop.f32.mrb[32].mxu1 }
 0x6ed   :  { %v2465_v54 = vadd.f32 %v4323_v21, %v6542_v2  ;;  %v2385_v29 = vpop.f32.mrb[33].mxu1 }
 0x6ee   :  { %v2464_v62 = vadd.f32 %v2385_v29, %v6543_v48  ;;  %v6549_v29 = vld [vmem:[#allocation12_spill] sm:$0xff] }
 0x6ef   :  { %v2481_v34 = vmul.f32 0.5, %v2465_v54 }
 0x6f0   :  { %v4326_v27 = vpop.f32.mrb[34].mxu1  ;;  %v2480_v43 = vmul.f32 0.5, %v2464_v62 }
 0x6f1   :  { %v2467_v46 = vadd.f32 %v4326_v27, %v6544_v39  ;;  %v2395_v44 = vpop.f32.mrb[35].mxu1  ;;  %4912 = vtanh.f32 %v2481_v34 }
 0x6f2   :  { %v2466_v42 = vadd.f32 %v2395_v44, %v6545_v35  ;;  %4914 = vtanh.f32 %v2480_v43  ;;  %v6550_v44 = vld [vmem:[#allocation13_spill] sm:$0xff] }
 0x6f3   :  { %v2483_v51 = vmul.f32 0.5, %v2467_v46 }
 0x6f4   :  { %v4329_v57 = vpop.f32.mrb[36].mxu1  ;;  %v2482_v31 = vmul.f32 0.5, %v2466_v42  ;;  %v6551_v42 = vld [vmem:[#allocation14_spill] sm:$0xff] }
 0x6f5   :  { %v2469_v13 = vadd.f32 %v4329_v57, %v6546_v61  ;;  %v2405_v50 = vpop.f32.mrb[37].mxu1  ;;  %4916 = vtanh.f32 %v2483_v51 }
 0x6f6   :  { %v2468_v19 = vadd.f32 %v2405_v50, %v6547_v24  ;;  %v6554_v24 = vld [vmem:[#allocation18_spill] sm:$0xff] }
 0x6f7   :  { %v2497_v25 = vmul.f32 0.5, %v2469_v13 }
 0x6f8   :  { %v2496_v26 = vmul.f32 0.5, %v2468_v19  ;;  %v4332_v49 = vpop.f32.mrb[38].mxu1 }
 0x6f9   :  { %4918 = vtanh.f32 %v2497_v25  ;;  %v2471_v21 = vadd.f32 %v4332_v49, %v6548_v33  ;;  %v2415_v54 = vpop.f32.mrb[39].mxu1  ;;  %v6552_v25 = vld [vmem:[#allocation15_spill] sm:$0xff] }
 0x6fa   :  { %4920 = vtanh.f32 %v2496_v26  ;;  %v2470_v62 = vadd.f32 %v2415_v54, %v6549_v29 }
 0x6fb   :  { %4922 = vtanh.f32 %v2482_v31  ;;  %v2499_v27 = vmul.f32 0.5, %v2471_v21  ;;  %v4913_v13 = vpop.eup %4912  ;;  %v6553_v31 = vld [vmem:[#allocation16_spill] sm:$0xff] }
 0x6fc   :  { %v2498_v34 = vmul.f32 0.5, %v2470_v62  ;;  %v4335_v46 = vpop.f32.mrb[40].mxu1  ;;  %v4915_v50 = vpop.eup %4914  ;;  %v2489_v29 = vmul.f32 0.5, %v4913_v13 }
 0x6fd   :  { %4924 = vtanh.f32 %v2499_v27  ;;  %v2473_v43 = vadd.f32 %v4335_v46, %v6550_v44  ;;  %v2425_v57 = vpop.f32.mrb[41].mxu1  ;;  %v2488_v27 = vmul.f32 0.5, %v4915_v50 }
 0x6fe   :  { %4926 = vtanh.f32 %v2498_v34  ;;  %v2472_v51 = vadd.f32 %v2425_v57, %v6551_v42  ;;  %v2493_v61 = vadd.f32 0.5, %v2489_v29 }
 0x6ff   :  { %4928 = vtanh.f32 %v2473_v43  ;;  %v4917_v54 = vpop.eup %4916  ;;  %v2492_v35 = vadd.f32 0.5, %v2488_v27 }
 0x700   :  { %4930 = vtanh.f32 %v2472_v51  ;;  %v4338_v19 = vpop.f32.mrb[42].mxu1  ;;  %v2491_v50 = vmul.f32 0.5, %v4917_v54 }
 0x701   :  { %v2475_v26 = vadd.f32 %v4338_v19, %v6552_v25  ;;  %v2435_v49 = vpop.f32.mrb[43].mxu1 }
 0x702   :  { %v2474_v21 = vadd.f32 %v2435_v49, %v6553_v31 }
 0x703   :  { %v4919_v62 = vpop.eup %4918  ;;  %4932 = vtanh.f32 %v2475_v26 }
 0x704   :  { %v4921_v46 = vpop.eup %4920  ;;  %v2505_v44 = vmul.f32 0.5, %v4919_v62  ;;  %4934 = vtanh.f32 %v2474_v21  ;;  %v4341_v34 = vpop.f32.mrb[44].mxu1 }
 0x705   :  { %v4923_v57 = vpop.eup %4922  ;;  %v2504_v42 = vmul.f32 0.5, %v4921_v46  ;;  %v2477_v43 = vadd.f32 %v4341_v34, %v6508_v40  ;;  %v2445_v51 = vpop.f32.mrb[45].mxu1 }
 0x706   :  { %v2509_v33 = vadd.f32 0.5, %v2505_v44  ;;  %v2476_v19 = vadd.f32 %v2445_v51, %v6554_v24  ;;  %v2490_v26 = vmul.f32 0.5, %v4923_v57 }
 0x707   :  { %v4925_v25 = vpop.eup %4924  ;;  %v2508_v49 = vadd.f32 0.5, %v2504_v42  ;;  %v2517_v31 = vmul.f32 0.5, %v2477_v43  ;;  %v2495_v43 = vadd.f32 0.5, %v2491_v50 }
 0x708   :  { %v4927_v13 = vpop.eup %4926  ;;  %v2507_v39 = vmul.f32 0.5, %v4925_v25  ;;  %v2516_v62 = vmul.f32 0.5, %v2476_v19  ;;  %v4344_v21 = vpop.f32.mrb[46].mxu1  ;;  %v2533_v46 = vmul.f32 %v2509_v33, %v6041_v45 }
 0x709   :  { %v4929_v48 = vpop.eup %4928  ;;  %v2506_v2 = vmul.f32 0.5, %v4927_v13  ;;  %4936 = vtanh.f32 %v2517_v31  ;;  %v2479_v44 = vadd.f32 %v4344_v21, %v5469_v20  ;;  %v2455_v34 = vpop.f32.mrb[47].mxu1  ;;  %v2532_v54 = vmul.f32 %v2508_v49, %v6043_v47 }
 0x70a   :  { %v4931_v51 = vpop.eup %4930  ;;  %v2511_v24 = vadd.f32 0.5, %v2507_v39  ;;  %v2537_v29 = vmul.f32 %v4929_v48, %v2493_v61  ;;  %4938 = vtanh.f32 %v2516_v62  ;;  %v2478_v42 = vadd.f32 %v2455_v34, %v5471_v30 }
 0x70b   :  { %v2510_v27 = vadd.f32 0.5, %v2506_v2  ;;  %v2536_v25 = vmul.f32 %v4931_v51, %v2492_v35  ;;  %v2519_v57 = vmul.f32 0.5, %v2479_v44  ;;  %v2494_v31 = vadd.f32 0.5, %v2490_v26 }
 0x70c   :  { %v6143_v19 = vadd.f32 %v2537_v29, %v2533_v46  ;;  %v2518_v45 = vmul.f32 0.5, %v2478_v42  ;;  %v2535_v48 = vmul.f32 %v2511_v24, %v6049_v23 }
 0x70d   :  { %v4933_v33 = vpop.eup %4932  ;;  %v6145_v13 = vadd.f32 %v2536_v25, %v2532_v54  ;;  %4940 = vtanh.f32 %v2519_v57  ;;  %v2534_v47 = vmul.f32 %v2510_v27, %v6051_v63 }
 0x70e   :  { %v4935_v21 = vpop.eup %4934  ;;  %4942 = vtanh.f32 %v6143_v19  ;;  %v2539_v39 = vmul.f32 %v4933_v33, %v2495_v43 }
 0x70f   :  { %4944 = vtanh.f32 %v6145_v13  ;;  %v2538_v2 = vmul.f32 %v4935_v21, %v2494_v31  ;;  %v3607_v31 = vld [vmem:[%s6427_s0 + $0x60] sm:$0xff]  ;;  %v3608_v21 = vld [vmem:[%s6427_s0 + $0x68] sm:$0xff] }
 0x710   :  { %v6151_v35 = vadd.f32 %v2539_v39, %v2535_v48  ;;  %4946 = vtanh.f32 %v2518_v45 }
 0x711   :  { %v6153_v61 = vadd.f32 %v2538_v2, %v2534_v47  ;;  %v4556_v47 = vpack.c.bf16 %v3608_v21, %v3607_v31 }
 0x712   :  { %4948 = vtanh.f32 %v6151_v35 }
 0x713   :  { %v4937_v49 = vpop.eup %4936  ;;  %4950 = vtanh.f32 %v6153_v61 }
 0x714   :  { %v4939_v50 = vpop.eup %4938  ;;  %v2525_v23 = vmul.f32 0.5, %v4937_v49 }
 0x715   :  { %v2524_v24 = vmul.f32 0.5, %v4939_v50  ;;  %v6563_v50 = vld [vmem:[#allocation13_spill] sm:$0xff] }
 0x716   :  { %v2529_v26 = vadd.f32 0.5, %v2525_v23 }
 0x717   :  { %v4941_v62 = vpop.eup %4940  ;;  %v2528_v46 = vadd.f32 0.5, %v2524_v24 }
 0x718   :  { %v4943_v63 = vpop.eup %4942  ;;  %v2527_v44 = vmul.f32 0.5, %v4941_v62 }
 0x719   :  { %v4945_v34 = vpop.eup %4944  ;;  %v2549_v51 = vmul.f32 %v4943_v63, %v2529_v26  ;;  %v6564_v26 = vld [vmem:[#allocation14_spill] sm:$0xff] }
 0x71a   :  { %v4947_v29 = vpop.eup %4946  ;;  %v2531_v42 = vadd.f32 0.5, %v2527_v44  ;;  %v2548_v54 = vmul.f32 %v4945_v34, %v2528_v46  ;;  %v6565_v34 = vld [vmem:[#allocation15_spill] sm:$0xff] }
 0x71b   :  { %v2526_v27 = vmul.f32 0.5, %v4947_v29 }
 0x71c   :  { %v4949_v25 = vpop.eup %4948  ;;  %v4548_v57 = vpack.c.bf16 %v2549_v51, %v2548_v54  ;;  %v6566_v54 = vld [vmem:[#allocation16_spill] sm:$0xff] }
 0x71d   :  { %v4951_v43 = vpop.eup %4950  ;;  %v2530_v45 = vadd.f32 0.5, %v2526_v27  ;;  %v2551_v33 = vmul.f32 %v4949_v25, %v2531_v42 }
 0x71e   :  { %4549 = vmatprep.subr.bf16.mxu0 %v4548_v57 }
 0x71f   :  { %4551 = vmatpush3.bf16.msra.mxu0 %v4548_v57  ;;  %v2550_v48 = vmul.f32 %v4951_v43, %v2530_v45 }
 0x721   :  { %v4552_v39 = vpack.c.bf16 %v2551_v33, %v2550_v48 }
 0x723   :  { %4553 = vmatprep.subr.bf16.mxu0 %v4552_v39 }
 0x724   :  { %4555 = vmatpush3.bf16.msra.mxu0 %v4552_v39 }
 0x725   :  { %4557 = vmatprep.subr.bf16.mxu0 %v4556_v47 }
 0x727   :  { %4354 = vmatmul.mubr.msk.f32.vlgmr.msra.gmra.mrb[48].mxu0 %vm171_vm1, %v5700_v52 }
 0x728   :  { %4356 = vmatprep.mubr.msk.f32.mxu0 %vm171_vm1, %v5707_v53  ;;  %4559 = vmatpush3.bf16.msra.mxu0 %v4556_v47  ;;  %v6555_v53 = vld [vmem:[#allocation8_spill] sm:$0xff] }
 0x72b   :  { %4357 = vmatmul.mubr.msk.f32.gmra.mrb[50].mxu0 %vm171_vm1, %v5714_v55 }
 0x72c   :  { %4359 = vmatprep.mubr.msk.f32.mxu0 %vm171_vm1, %v5721_v56 }
 0x72f   :  { %4360 = vmatmul.mubr.msk.f32.gmra.mrb[52].mxu0 %vm171_vm1, %v5728_v58  ;;  %v6556_v58 = vld [vmem:[#allocation6_spill] sm:$0xff] }
 0x730   :  { %4362 = vmatprep.mubr.msk.f32.mxu0 %vm171_vm1, %v5735_v1 }
 0x733   :  { %4363 = vmatmul.mubr.msk.f32.gmra.mrb[54].mxu0 %vm171_vm1, %v5742_v16 }
 0x734   :  { %4365 = vmatprep.mubr.msk.f32.mxu0 %vm171_vm1, %v5749_v5 }
 0x737   :  { %4366 = vmatmul.mubr.msk.f32.gmra.mrb[56].mxu0 %vm171_vm1, %v5756_v8  ;;  %v6557_v8 = vld [vmem:[#allocation9_spill] sm:$0xff] }
 0x738   :  { %4368 = vmatprep.mubr.msk.f32.mxu0 %vm171_vm1, %v5763_v10 }
 0x73b   :  { %4369 = vmatmul.mubr.msk.f32.gmra.mrb[58].mxu0 %vm171_vm1, %v5770_v4 }
 0x73c   :  { %4371 = vmatprep.mubr.msk.f32.mxu0 %vm171_vm1, %v5777_v18 }
 0x73f   :  { %4372 = vmatmul.mubr.msk.f32.gmra.mrb[60].mxu0 %vm171_vm1, %v5784_v38  ;;  %v6558_v38 = vld [vmem:[#allocation10_spill] sm:$0xff] }
 0x740   :  { %4374 = vmatprep.mubr.msk.f32.mxu0 %vm171_vm1, %v5791_v60 }
 0x743   :  { %4375 = vmatmul.mubr.msk.f32.gmra.mrb[62].mxu0 %vm171_vm1, %v5798_v3 }
 0x744   :  { %4381 = vmatprep.mubr.msk.f32.mxu0 %vm365_vm2, %v5805_v12 }
 0x747   :  { %4382 = vmatmul.mubr.msk.f32.vlgmr.msra.gmra.mrb[48].mxu0 %vm365_vm2, %v5812_v7  ;;  %v6559_v7 = vld [vmem:[#allocation7_spill] sm:$0xff] }
 0x748   :  { %4384 = vmatprep.mubr.msk.f32.mxu0 %vm365_vm2, %v5819_v22 }
 0x74b   :  { %4385 = vmatmul.mubr.msk.f32.gmra.mrb[50].mxu0 %vm365_vm2, %v5826_v32 }
 0x74c   :  { %4387 = vmatprep.mubr.msk.f32.mxu0 %vm365_vm2, %v5833_v0  ;;  %v6560_v0 = vld [vmem:[#allocation5_spill] sm:$0xff] }
 0x74f   :  { %4388 = vmatmul.mubr.msk.f32.gmra.mrb[52].mxu0 %vm365_vm2, %v5840_v14 }
 0x750   :  { %4390 = vmatprep.mubr.msk.f32.mxu0 %vm365_vm2, %v5847_v6 }
 0x753   :  { %4391 = vmatmul.mubr.msk.f32.gmra.mrb[54].mxu0 %vm365_vm2, %v5854_v9 }
 0x754   :  { %4393 = vmatprep.mubr.msk.f32.mxu0 %vm365_vm2, %v5861_v28 }
 0x757   :  { %4394 = vmatmul.mubr.msk.f32.gmra.mrb[56].mxu0 %vm365_vm2, %v5868_v36 }
 0x758   :  { %4396 = vmatprep.mubr.msk.f32.mxu0 %vm365_vm2, %v5875_v59  ;;  %v6561_v59 = vld [vmem:[#allocation11_spill] sm:$0xff] }
 0x75b   :  { %4397 = vmatmul.mubr.msk.f32.gmra.mrb[58].mxu0 %vm365_vm2, %v5882_v11 }
 0x75c   :  { %4399 = vmatprep.mubr.msk.f32.mxu0 %vm365_vm2, %v5889_v15 }
 0x75f   :  { %4400 = vmatmul.mubr.msk.f32.gmra.mrb[60].mxu0 %vm365_vm2, %v5896_v17  ;;  %v6562_v17 = vld [vmem:[#allocation12_spill] sm:$0xff] }
 0x760   :  { %4402 = vmatprep.mubr.msk.f32.mxu0 %vm365_vm2, %v6527_v41 }
 0x763   :  { %4403 = vmatmul.mubr.msk.f32.gmra.mrb[62].mxu0 %vm365_vm2, %v6528_v37 }
 0x81a   :  { %v4383_v52 = vpop.f32.mrb[48].mxu0 }
 0x81b   :  { %v2846_v55 = vadd.f32 %v4383_v52, %v6555_v53  ;;  %v2766_v56 = vpop.f32.mrb[49].mxu0 }
 0x81c   :  { %v2845_v1 = vadd.f32 %v2766_v56, %v6556_v58 }
 0x81d   :  { %v2862_v5 = vmul.f32 0.5, %v2846_v55  ;;  %v6567_v55 = vld [vmem:[#allocation18_spill] sm:$0xff] }
 0x81e   :  { %v4386_v16 = vpop.f32.mrb[50].mxu0  ;;  %v2861_v18 = vmul.f32 0.5, %v2845_v1 }
 0x81f   :  { %v2848_v10 = vadd.f32 %v4386_v16, %v6557_v8  ;;  %v2776_v4 = vpop.f32.mrb[51].mxu0  ;;  %4952 = vtanh.f32 %v2862_v5 }
 0x820   :  { %v2847_v60 = vadd.f32 %v2776_v4, %v6558_v38  ;;  %4954 = vtanh.f32 %v2861_v18 }
 0x821   :  { %v2864_v3 = vmul.f32 0.5, %v2848_v10 }
 0x822   :  { %v4389_v12 = vpop.f32.mrb[52].mxu0  ;;  %v2863_v6 = vmul.f32 0.5, %v2847_v60 }
 0x823   :  { %v2850_v22 = vadd.f32 %v4389_v12, %v6559_v7  ;;  %v2786_v32 = vpop.f32.mrb[53].mxu0  ;;  %4956 = vtanh.f32 %v2864_v3 }
 0x824   :  { %v2849_v14 = vadd.f32 %v2786_v32, %v6560_v0 }
 0x825   :  { %v2878_v9 = vmul.f32 0.5, %v2850_v22 }
 0x826   :  { %v2877_v28 = vmul.f32 0.5, %v2849_v14  ;;  %v4392_v36 = vpop.f32.mrb[54].mxu0 }
 0x827   :  { %4958 = vtanh.f32 %v2878_v9  ;;  %v2852_v11 = vadd.f32 %v4392_v36, %v6561_v59  ;;  %v2796_v15 = vpop.f32.mrb[55].mxu0 }
 0x828   :  { %4960 = vtanh.f32 %v2877_v28  ;;  %v2851_v41 = vadd.f32 %v2796_v15, %v6562_v17 }
 0x829   :  { %4962 = vtanh.f32 %v2863_v6  ;;  %v2880_v37 = vmul.f32 0.5, %v2852_v11  ;;  %v4953_v46 = vpop.eup %4952 }
 0x82a   :  { %v2879_v2 = vmul.f32 0.5, %v2851_v41  ;;  %v4395_v49 = vpop.f32.mrb[56].mxu0  ;;  %v4955_v63 = vpop.eup %4954  ;;  %v2870_v57 = vmul.f32 0.5, %v4953_v46 }
 0x82b   :  { %4964 = vtanh.f32 %v2880_v37  ;;  %v2854_v23 = vadd.f32 %v4395_v49, %v6563_v50  ;;  %v2806_v24 = vpop.f32.mrb[57].mxu0  ;;  %v2869_v43 = vmul.f32 0.5, %v4955_v63 }
 0x82c   :  { %4966 = vtanh.f32 %v2879_v2  ;;  %v2853_v62 = vadd.f32 %v2806_v24, %v6564_v26  ;;  %v2874_v16 = vadd.f32 0.5, %v2870_v57 }
 0x82d   :  { %4968 = vtanh.f32 %v2854_v23  ;;  %v4957_v42 = vpop.eup %4956  ;;  %v2873_v5 = vadd.f32 0.5, %v2869_v43 }
 0x82e   :  { %4970 = vtanh.f32 %v2853_v62  ;;  %v4398_v44 = vpop.f32.mrb[58].mxu0  ;;  %v2872_v60 = vmul.f32 0.5, %v4957_v42 }
 0x82f   :  { %v2856_v51 = vadd.f32 %v4398_v44, %v6565_v34  ;;  %v2816_v29 = vpop.f32.mrb[59].mxu0 }
 0x830   :  { %v2855_v27 = vadd.f32 %v2816_v29, %v6566_v54  ;;  %v2876_v62 = vadd.f32 0.5, %v2872_v60 }
 0x831   :  { %v4959_v25 = vpop.eup %4958  ;;  %4972 = vtanh.f32 %v2856_v51 }
 0x832   :  { %v4961_v45 = vpop.eup %4960  ;;  %v2886_v33 = vmul.f32 0.5, %v4959_v25  ;;  %4974 = vtanh.f32 %v2855_v27  ;;  %v4401_v31 = vpop.f32.mrb[60].mxu0 }
 0x833   :  { %v4963_v21 = vpop.eup %4962  ;;  %v2885_v48 = vmul.f32 0.5, %v4961_v45  ;;  %v2858_v39 = vadd.f32 %v4401_v31, %v6508_v40  ;;  %v2826_v47 = vpop.f32.mrb[61].mxu0 }
 0x834   :  { %v2890_v52 = vadd.f32 0.5, %v2886_v33  ;;  %v2857_v56 = vadd.f32 %v2826_v47, %v6567_v55  ;;  %v2871_v3 = vmul.f32 0.5, %v4963_v21 }
 0x835   :  { %v4965_v1 = vpop.eup %4964  ;;  %v2889_v10 = vadd.f32 0.5, %v2885_v48  ;;  %v2898_v4 = vmul.f32 0.5, %v2858_v39 }
 0x836   :  { %v4967_v18 = vpop.eup %4966  ;;  %v2888_v12 = vmul.f32 0.5, %v4965_v1  ;;  %v2897_v22 = vmul.f32 0.5, %v2857_v56  ;;  %v4404_v32 = vpop.f32.mrb[62].mxu0  ;;  %v2914_v6 = vmul.f32 %v2890_v52, %v6143_v19  ;;  %v2875_v44 = vadd.f32 0.5, %v2871_v3 }
 0x837   :  { %v4969_v14 = vpop.eup %4968  ;;  %v2887_v9 = vmul.f32 0.5, %v4967_v18  ;;  %4976 = vtanh.f32 %v2898_v4  ;;  %v2860_v28 = vadd.f32 %v4404_v32, %v5469_v20  ;;  %v2836_v36 = vpop.f32.mrb[63].mxu0  ;;  %v2913_v2 = vmul.f32 %v2889_v10, %v6145_v13  ;;  %v3642_v32 = vld [vmem:[%s6427_s0 + $0x78] sm:$0xff] }
 0x838   :  { %v4971_v11 = vpop.eup %4970  ;;  %v2892_v15 = vadd.f32 0.5, %v2888_v12  ;;  %v2918_v41 = vmul.f32 %v4969_v14, %v2874_v16  ;;  %4978 = vtanh.f32 %v2897_v22  ;;  %v2859_v37 = vadd.f32 %v2836_v36, %v5471_v30  ;;  %v3641_v22 = vld [vmem:[%s6427_s0 + $0x70] sm:$0xff] }
 0x839   :  { %v2891_v49 = vadd.f32 0.5, %v2887_v9  ;;  %v2917_v23 = vmul.f32 %v4971_v11, %v2873_v5  ;;  %v2900_v24 = vmul.f32 0.5, %v2860_v28  ;;  %v4568_v9 = vpack.c.bf16 %v3642_v32, %v3641_v22  ;;  %v5064_v28 = vld [vmem:[%s6426_s2 + $0x8] sm:$0xff]  ;;  %v5065_v36 = vld [vmem:[%s6426_s2 + $0x10] sm:$0xff]  ;;  %v5066_v11 = vld [vmem:[%s6426_s2 + $0x18] sm:$0xff] }
 0x83a   :  { %v6243_v46 = vadd.f32 %v2918_v41, %v2914_v6  ;;  %v2899_v19 = vmul.f32 0.5, %v2859_v37  ;;  %v2916_v42 = vmul.f32 %v2892_v15, %v6151_v35  ;;  %v5067_v15 = vld [vmem:[%s6426_s2 + $0x20] sm:$0xff]  ;;  %v5068_v41 = vld [vmem:[%s6426_s2 + $0x28] sm:$0xff]  ;;  %v5069_v37 = vld [vmem:[%s6426_s2 + $0x30] sm:$0xff] }
 0x83b   :  { %v4973_v63 = vpop.eup %4972  ;;  %v6245_v51 = vadd.f32 %v2917_v23, %v2913_v2  ;;  %4980 = vtanh.f32 %v2900_v24  ;;  %v2915_v13 = vmul.f32 %v2891_v49, %v6153_v61  ;;  %v5070_v2 = vld [vmem:[%s6426_s2 + $0x38] sm:$0xff]  ;;  %v5071_v49 = vld [vmem:[%s6426_s2 + $0x40] sm:$0xff]  ;;  %v5072_v23 = vld [vmem:[%s6426_s2 + $0x48] sm:$0xff] }
 0x83c   :  { %v4975_v29 = vpop.eup %4974  ;;  %4982 = vtanh.f32 %v6243_v46  ;;  %v2920_v27 = vmul.f32 %v4973_v63, %v2876_v62  ;;  %v5073_v24 = vld [vmem:[%s6426_s2 + $0x50] sm:$0xff]  ;;  %v5074_v62 = vld [vmem:[%s6426_s2 + $0x58] sm:$0xff]  ;;  %v5076_v63 = vld [vmem:[%s6426_s2 + $0x68] sm:$0xff] }
 0x83d   :  { %4984 = vtanh.f32 %v6245_v51  ;;  %v2919_v25 = vmul.f32 %v4975_v29, %v2875_v44  ;;  %v5077_v44 = vld [vmem:[%s6426_s2 + $0x70] sm:$0xff]  ;;  %v5078_v29 = vld [vmem:[%s6426_s2 + $0x78] sm:$0xff] }
 0x83e   :  { %v6251_v57 = vadd.f32 %v2920_v27, %v2916_v42  ;;  %4986 = vtanh.f32 %v2899_v19  ;;  %v5075_v19 = vld [vmem:[%s6426_s2 + $0x60] sm:$0xff]  ;;  %v5080_v27 = vld [vmem:[%s6429_s1 + $0x8] sm:$0xff] }
 0x83f   :  { %v6253_v43 = vadd.f32 %v2919_v25, %v2915_v13  ;;  %v5079_v42 = vld [vmem:[%s6429_s1] sm:$0xff]  ;;  %v5081_v13 = vld [vmem:[%s6429_s1 + $0x10] sm:$0xff]  ;;  %v5082_v25 = vld [vmem:[%s6429_s1 + $0x18] sm:$0xff] }
 0x840   :  { %4988 = vtanh.f32 %v6251_v57 }
 0x841   :  { %v4977_v45 = vpop.eup %4976  ;;  %4990 = vtanh.f32 %v6253_v43 }
 0x842   :  { %v4979_v33 = vpop.eup %4978  ;;  %v2906_v35 = vmul.f32 0.5, %v4977_v45  ;;  %v5083_v45 = vld [vmem:[%s6429_s1 + $0x20] sm:$0xff] }
 0x843   :  { %v2905_v31 = vmul.f32 0.5, %v4979_v33  ;;  %v5084_v33 = vld [vmem:[%s6429_s1 + $0x28] sm:$0xff] }
 0x844   :  { %v2910_v21 = vadd.f32 0.5, %v2906_v35  ;;  %v5085_v35 = vld [vmem:[%s6429_s1 + $0x30] sm:$0xff] }
 0x845   :  { %v4981_v48 = vpop.eup %4980  ;;  %v2909_v39 = vadd.f32 0.5, %v2905_v31  ;;  %v5086_v31 = vld [vmem:[%s6429_s1 + $0x38] sm:$0xff] }
 0x846   :  { %v4983_v61 = vpop.eup %4982  ;;  %v2908_v47 = vmul.f32 0.5, %v4981_v48  ;;  %v5088_v48 = vld [vmem:[%s6429_s1 + $0x48] sm:$0xff] }
 0x847   :  { %v4985_v52 = vpop.eup %4984  ;;  %v2930_v56 = vmul.f32 %v4983_v61, %v2910_v21  ;;  %v5087_v21 = vld [vmem:[%s6429_s1 + $0x40] sm:$0xff]  ;;  %v5090_v61 = vld [vmem:[%s6429_s1 + $0x58] sm:$0xff] }
 0x848   :  { %v4987_v1 = vpop.eup %4986  ;;  %v2912_v16 = vadd.f32 0.5, %v2908_v47  ;;  %v2929_v5 = vmul.f32 %v4985_v52, %v2909_v39  ;;  %v5089_v39 = vld [vmem:[%s6429_s1 + $0x50] sm:$0xff]  ;;  %v5091_v47 = vld [vmem:[%s6429_s1 + $0x60] sm:$0xff]  ;;  %v5092_v52 = vld [vmem:[%s6429_s1 + $0x68] sm:$0xff] }
 0x849   :  { %v2907_v10 = vmul.f32 0.5, %v4987_v1  ;;  %v5094_v1 = vld [vmem:[%s6429_s1 + $0x78] sm:$0xff] }
 0x84a   :  { %v4989_v4 = vpop.eup %4988  ;;  %v4560_v18 = vpack.c.bf16 %v2930_v56, %v2929_v5  ;;  %v5093_v56 = vld [vmem:[%s6429_s1 + $0x70] sm:$0xff]  ;;  %v6568_v5 = vmov 0.0  }
 0x84b   :  { %v4991_v60 = vpop.eup %4990  ;;  %v2911_v3 = vadd.f32 0.5, %v2907_v10  ;;  %v2932_v12 = vmul.f32 %v4989_v4, %v2912_v16  ;;  %v5097_v16 = vmov 0.0|0.0   ;;  %4473 = vmatprep.mubr.msk.f32.mxu0 %vm5098_vm3, %v6568_v5 }
 0x84c   :  { %4561 = vmatprep.subr.bf16.mxu1 %v4560_v18  ;;  %4572 = vmatprep.subr.bf16.mxu0 %v5097_v16 }
 0x84d   :  { %4563 = vmatpush3.bf16.msra.mxu1 %v4560_v18  ;;  %v2931_v14 = vmul.f32 %v4991_v60, %v2911_v3 }
 0x84f   :  { %v4564_v6 = vpack.c.bf16 %v2932_v12, %v2931_v14 }
 0x851   :  { %4565 = vmatprep.subr.bf16.mxu1 %v4564_v6 }
 0x852   :  { %4567 = vmatpush3.bf16.msra.mxu1 %v4564_v6 }
 0x853   :  { %4569 = vmatprep.subr.bf16.mxu1 %v4568_v9 }
 0x855   :  { %4414 = vmatmul.mubr.msk.f32.vlgmr.msra.gmra.mrb[48].mxu1 %vm171_vm1, %v5064_v28 }
 0x856   :  { %4416 = vmatprep.mubr.msk.f32.mxu1 %vm171_vm1, %v5065_v36  ;;  %4571 = vmatpush3.bf16.msra.mxu1 %v4568_v9 }
 0x859   :  { %4417 = vmatmul.mubr.msk.f32.gmra.mrb[50].mxu1 %vm171_vm1, %v5066_v11 }
 0x85a   :  { %4419 = vmatprep.mubr.msk.f32.mxu1 %vm171_vm1, %v5067_v15 }
 0x85d   :  { %4420 = vmatmul.mubr.msk.f32.gmra.mrb[52].mxu1 %vm171_vm1, %v5068_v41 }
 0x85e   :  { %4422 = vmatprep.mubr.msk.f32.mxu1 %vm171_vm1, %v5069_v37 }
 0x861   :  { %4423 = vmatmul.mubr.msk.f32.gmra.mrb[54].mxu1 %vm171_vm1, %v5070_v2 }
 0x862   :  { %4425 = vmatprep.mubr.msk.f32.mxu1 %vm171_vm1, %v5071_v49 }
 0x865   :  { %4426 = vmatmul.mubr.msk.f32.gmra.mrb[56].mxu1 %vm171_vm1, %v5072_v23 }
 0x866   :  { %4428 = vmatprep.mubr.msk.f32.mxu1 %vm171_vm1, %v5073_v24 }
 0x869   :  { %4429 = vmatmul.mubr.msk.f32.gmra.mrb[58].mxu1 %vm171_vm1, %v5074_v62 }
 0x86a   :  { %4431 = vmatprep.mubr.msk.f32.mxu1 %vm171_vm1, %v5075_v19 }
 0x86d   :  { %4432 = vmatmul.mubr.msk.f32.gmra.mrb[60].mxu1 %vm171_vm1, %v5076_v63 }
 0x86e   :  { %4434 = vmatprep.mubr.msk.f32.mxu1 %vm171_vm1, %v5077_v44 }
 0x871   :  { %4435 = vmatmul.mubr.msk.f32.gmra.mrb[62].mxu1 %vm171_vm1, %v5078_v29 }
 0x872   :  { %4441 = vmatprep.mubr.msk.f32.mxu1 %vm365_vm2, %v5079_v42 }
 0x875   :  { %4442 = vmatmul.mubr.msk.f32.vlgmr.msra.gmra.mrb[48].mxu1 %vm365_vm2, %v5080_v27 }
 0x876   :  { %4444 = vmatprep.mubr.msk.f32.mxu1 %vm365_vm2, %v5081_v13 }
 0x879   :  { %4445 = vmatmul.mubr.msk.f32.gmra.mrb[50].mxu1 %vm365_vm2, %v5082_v25 }
 0x87a   :  { %4447 = vmatprep.mubr.msk.f32.mxu1 %vm365_vm2, %v5083_v45 }
 0x87d   :  { %4448 = vmatmul.mubr.msk.f32.gmra.mrb[52].mxu1 %vm365_vm2, %v5084_v33 }
 0x87e   :  { %4450 = vmatprep.mubr.msk.f32.mxu1 %vm365_vm2, %v5085_v35 }
 0x881   :  { %4451 = vmatmul.mubr.msk.f32.gmra.mrb[54].mxu1 %vm365_vm2, %v5086_v31 }
 0x882   :  { %4453 = vmatprep.mubr.msk.f32.mxu1 %vm365_vm2, %v5087_v21 }
 0x885   :  { %4454 = vmatmul.mubr.msk.f32.gmra.mrb[56].mxu1 %vm365_vm2, %v5088_v48 }
 0x886   :  { %4456 = vmatprep.mubr.msk.f32.mxu1 %vm365_vm2, %v5089_v39 }
 0x889   :  { %4457 = vmatmul.mubr.msk.f32.gmra.mrb[58].mxu1 %vm365_vm2, %v5090_v61 }
 0x88a   :  { %4459 = vmatprep.mubr.msk.f32.mxu1 %vm365_vm2, %v5091_v47 }
 0x88d   :  { %4460 = vmatmul.mubr.msk.f32.gmra.mrb[60].mxu1 %vm365_vm2, %v5092_v52 }
 0x88e   :  { %4462 = vmatprep.mubr.msk.f32.mxu1 %vm365_vm2, %v5093_v56 }
 0x891   :  { %4463 = vmatmul.mubr.msk.f32.gmra.mrb[62].mxu1 %vm365_vm2, %v5094_v1 }
 0x948   :  { %v4443_v10 = vpop.f32.mrb[48].mxu1 }
 0x949   :  { %v3227_v4 = vadd.f32 %v4443_v10, %v6555_v53  ;;  %v3147_v18 = vpop.f32.mrb[49].mxu1 }
 0x94a   :  { %v3226_v60 = vadd.f32 %v3147_v18, %v6556_v58 }
 0x94b   :  { %v3243_v12 = vmul.f32 0.5, %v3227_v4 }
 0x94c   :  { %v4446_v3 = vpop.f32.mrb[50].mxu1  ;;  %v3242_v14 = vmul.f32 0.5, %v3226_v60 }
 0x94d   :  { %v3229_v22 = vadd.f32 %v4446_v3, %v6557_v8  ;;  %v3157_v32 = vpop.f32.mrb[51].mxu1  ;;  %4992 = vtanh.f32 %v3243_v12 }
 0x94e   :  { %v3228_v6 = vadd.f32 %v3157_v32, %v6558_v38  ;;  %4994 = vtanh.f32 %v3242_v14 }
 0x94f   :  { %v3245_v9 = vmul.f32 0.5, %v3229_v22 }
 0x950   :  { %v4449_v28 = vpop.f32.mrb[52].mxu1  ;;  %v3244_v15 = vmul.f32 0.5, %v3228_v6 }
 0x951   :  { %v3231_v36 = vadd.f32 %v4449_v28, %v6559_v7  ;;  %v3167_v11 = vpop.f32.mrb[53].mxu1  ;;  %4996 = vtanh.f32 %v3245_v9 }
 0x952   :  { %v3230_v53 = vadd.f32 %v3167_v11, %v6560_v0 }
 0x953   :  { %v3259_v41 = vmul.f32 0.5, %v3231_v36 }
 0x954   :  { %v3258_v58 = vmul.f32 0.5, %v3230_v53  ;;  %v4452_v37 = vpop.f32.mrb[54].mxu1 }
 0x955   :  { %4998 = vtanh.f32 %v3259_v41  ;;  %v3233_v8 = vadd.f32 %v4452_v37, %v6561_v59  ;;  %v3177_v2 = vpop.f32.mrb[55].mxu1 }
 0x956   :  { %5000 = vtanh.f32 %v3258_v58  ;;  %v3232_v38 = vadd.f32 %v3177_v2, %v6562_v17 }
 0x957   :  { %5002 = vtanh.f32 %v3244_v15  ;;  %v3261_v49 = vmul.f32 0.5, %v3233_v8  ;;  %v4993_v19 = vpop.eup %4992 }
 0x958   :  { %v3260_v23 = vmul.f32 0.5, %v3232_v38  ;;  %v4455_v7 = vpop.f32.mrb[56].mxu1  ;;  %v4995_v63 = vpop.eup %4994  ;;  %v3251_v13 = vmul.f32 0.5, %v4993_v19 }
 0x959   :  { %5004 = vtanh.f32 %v3261_v49  ;;  %v3235_v24 = vadd.f32 %v4455_v7, %v6563_v50  ;;  %v3187_v0 = vpop.f32.mrb[57].mxu1  ;;  %v3250_v25 = vmul.f32 0.5, %v4995_v63 }
 0x95a   :  { %5006 = vtanh.f32 %v3260_v23  ;;  %v3234_v62 = vadd.f32 %v3187_v0, %v6564_v26  ;;  %v3255_v61 = vadd.f32 0.5, %v3251_v13 }
 0x95b   :  { %5008 = vtanh.f32 %v3235_v24  ;;  %v4997_v17 = vpop.eup %4996  ;;  %v3254_v47 = vadd.f32 0.5, %v3250_v25 }
 0x95c   :  { %5010 = vtanh.f32 %v3234_v62  ;;  %v4458_v59 = vpop.f32.mrb[58].mxu1  ;;  %v3253_v1 = vmul.f32 0.5, %v4997_v17 }
 0x95d   :  { %v3237_v44 = vadd.f32 %v4458_v59, %v6565_v34  ;;  %v3197_v29 = vpop.f32.mrb[59].mxu1 }
 0x95e   :  { %v3236_v42 = vadd.f32 %v3197_v29, %v6566_v54  ;;  %v3257_v53 = vadd.f32 0.5, %v3253_v1 }
 0x95f   :  { %v4999_v27 = vpop.eup %4998  ;;  %5012 = vtanh.f32 %v3237_v44 }
 0x960   :  { %v5001_v50 = vpop.eup %5000  ;;  %v3267_v45 = vmul.f32 0.5, %v4999_v27  ;;  %5014 = vtanh.f32 %v3236_v42  ;;  %v4461_v33 = vpop.f32.mrb[60].mxu1 }
 0x961   :  { %v5003_v26 = vpop.eup %5002  ;;  %v3266_v35 = vmul.f32 0.5, %v5001_v50  ;;  %v3239_v31 = vadd.f32 %v4461_v33, %v6508_v40  ;;  %v3207_v21 = vpop.f32.mrb[61].mxu1 }
 0x962   :  { %v3271_v48 = vadd.f32 0.5, %v3267_v45  ;;  %v3238_v34 = vadd.f32 %v3207_v21, %v6567_v55  ;;  %v3252_v5 = vmul.f32 0.5, %v5003_v26 }
 0x963   :  { %v5005_v39 = vpop.eup %5004  ;;  %v3270_v54 = vadd.f32 0.5, %v3266_v35  ;;  %v3279_v52 = vmul.f32 0.5, %v3239_v31  ;;  %v3326_v31 = vld [vmem:[%s6430_s4] sm:$0xff] }
 0x964   :  { %v5007_v56 = vpop.eup %5006  ;;  %v3269_v10 = vmul.f32 0.5, %v5005_v39  ;;  %v3278_v4 = vmul.f32 0.5, %v3238_v34  ;;  %v4464_v18 = vpop.f32.mrb[62].mxu1  ;;  %v3295_v3 = vmul.f32 %v3271_v48, %v6243_v46  ;;  %v3256_v58 = vadd.f32 0.5, %v3252_v5 }
 0x965   :  { %v5009_v60 = vpop.eup %5008  ;;  %v3268_v12 = vmul.f32 0.5, %v5007_v56  ;;  %5016 = vtanh.f32 %v3279_v52  ;;  %v3241_v40 = vadd.f32 %v4464_v18, %v5469_v20  ;;  %v3217_v22 = vpop.f32.mrb[63].mxu1  ;;  %v3294_v9 = vmul.f32 %v3270_v54, %v6245_v51 }
 0x966   :  { %v5011_v55 = vpop.eup %5010  ;;  %v3273_v32 = vadd.f32 0.5, %v3269_v10  ;;  %v3299_v14 = vmul.f32 %v5009_v60, %v3255_v61  ;;  %5018 = vtanh.f32 %v3278_v4  ;;  %v3240_v6 = vadd.f32 %v3217_v22, %v5471_v30 }
 0x967   :  { %v3272_v28 = vadd.f32 0.5, %v3268_v12  ;;  %v3298_v36 = vmul.f32 %v5011_v55, %v3254_v47  ;;  %v3281_v11 = vmul.f32 0.5, %v3241_v40 }
 0x968   :  { %v3303_v15 = vadd.f32 %v3299_v14, %v3295_v3  ;;  %v3280_v41 = vmul.f32 0.5, %v3240_v6  ;;  %v3297_v8 = vmul.f32 %v3273_v32, %v6251_v57 }
 0x969   :  { %v5013_v46 = vpop.eup %5012  ;;  %v3302_v37 = vadd.f32 %v3298_v36, %v3294_v9  ;;  %5020 = vtanh.f32 %v3281_v11  ;;  %v3296_v30 = vmul.f32 %v3272_v28, %v6253_v43 }
 0x96a   :  { %v5015_v20 = vpop.eup %5014  ;;  %5022 = vtanh.f32 %v3303_v15  ;;  %3320 = vst.msk [vmem:[#allocation3 + $0x8] sm:$0xff] %vm24_vm0, %v3303_v15  ;;  %v3301_v2 = vmul.f32 %v5013_v46, %v3257_v53 }
 0x96b   :  { %5024 = vtanh.f32 %v3302_v37  ;;  %3319 = vst.msk [vmem:[#allocation3] sm:$0xff] %vm24_vm0, %v3302_v37  ;;  %v3300_v51 = vmul.f32 %v5015_v20, %v3256_v58 }
 0x96c   :  { %v3305_v38 = vadd.f32 %v3301_v2, %v3297_v8  ;;  %5026 = vtanh.f32 %v3280_v41 }
 0x96d   :  { %v3304_v49 = vadd.f32 %v3300_v51, %v3296_v30 }
 0x96e   :  { %5028 = vtanh.f32 %v3305_v38  ;;  %3322 = vst.msk [vmem:[#allocation3 + $0x18] sm:$0xff] %vm24_vm0, %v3305_v38 }
 0x96f   :  { %v5017_v23 = vpop.eup %5016  ;;  %5030 = vtanh.f32 %v3304_v49  ;;  %3321 = vst.msk [vmem:[#allocation3 + $0x10] sm:$0xff] %vm24_vm0, %v3304_v49 }
 0x970   :  { %v5019_v57 = vpop.eup %5018  ;;  %v3287_v7 = vmul.f32 0.5, %v5017_v23 }
 0x971   :  { %v3286_v24 = vmul.f32 0.5, %v5019_v57 }
 0x972   :  { %v3291_v0 = vadd.f32 0.5, %v3287_v7 }
 0x973   :  { %v5021_v62 = vpop.eup %5020  ;;  %v3290_v43 = vadd.f32 0.5, %v3286_v24 }
 0x974   :  { %v5023_v19 = vpop.eup %5022  ;;  %v3289_v63 = vmul.f32 0.5, %v5021_v62 }
 0x975   :  { %v5025_v59 = vpop.eup %5024  ;;  %v3311_v44 = vmul.f32 %v5023_v19, %v3291_v0 }
 0x976   :  { %v5027_v29 = vpop.eup %5026  ;;  %v3310_v17 = vmul.f32 %v5025_v59, %v3290_v43  ;;  %v3293_v42 = vadd.f32 0.5, %v3289_v63 }
 0x977   :  { %3316 = vst.msk [vmem:[#allocation2 + $0x8] sm:$0xff] %vm24_vm0, %v3311_v44  ;;  %v3288_v27 = vmul.f32 0.5, %v5027_v29 }
 0x978   :  { %v5029_v13 = vpop.eup %5028  ;;  %3315 = vst.msk [vmem:[#allocation2] sm:$0xff] %vm24_vm0, %v3310_v17  ;;  %v4573_v25 = vpack.c.bf16 %v3311_v44, %v3310_v17 }
 0x979   :  { %v5031_v50 = vpop.eup %5030  ;;  %v3313_v45 = vmul.f32 %v5029_v13, %v3293_v42  ;;  %v3292_v33 = vadd.f32 0.5, %v3288_v27 }
 0x97a   :  { %4574 = vmatpush3.bf16.msra.mxu0 %v4573_v25 }
 0x97b   :  { %3318 = vst.msk [vmem:[#allocation2 + $0x18] sm:$0xff] %vm24_vm0, %v3313_v45  ;;  %v3312_v26 = vmul.f32 %v5031_v50, %v3292_v33  ;;  %4575 = vmatprep.subr.bf16.mxu0 %v5097_v16 }
 0x97d   :  { %3317 = vst.msk [vmem:[#allocation2 + $0x10] sm:$0xff] %vm24_vm0, %v3312_v26  ;;  %v4576_v35 = vpack.c.bf16 %v3313_v45, %v3312_v26 }
 0x97f   :  { %4577 = vmatpush3.bf16.msra.mxu0 %v4576_v35 }
 0x982   :  { %4474 = vmatmul.mubr.msk.f32.vlgmr.msra.gmra.mrb[64].mxu0 %vm171_vm1, %v3326_v31 }
 0xa55   :  { %v3396_v21 = vpop.f32.mrb[64].mxu0 }
 0xa56   :  { %3400 = vst.msk [vmem:[%s6431_s5] sm:$0xff] %vm24_vm0, %v3396_v21  ;;  %v4475_v48 = vpop.f32.mrb[65].mxu0 }

</bundles_post_ra>
